<compile_context>
chip_gen: v5e
topology: v5e:2x2
jax: 0.10.0
libtpu: 0.0.40
codegen_flags: <defaults>
</compile_context>

<pallas_src>
import functools

import jax
import jax.numpy as jnp
import numpy as np
from jax import lax
from jax.experimental import pallas as pl
from jax.experimental.pallas import tpu as pltpu


def _round_up(x, m):
    return (x + m - 1) // m * m


def _cdiv(a, b):
    return -(-a // b)


def _two_tc_chip():
    """True only for 2-TensorCore chips (v7x) where a batch split pays off."""
    try:
        kind = jax.devices()[0].device_kind.lower()
    except Exception:
        return False
    return "v7" in kind


def _vmem_limit_bytes():
    """Explicit scoped-VMEM limit with headroom, per generation."""
    try:
        cap = pltpu.get_tpu_info().vmem_capacity_bytes
    except Exception:
        cap = 64 << 20          # safe on every generation (v7x physical = 64 MiB)
    return int(cap * 0.85)


def _pick_time_chunk(T, Bt, Hp, vmem_limit):
    """Largest time chunk whose streamed blocks fit the VMEM budget."""
    per_t = Bt * (3 * Hp + Hp) * 2 * 2      # gi + out, bf16, double-buffered
    fixed = Hp * 3 * Hp * 2 * 2             # whh bf16, double-buffered
    fixed += 2 * Bt * Hp * 4                # h + acc scratch, f32
    fixed += 4 * Hp * 2                     # bhn / small biases
    budget = int(vmem_limit * 0.7)
    tc_max = max(1, (budget - fixed) // per_t)
    return int(max(1, min(T, tc_max)))


def _pick_m_tile(M):
    if M >= 512 and M % 512 == 0:
        return 512
    if M >= 256:
        return 256
    return M                                 # M = Tpad*Bp is a multiple of 8


# ----------------------------------------------------------------------------
# Kernel 1: input projection for all timesteps at once (bf16 output).
#   gi = x_flat @ Wih_T + bgi,   x_flat: (Tpad*Bp, Din) bf16, Wih_T: (Din, 3Hp)
# ----------------------------------------------------------------------------
def _in_proj_kernel(x_ref, w_ref, b_ref, out_ref):
    x = x_ref[...].astype(jnp.bfloat16)
    acc = jnp.dot(x, w_ref[...], preferred_element_type=jnp.float32)
    out_ref[...] = (acc + b_ref[...]).astype(out_ref.dtype)


def input_projection(x_2d, wih_t, bgi):
    M, Din = x_2d.shape
    N3 = wih_t.shape[1]
    Hp = N3 // 3
    tm = _pick_m_tile(M)
    tn = N3 if N3 <= 2048 else Hp            # keep gate columns lane-dense
    grid = (_cdiv(M, tm), N3 // tn)
    return pl.pallas_call(
        _in_proj_kernel,
        out_shape=jax.ShapeDtypeStruct((M, N3), jnp.bfloat16),
        grid=grid,
        in_specs=[
            pl.BlockSpec((tm, Din), lambda i, j: (i, 0)),
            pl.BlockSpec((Din, tn), lambda i, j: (0, j)),
            pl.BlockSpec((1, tn), lambda i, j: (0, j)),
        ],
        out_specs=pl.BlockSpec((tm, tn), lambda i, j: (i, j)),
        compiler_params=pltpu.CompilerParams(
            dimension_semantics=("parallel", "parallel")),
    )(x_2d, wih_t, bgi)


# ----------------------------------------------------------------------------
# Shared GRU step.  gi_t already contains b_ih (+ b_hh for r,z); bhn is the
# hidden bias of the n gate.  Sigmoid uses the EUP approx-reciprocal path.
# ----------------------------------------------------------------------------
def _sigmoid(x):
    return pl.reciprocal(1.0 + jnp.exp(-x), approx=True)


def _gru_step(gi_t, h_prev, whh, bhn, Hp):
    gh = jnp.dot(h_prev.astype(jnp.bfloat16), whh,
                 preferred_element_type=jnp.float32)
    r = _sigmoid(gi_t[:, 0 * Hp:1 * Hp] + gh[:, 0 * Hp:1 * Hp])
    z = _sigmoid(gi_t[:, 1 * Hp:2 * Hp] + gh[:, 1 * Hp:2 * Hp])
    n = jnp.tanh(gi_t[:, 2 * Hp:3 * Hp] + r * (gh[:, 2 * Hp:3 * Hp] + bhn))
    return (1.0 - z) * n + z * h_prev


# ----------------------------------------------------------------------------
# Kernel 2: time-chunked recurrence for a non-final layer (emits h sequence).
#   grid = (batch_chunks, time_chunks); h carried in scratch across time axis.
# ----------------------------------------------------------------------------
def _gru_rec_kernel(gi_ref, whh_ref, bhn_ref, out_ref, h_ref,
                    *, Tc, T_real, needs_mask, Hp, unroll):
    tc = pl.program_id(1)

    @pl.when(tc == 0)
    def _():
        h_ref[...] = jnp.zeros_like(h_ref)

    whh = whh_ref[...]
    bhn = bhn_ref[...]
    t0 = tc * Tc

    def step(t, carry):
        h_prev = h_ref[...]
        h_cand = _gru_step(gi_ref[t], h_prev, whh, bhn, Hp)
        if needs_mask:
            valid = (t0 + t) < T_real
            h_new = jnp.where(valid, h_cand, h_prev)
        else:
            h_new = h_cand
        h_ref[...] = h_new
        out_ref[t] = h_new.astype(out_ref.dtype)
        return carry

    lax.fori_loop(0, Tc, step, 0, unroll=unroll)


def gru_recurrence(gi_tbh, whh_t, bhn, *, T_real, Tc, batch_tile, vmem_limit):
    Tpad, Bp, H3 = gi_tbh.shape
    Hp = H3 // 3
    Bt = batch_tile
    needs_mask = (Tpad != T_real)
    unroll = Tc if Tc <= 8 else 4
    kernel = functools.partial(_gru_rec_kernel, Tc=Tc, T_real=T_real,
                               needs_mask=needs_mask, Hp=Hp, unroll=unroll)
    return pl.pallas_call(
        kernel,
        out_shape=jax.ShapeDtypeStruct((Tpad, Bp, Hp), jnp.bfloat16),
        grid=(Bp // Bt, Tpad // Tc),
        in_specs=[
            pl.BlockSpec((Tc, Bt, H3), lambda b, t: (t, b, 0)),
            pl.BlockSpec((Hp, H3), lambda b, t: (0, 0)),
            pl.BlockSpec((1, Hp), lambda b, t: (0, 0)),
        ],
        out_specs=pl.BlockSpec((Tc, Bt, Hp), lambda b, t: (t, b, 0)),
        scratch_shapes=[pltpu.VMEM((Bt, Hp), jnp.float32)],
        compiler_params=pltpu.CompilerParams(
            dimension_semantics=("parallel", "arbitrary"),
            vmem_limit_bytes=vmem_limit),
    )(gi_tbh, whh_t, bhn)


# ----------------------------------------------------------------------------
# Kernel 3: time-chunked recurrence for the FINAL layer with the head fused:
#   running sum over valid timesteps -> rep = sum/T -> logit = rep @ Wfc_T + b.
# ----------------------------------------------------------------------------
def _gru_rec_head_kernel(gi_ref, whh_ref, bhn_ref, wfc_ref, bfc_ref,
                         logit_ref, rep_ref, h_ref, acc_ref,
                         *, Tc, T_real, needs_mask, Hp, unroll):
    tc = pl.program_id(1)

    @pl.when(tc == 0)
    def _():
        h_ref[...] = jnp.zeros_like(h_ref)
        acc_ref[...] = jnp.zeros_like(acc_ref)

    whh = whh_ref[...]
    bhn = bhn_ref[...]
    t0 = tc * Tc

    def step(t, carry):
        h_prev = h_ref[...]
        h_cand = _gru_step(gi_ref[t], h_prev, whh, bhn, Hp)
        if needs_mask:
            valid = (t0 + t) < T_real
            h_new = jnp.where(valid, h_cand, h_prev)
            acc_ref[...] = acc_ref[...] + jnp.where(valid, h_cand,
                                                    jnp.zeros_like(h_cand))
        else:
            h_new = h_cand
            acc_ref[...] = acc_ref[...] + h_new
        h_ref[...] = h_new
        return carry

    lax.fori_loop(0, Tc, step, 0, unroll=unroll)

    @pl.when(tc == pl.num_programs(1) - 1)
    def _():
        rep = acc_ref[...] * (1.0 / T_real)
        rep_ref[...] = rep.astype(rep_ref.dtype)
        logit = jnp.dot(rep.astype(jnp.bfloat16), wfc_ref[...],
                        preferred_element_type=jnp.float32) + bfc_ref[...]
        logit_ref[...] = logit.astype(logit_ref.dtype)


def gru_recurrence_head(gi_tbh, whh_t, bhn, wfc_t, bfc,
                        *, T_real, Tc, batch_tile, vmem_limit):
    Tpad, Bp, H3 = gi_tbh.shape
    Hp = H3 // 3
    Cp = wfc_t.shape[1]
    Bt = batch_tile
    needs_mask = (Tpad != T_real)
    unroll = Tc if Tc <= 8 else 4
    kernel = functools.partial(_gru_rec_head_kernel, Tc=Tc, T_real=T_real,
                               needs_mask=needs_mask, Hp=Hp, unroll=unroll)
    return pl.pallas_call(
        kernel,
        out_shape=(
            jax.ShapeDtypeStruct((Bp, Cp), jnp.float32),
            jax.ShapeDtypeStruct((Bp, Hp), jnp.float32),
        ),
        grid=(Bp // Bt, Tpad // Tc),
        in_specs=[
            pl.BlockSpec((Tc, Bt, H3), lambda b, t: (t, b, 0)),
            pl.BlockSpec((Hp, H3), lambda b, t: (0, 0)),
            pl.BlockSpec((1, Hp), lambda b, t: (0, 0)),
            pl.BlockSpec((Hp, Cp), lambda b, t: (0, 0)),
            pl.BlockSpec((1, Cp), lambda b, t: (0, 0)),
        ],
        out_specs=(
            pl.BlockSpec((Bt, Cp), lambda b, t: (b, 0)),
            pl.BlockSpec((Bt, Hp), lambda b, t: (b, 0)),
        ),
        scratch_shapes=[pltpu.VMEM((Bt, Hp), jnp.float32),
                        pltpu.VMEM((Bt, Hp), jnp.float32)],
        compiler_params=pltpu.CompilerParams(
            dimension_semantics=("parallel", "arbitrary"),
            vmem_limit_bytes=vmem_limit),
    )(gi_tbh, whh_t, bhn, wfc_t, bfc)


# ----------------------------------------------------------------------------
# Parameter init (PyTorch layout, f32) + one-time prep (pad/transpose/bf16).
# ----------------------------------------------------------------------------
def init_params(key, input_size, hidden_size, n_layers, n_classes):
    params = {"gru": [], "fc": None}
    k = 1.0 / np.sqrt(hidden_size)
    for layer in range(n_layers):
        d_in = input_size if layer == 0 else hidden_size
        key, k1, k2, k3, k4 = jax.random.split(key, 5)
        params["gru"].append({
            "w_ih": jax.random.uniform(k1, (3 * hidden_size, d_in), jnp.float32, -k, k),
            "w_hh": jax.random.uniform(k2, (3 * hidden_size, hidden_size), jnp.float32, -k, k),
            "b_ih": jax.random.uniform(k3, (3 * hidden_size,), jnp.float32, -k, k),
            "b_hh": jax.random.uniform(k4, (3 * hidden_size,), jnp.float32, -k, k),
        })
    key, k1, k2 = jax.random.split(key, 3)
    params["fc"] = {
        "w": jax.random.uniform(k1, (n_classes, hidden_size), jnp.float32, -k, k),
        "b": jax.random.uniform(k2, (n_classes,), jnp.float32, -k, k),
    }
    return params


def prepare_params(params):
    """One-time weight prep: transpose, lane-pad H->Hp / C->Cp, align gates to
    Hp columns, fold biases (b_ih + b_hh for r,z into gi bias), cast to bf16."""
    H = params["gru"][0]["w_hh"].shape[1]
    Hp = _round_up(H, 128)
    prep = {"gru": [], "fc": None}
    for l, lp in enumerate(params["gru"]):
        d_in = lp["w_ih"].shape[1]
        d_in_p = d_in if l == 0 else Hp          # layers >0 consume padded hidden
        wih = jnp.zeros((d_in_p, 3 * Hp), jnp.float32)
        whh = jnp.zeros((Hp, 3 * Hp), jnp.float32)
        bgi = jnp.zeros((1, 3 * Hp), jnp.float32)
        for g in range(3):
            wih = wih.at[:d_in, g * Hp:g * Hp + H].set(lp["w_ih"][g * H:(g + 1) * H, :].T)
            whh = whh.at[:H, g * Hp:g * Hp + H].set(lp["w_hh"][g * H:(g + 1) * H, :].T)
            bg = lp["b_ih"][g * H:(g + 1) * H]
            if g < 2:                              # r,z: b_ih + b_hh folded into gi
                bg = bg + lp["b_hh"][g * H:(g + 1) * H]
            bgi = bgi.at[0, g * Hp:g * Hp + H].set(bg)
        bhn = jnp.zeros((1, Hp), jnp.float32).at[0, :H].set(lp["b_hh"][2 * H:3 * H])
        prep["gru"].append({
            "wih_t": wih.astype(jnp.bfloat16),
            "whh_t": whh.astype(jnp.bfloat16),
            "bgi": bgi,
            "bhn": bhn,
        })
    C = params["fc"]["w"].shape[0]
    Cp = _round_up(C, 128)
    wfc = jnp.zeros((Hp, Cp), jnp.float32).at[:H, :C].set(params["fc"]["w"].T)
    bfc = jnp.zeros((1, Cp), jnp.float32).at[0, :C].set(params["fc"]["b"])
    prep["fc"] = {"w_t": wfc.astype(jnp.bfloat16), "b": bfc}
    return prep


# ----------------------------------------------------------------------------
# Full module forward.
# ----------------------------------------------------------------------------
def gru_forward(prep, x_btd, *, hidden_size, n_classes):
    """x_btd: (B, T, D) batch-first, matching the PyTorch module."""
    B, T, D = x_btd.shape
    Bp = _round_up(B, 8)
    Hp = prep["gru"][0]["whh_t"].shape[0]

    # Batch split only on 2-TensorCore chips (v7x); on v5e/v6e it just doubles
    # the sequential recurrence loop.
    Bt = Bp // 2 if (_two_tc_chip() and Bp % 16 == 0) else Bp

    vmem_limit = _vmem_limit_bytes()
    Tc = _pick_time_chunk(T, Bt, Hp, vmem_limit)
    Tpad = _cdiv(T, Tc) * Tc

    x = jnp.transpose(x_btd, (1, 0, 2)).astype(jnp.bfloat16)      # (T, B, D)
    if Tpad != T or Bp != B:
        x = jnp.pad(x, ((0, Tpad - T), (0, Bp - B), (0, 0)))

    n_layers = len(prep["gru"])
    h_seq = x
    logit_p = rep_p = None
    for l, lp in enumerate(prep["gru"]):
        Din = h_seq.shape[2]
        gi = input_projection(h_seq.reshape(Tpad * Bp, Din), lp["wih_t"], lp["bgi"])
        gi = gi.reshape(Tpad, Bp, 3 * Hp)
        if l < n_layers - 1:
            h_seq = gru_recurrence(gi, lp["whh_t"], lp["bhn"],
                                   T_real=T, Tc=Tc, batch_tile=Bt,
                                   vmem_limit=vmem_limit)
        else:
            logit_p, rep_p = gru_recurrence_head(
                gi, lp["whh_t"], lp["bhn"], prep["fc"]["w_t"], prep["fc"]["b"],
                T_real=T, Tc=Tc, batch_tile=Bt, vmem_limit=vmem_limit)
    return logit_p[:B, :n_classes], rep_p[:B, :hidden_size]


# ----------------------------------------------------------------------------
# Pure-JAX f32 reference (lax.scan) for correctness.
# ----------------------------------------------------------------------------
def gru_forward_ref(params, x_btd):
    h_seq = jnp.transpose(x_btd, (1, 0, 2)).astype(jnp.float32)   # (T, B, D)
    for lp in params["gru"]:
        H = lp["w_hh"].shape[1]
        B = h_seq.shape[1]

        def step(h_prev, x_t, lp=lp, H=H):
            gi = x_t @ lp["w_ih"].T + lp["b_ih"]
            gh = h_prev @ lp["w_hh"].T + lp["b_hh"]
            r = jax.nn.sigmoid(gi[:, :H] + gh[:, :H])
            z = jax.nn.sigmoid(gi[:, H:2 * H] + gh[:, H:2 * H])
            n = jnp.tanh(gi[:, 2 * H:] + r * gh[:, 2 * H:])
            h_new = (1.0 - z) * n + z * h_prev
            return h_new, h_new

        _, h_seq = jax.lax.scan(step, jnp.zeros((B, H), jnp.float32), h_seq)
    rep = jnp.mean(h_seq, axis=0)
    logit = rep @ params["fc"]["w"].T + params["fc"]["b"]
    return logit, rep


if __name__ == "__main__":
    # x: (batch, n_frames, input_size)
    B, T, D = 2, 8, 16
    H, n_layers, n_classes = 32, 2, 5

    key = jax.random.PRNGKey(0)
    key, xkey = jax.random.split(key)
    x = jax.random.normal(xkey, (B, T, D), dtype=jnp.float32)

    params = init_params(key, D, H, n_layers, n_classes)
    prep = prepare_params(params)          # one-time: transpose/pad/bf16-cast

    fwd = jax.jit(functools.partial(gru_forward, hidden_size=H, n_classes=n_classes))
    logit, representation = jax.block_until_ready(fwd(prep, x))

    logit_ref, rep_ref = jax.block_until_ready(gru_forward_ref(params, x))

    assert logit.shape == (B, n_classes) and representation.shape == (B, H)
    # bf16 matmul weights + bf16 gi/h_seq intermediates -> looser tolerance.
    np.testing.assert_allclose(np.asarray(logit), np.asarray(logit_ref), atol=5e-2, rtol=5e-2)
    np.testing.assert_allclose(np.asarray(representation), np.asarray(rep_ref), atol=5e-2, rtol=5e-2)

    print("KERNEL_OK")
</pallas_src>

<mosaic_0001>
module attributes {stable_mosaic.version = 11 : i64} {
  func.func @_in_proj_kernel(%arg0: i32, %arg1: i32, %arg2: memref<64x16xbf16, #tpu.memory_space<vmem>>, %arg3: memref<16x384xbf16, #tpu.memory_space<vmem>>, %arg4: memref<1x384xf32, #tpu.memory_space<vmem>>, %arg5: memref<64x384xbf16, #tpu.memory_space<vmem>>) attributes {dimension_semantics = [#tpu.dimension_semantics<parallel>, #tpu.dimension_semantics<parallel>], iteration_bounds = array<i64: 1, 1>, scalar_prefetch = 0 : i64, scratch_operands = 0 : i64, tpu.core_type = #tpu.core_type<tc>, window_params = [{transform_indices = @transform_0, window_bounds = array<i64: 64, 16>}, {transform_indices = @transform_1, window_bounds = array<i64: 16, 384>}, {transform_indices = @transform_2, window_bounds = array<i64: 1, 384>}, {transform_indices = @transform_3, window_bounds = array<i64: 64, 384>}]} {
    %c0 = arith.constant 0 : index
    %c0_0 = arith.constant 0 : index
    %0 = vector.load %arg2[%c0, %c0_0] : memref<64x16xbf16, #tpu.memory_space<vmem>>, vector<64x16xbf16>
    %c0_1 = arith.constant 0 : index
    %c0_2 = arith.constant 0 : index
    %1 = vector.load %arg3[%c0_1, %c0_2] : memref<16x384xbf16, #tpu.memory_space<vmem>>, vector<16x384xbf16>
    %cst = arith.constant dense<0.000000e+00> : vector<64x384xf32>
    %2 = tpu.matmul %0, %1, %cst {dimension_numbers = #tpu.dot_dimension_numbers<[1], [0], [0], [1], [0, 0, 1, 1], [], []>} : vector<64x16xbf16>, vector<16x384xbf16>, vector<64x384xf32> -> vector<64x384xf32>
    %c0_3 = arith.constant 0 : index
    %c0_4 = arith.constant 0 : index
    %3 = vector.load %arg4[%c0_3, %c0_4] : memref<1x384xf32, #tpu.memory_space<vmem>>, vector<1x384xf32>
    %4 = vector.broadcast %3 : vector<1x384xf32> to vector<64x384xf32>
    %5 = arith.addf %2, %4 : vector<64x384xf32>
    %6 = arith.truncf %5 : vector<64x384xf32> to vector<64x384xbf16>
    %c0_5 = arith.constant 0 : index
    %c0_6 = arith.constant 0 : index
    %7 = vector.load %arg5[%c0_5, %c0_6] : memref<64x384xbf16, #tpu.memory_space<vmem>>, vector<64x384xbf16>
    tpu.vector_store %arg5[%c0_5, %c0_6], %6 {strides = array<i32>} : memref<64x384xbf16, #tpu.memory_space<vmem>>, vector<64x384xbf16>,
    return
  }
  func.func @transform_0(%arg0: i32, %arg1: i32) -> (i32, i32) {
    %c0_i32 = arith.constant 0 : i32
    %c0_i32_0 = arith.constant 0 : i32
    return %arg0, %c0_i32 : i32, i32
  }
  func.func @transform_1(%arg0: i32, %arg1: i32) -> (i32, i32) {
    %c0_i32 = arith.constant 0 : i32
    %c0_i32_0 = arith.constant 0 : i32
    return %c0_i32, %arg1 : i32, i32
  }
  func.func @transform_2(%arg0: i32, %arg1: i32) -> (i32, i32) {
    %c0_i32 = arith.constant 0 : i32
    %c0_i32_0 = arith.constant 0 : i32
    return %c0_i32, %arg1 : i32, i32
  }
  func.func @transform_3(%arg0: i32, %arg1: i32) -> (i32, i32) {
    %c0_i32 = arith.constant 0 : i32
    return %arg0, %arg1 : i32, i32
  }
}

module attributes {stable_mosaic.version = 11 : i64} {
  func.func @_in_proj_kernel(%arg0: i32, %arg1: i32, %arg2: memref<64x128xbf16, #tpu.memory_space<vmem>>, %arg3: memref<128x384xbf16, #tpu.memory_space<vmem>>, %arg4: memref<1x384xf32, #tpu.memory_space<vmem>>, %arg5: memref<64x384xbf16, #tpu.memory_space<vmem>>) attributes {dimension_semantics = [#tpu.dimension_semantics<parallel>, #tpu.dimension_semantics<parallel>], iteration_bounds = array<i64: 1, 1>, scalar_prefetch = 0 : i64, scratch_operands = 0 : i64, tpu.core_type = #tpu.core_type<tc>, window_params = [{transform_indices = @transform_0, window_bounds = array<i64: 64, 128>}, {transform_indices = @transform_1, window_bounds = array<i64: 128, 384>}, {transform_indices = @transform_2, window_bounds = array<i64: 1, 384>}, {transform_indices = @transform_3, window_bounds = array<i64: 64, 384>}]} {
    %c0 = arith.constant 0 : index
    %c0_0 = arith.constant 0 : index
    %0 = vector.load %arg2[%c0, %c0_0] : memref<64x128xbf16, #tpu.memory_space<vmem>>, vector<64x128xbf16>
    %c0_1 = arith.constant 0 : index
    %c0_2 = arith.constant 0 : index
    %1 = vector.load %arg3[%c0_1, %c0_2] : memref<128x384xbf16, #tpu.memory_space<vmem>>, vector<128x384xbf16>
    %cst = arith.constant dense<0.000000e+00> : vector<64x384xf32>
    %2 = tpu.matmul %0, %1, %cst {dimension_numbers = #tpu.dot_dimension_numbers<[1], [0], [0], [1], [0, 0, 1, 1], [], []>} : vector<64x128xbf16>, vector<128x384xbf16>, vector<64x384xf32> -> vector<64x384xf32>
    %c0_3 = arith.constant 0 : index
    %c0_4 = arith.constant 0 : index
    %3 = vector.load %arg4[%c0_3, %c0_4] : memref<1x384xf32, #tpu.memory_space<vmem>>, vector<1x384xf32>
    %4 = vector.broadcast %3 : vector<1x384xf32> to vector<64x384xf32>
    %5 = arith.addf %2, %4 : vector<64x384xf32>
    %6 = arith.truncf %5 : vector<64x384xf32> to vector<64x384xbf16>
    %c0_5 = arith.constant 0 : index
    %c0_6 = arith.constant 0 : index
    %7 = vector.load %arg5[%c0_5, %c0_6] : memref<64x384xbf16, #tpu.memory_space<vmem>>, vector<64x384xbf16>
    tpu.vector_store %arg5[%c0_5, %c0_6], %6 {strides = array<i32>} : memref<64x384xbf16, #tpu.memory_space<vmem>>, vector<64x384xbf16>,
    return
  }
  func.func @transform_0(%arg0: i32, %arg1: i32) -> (i32, i32) {
    %c0_i32 = arith.constant 0 : i32
    %c0_i32_0 = arith.constant 0 : i32
    return %arg0, %c0_i32 : i32, i32
  }
  func.func @transform_1(%arg0: i32, %arg1: i32) -> (i32, i32) {
    %c0_i32 = arith.constant 0 : i32
    %c0_i32_0 = arith.constant 0 : i32
    return %c0_i32, %arg1 : i32, i32
  }
  func.func @transform_2(%arg0: i32, %arg1: i32) -> (i32, i32) {
    %c0_i32 = arith.constant 0 : i32
    %c0_i32_0 = arith.constant 0 : i32
    return %c0_i32, %arg1 : i32, i32
  }
  func.func @transform_3(%arg0: i32, %arg1: i32) -> (i32, i32) {
    %c0_i32 = arith.constant 0 : i32
    return %arg0, %arg1 : i32, i32
  }
}

module attributes {stable_mosaic.version = 11 : i64} {
  func.func @_gru_rec_head_kernel(%arg0: i32, %arg1: i32, %arg2: memref<8x8x384xbf16, #tpu.memory_space<vmem>>, %arg3: memref<128x384xbf16, #tpu.memory_space<vmem>>, %arg4: memref<1x128xf32, #tpu.memory_space<vmem>>, %arg5: memref<128x128xbf16, #tpu.memory_space<vmem>>, %arg6: memref<1x128xf32, #tpu.memory_space<vmem>>, %arg7: memref<8x128xf32, #tpu.memory_space<vmem>>, %arg8: memref<8x128xf32, #tpu.memory_space<vmem>>, %arg9: memref<8x128xf32, #tpu.memory_space<vmem>>, %arg10: memref<8x128xf32, #tpu.memory_space<vmem>>) attributes {dimension_semantics = [#tpu.dimension_semantics<parallel>, #tpu.dimension_semantics<arbitrary>], iteration_bounds = array<i64: 1, 1>, scalar_prefetch = 0 : i64, scratch_operands = 2 : i64, tpu.core_type = #tpu.core_type<tc>, window_params = [{transform_indices = @transform_0, window_bounds = array<i64: 8, 8, 384>}, {pipeline_mode = #tpu.pipeline_mode<synchronous>, transform_indices = @transform_1, window_bounds = array<i64: 128, 384>}, {pipeline_mode = #tpu.pipeline_mode<synchronous>, transform_indices = @transform_2, window_bounds = array<i64: 1, 128>}, {pipeline_mode = #tpu.pipeline_mode<synchronous>, transform_indices = @transform_3, window_bounds = array<i64: 128, 128>}, {pipeline_mode = #tpu.pipeline_mode<synchronous>, transform_indices = @transform_4, window_bounds = array<i64: 1, 128>}, {transform_indices = @transform_5, window_bounds = array<i64: 8, 128>}, {transform_indices = @transform_6, window_bounds = array<i64: 8, 128>}]} {
    %c0_i32 = arith.constant 0 : i32
    %0 = arith.cmpi eq, %arg1, %c0_i32 : i32
    %1 = arith.extui %0 : i1 to i32
    %c0_i32_0 = arith.constant 0 : i32
    %2 = arith.cmpi ne, %1, %c0_i32_0 : i32
    scf.if %2 {
      %cst_134 = arith.constant 0.000000e+00 : f32
      %352 = vector.broadcast %cst_134 : f32 to vector<8x128xf32>
      %c0_135 = arith.constant 0 : index
      %c0_136 = arith.constant 0 : index
      %353 = vector.load %arg9[%c0_135, %c0_136] : memref<8x128xf32, #tpu.memory_space<vmem>>, vector<8x128xf32>
      tpu.vector_store %arg9[%c0_135, %c0_136], %352 {strides = array<i32>} : memref<8x128xf32, #tpu.memory_space<vmem>>, vector<8x128xf32>,
      %cst_137 = arith.constant 0.000000e+00 : f32
      %354 = vector.broadcast %cst_137 : f32 to vector<8x128xf32>
      %c0_138 = arith.constant 0 : index
      %c0_139 = arith.constant 0 : index
      %355 = vector.load %arg10[%c0_138, %c0_139] : memref<8x128xf32, #tpu.memory_space<vmem>>, vector<8x128xf32>
      tpu.vector_store %arg10[%c0_138, %c0_139], %354 {strides = array<i32>} : memref<8x128xf32, #tpu.memory_space<vmem>>, vector<8x128xf32>,
    } else {
    }
    %c0 = arith.constant 0 : index
    %c0_1 = arith.constant 0 : index
    %3 = vector.load %arg3[%c0, %c0_1] : memref<128x384xbf16, #tpu.memory_space<vmem>>, vector<128x384xbf16>
    %c0_2 = arith.constant 0 : index
    %c0_3 = arith.constant 0 : index
    %4 = vector.load %arg4[%c0_2, %c0_3] : memref<1x128xf32, #tpu.memory_space<vmem>>, vector<1x128xf32>
    %c0_i32_4 = arith.constant 0 : i32
    %c0_5 = arith.constant 0 : index
    %c0_6 = arith.constant 0 : index
    %5 = vector.load %arg9[%c0_5, %c0_6] : memref<8x128xf32, #tpu.memory_space<vmem>>, vector<8x128xf32>
    %6 = arith.index_cast %c0_i32_4 : i32 to index
    %c0_7 = arith.constant 0 : index
    %c0_8 = arith.constant 0 : index
    %7 = vector.load %arg2[%6, %c0_7, %c0_8] : memref<8x8x384xbf16, #tpu.memory_space<vmem>>, vector<1x8x384xbf16>
    %8 = vector.shape_cast %7 : vector<1x8x384xbf16> to vector<8x384xbf16>
    %9 = arith.truncf %5 : vector<8x128xf32> to vector<8x128xbf16>
    %cst = arith.constant dense<0.000000e+00> : vector<8x384xf32>
    %10 = tpu.matmul %9, %3, %cst {dimension_numbers = #tpu.dot_dimension_numbers<[1], [0], [0], [1], [0, 0, 1, 1], [], []>} : vector<8x128xbf16>, vector<128x384xbf16>, vector<8x384xf32> -> vector<8x384xf32>
    %11 = vector.extract_strided_slice %8 {offsets = [0, 0], sizes = [8, 128], strides = [1, 1]} : vector<8x384xbf16> to vector<8x128xbf16>
    %12 = vector.extract_strided_slice %10 {offsets = [0, 0], sizes = [8, 128], strides = [1, 1]} : vector<8x384xf32> to vector<8x128xf32>
    %13 = arith.extf %11 : vector<8x128xbf16> to vector<8x128xf32>
    %14 = arith.addf %13, %12 : vector<8x128xf32>
    %cst_9 = arith.constant 0.000000e+00 : f32
    %15 = vector.broadcast %cst_9 : f32 to vector<8x128xf32>
    %16 = arith.subf %15, %14 : vector<8x128xf32>
    %17 = math.exp %16 : vector<8x128xf32>
    %cst_10 = arith.constant 1.000000e+00 : f32
    %18 = vector.broadcast %cst_10 : f32 to vector<8x128xf32>
    %19 = arith.addf %18, %17 : vector<8x128xf32>
    %20 = tpu.reciprocal %19 {approx = true} : vector<8x128xf32> -> vector<8x128xf32>
    %21 = vector.extract_strided_slice %8 {offsets = [0, 128], sizes = [8, 128], strides = [1, 1]} : vector<8x384xbf16> to vector<8x128xbf16>
    %22 = vector.extract_strided_slice %10 {offsets = [0, 128], sizes = [8, 128], strides = [1, 1]} : vector<8x384xf32> to vector<8x128xf32>
    %23 = arith.extf %21 : vector<8x128xbf16> to vector<8x128xf32>
    %24 = arith.addf %23, %22 : vector<8x128xf32>
    %cst_11 = arith.constant 0.000000e+00 : f32
    %25 = vector.broadcast %cst_11 : f32 to vector<8x128xf32>
    %26 = arith.subf %25, %24 : vector<8x128xf32>
    %27 = math.exp %26 : vector<8x128xf32>
    %cst_12 = arith.constant 1.000000e+00 : f32
    %28 = vector.broadcast %cst_12 : f32 to vector<8x128xf32>
    %29 = arith.addf %28, %27 : vector<8x128xf32>
    %30 = tpu.reciprocal %29 {approx = true} : vector<8x128xf32> -> vector<8x128xf32>
    %31 = vector.extract_strided_slice %8 {offsets = [0, 256], sizes = [8, 128], strides = [1, 1]} : vector<8x384xbf16> to vector<8x128xbf16>
    %32 = vector.extract_strided_slice %10 {offsets = [0, 256], sizes = [8, 128], strides = [1, 1]} : vector<8x384xf32> to vector<8x128xf32>
    %33 = vector.broadcast %4 : vector<1x128xf32> to vector<8x128xf32>
    %34 = arith.addf %32, %33 : vector<8x128xf32>
    %35 = arith.mulf %20, %34 : vector<8x128xf32>
    %36 = arith.extf %31 : vector<8x128xbf16> to vector<8x128xf32>
    %37 = arith.addf %36, %35 : vector<8x128xf32>
    %38 = math.tanh %37 : vector<8x128xf32>
    %cst_13 = arith.constant 1.000000e+00 : f32
    %39 = vector.broadcast %cst_13 : f32 to vector<8x128xf32>
    %40 = arith.subf %39, %30 : vector<8x128xf32>
    %41 = arith.mulf %40, %38 : vector<8x128xf32>
    %42 = arith.mulf %30, %5 : vector<8x128xf32>
    %43 = arith.addf %41, %42 : vector<8x128xf32>
    %c0_14 = arith.constant 0 : index
    %c0_15 = arith.constant 0 : index
    %44 = vector.load %arg10[%c0_14, %c0_15] : memref<8x128xf32, #tpu.memory_space<vmem>>, vector<8x128xf32>
    %45 = arith.addf %44, %43 : vector<8x128xf32>
    %c0_16 = arith.constant 0 : index
    %c0_17 = arith.constant 0 : index
    %46 = vector.load %arg10[%c0_16, %c0_17] : memref<8x128xf32, #tpu.memory_space<vmem>>, vector<8x128xf32>
    tpu.vector_store %arg10[%c0_16, %c0_17], %45 {strides = array<i32>} : memref<8x128xf32, #tpu.memory_space<vmem>>, vector<8x128xf32>,
    %c0_18 = arith.constant 0 : index
    %c0_19 = arith.constant 0 : index
    %47 = vector.load %arg9[%c0_18, %c0_19] : memref<8x128xf32, #tpu.memory_space<vmem>>, vector<8x128xf32>
    tpu.vector_store %arg9[%c0_18, %c0_19], %43 {strides = array<i32>} : memref<8x128xf32, #tpu.memory_space<vmem>>, vector<8x128xf32>,
    %c1_i32 = arith.constant 1 : i32
    %c0_20 = arith.constant 0 : index
    %c0_21 = arith.constant 0 : index
    %48 = vector.load %arg9[%c0_20, %c0_21] : memref<8x128xf32, #tpu.memory_space<vmem>>, vector<8x128xf32>
    %49 = arith.index_cast %c1_i32 : i32 to index
    %c0_22 = arith.constant 0 : index
    %c0_23 = arith.constant 0 : index
    %50 = vector.load %arg2[%49, %c0_22, %c0_23] : memref<8x8x384xbf16, #tpu.memory_space<vmem>>, vector<1x8x384xbf16>
    %51 = vector.shape_cast %50 : vector<1x8x384xbf16> to vector<8x384xbf16>
    %52 = arith.truncf %48 : vector<8x128xf32> to vector<8x128xbf16>
    %cst_24 = arith.constant dense<0.000000e+00> : vector<8x384xf32>
    %53 = tpu.matmul %52, %3, %cst_24 {dimension_numbers = #tpu.dot_dimension_numbers<[1], [0], [0], [1], [0, 0, 1, 1], [], []>} : vector<8x128xbf16>, vector<128x384xbf16>, vector<8x384xf32> -> vector<8x384xf32>
    %54 = vector.extract_strided_slice %51 {offsets = [0, 0], sizes = [8, 128], strides = [1, 1]} : vector<8x384xbf16> to vector<8x128xbf16>
    %55 = vector.extract_strided_slice %53 {offsets = [0, 0], sizes = [8, 128], strides = [1, 1]} : vector<8x384xf32> to vector<8x128xf32>
    %56 = arith.extf %54 : vector<8x128xbf16> to vector<8x128xf32>
    %57 = arith.addf %56, %55 : vector<8x128xf32>
    %cst_25 = arith.constant 0.000000e+00 : f32
    %58 = vector.broadcast %cst_25 : f32 to vector<8x128xf32>
    %59 = arith.subf %58, %57 : vector<8x128xf32>
    %60 = math.exp %59 : vector<8x128xf32>
    %cst_26 = arith.constant 1.000000e+00 : f32
    %61 = vector.broadcast %cst_26 : f32 to vector<8x128xf32>
    %62 = arith.addf %61, %60 : vector<8x128xf32>
    %63 = tpu.reciprocal %62 {approx = true} : vector<8x128xf32> -> vector<8x128xf32>
    %64 = vector.extract_strided_slice %51 {offsets = [0, 128], sizes = [8, 128], strides = [1, 1]} : vector<8x384xbf16> to vector<8x128xbf16>
    %65 = vector.extract_strided_slice %53 {offsets = [0, 128], sizes = [8, 128], strides = [1, 1]} : vector<8x384xf32> to vector<8x128xf32>
    %66 = arith.extf %64 : vector<8x128xbf16> to vector<8x128xf32>
    %67 = arith.addf %66, %65 : vector<8x128xf32>
    %cst_27 = arith.constant 0.000000e+00 : f32
    %68 = vector.broadcast %cst_27 : f32 to vector<8x128xf32>
    %69 = arith.subf %68, %67 : vector<8x128xf32>
    %70 = math.exp %69 : vector<8x128xf32>
    %cst_28 = arith.constant 1.000000e+00 : f32
    %71 = vector.broadcast %cst_28 : f32 to vector<8x128xf32>
    %72 = arith.addf %71, %70 : vector<8x128xf32>
    %73 = tpu.reciprocal %72 {approx = true} : vector<8x128xf32> -> vector<8x128xf32>
    %74 = vector.extract_strided_slice %51 {offsets = [0, 256], sizes = [8, 128], strides = [1, 1]} : vector<8x384xbf16> to vector<8x128xbf16>
    %75 = vector.extract_strided_slice %53 {offsets = [0, 256], sizes = [8, 128], strides = [1, 1]} : vector<8x384xf32> to vector<8x128xf32>
    %76 = vector.broadcast %4 : vector<1x128xf32> to vector<8x128xf32>
    %77 = arith.addf %75, %76 : vector<8x128xf32>
    %78 = arith.mulf %63, %77 : vector<8x128xf32>
    %79 = arith.extf %74 : vector<8x128xbf16> to vector<8x128xf32>
    %80 = arith.addf %79, %78 : vector<8x128xf32>
    %81 = math.tanh %80 : vector<8x128xf32>
    %cst_29 = arith.constant 1.000000e+00 : f32
    %82 = vector.broadcast %cst_29 : f32 to vector<8x128xf32>
    %83 = arith.subf %82, %73 : vector<8x128xf32>
    %84 = arith.mulf %83, %81 : vector<8x128xf32>
    %85 = arith.mulf %73, %48 : vector<8x128xf32>
    %86 = arith.addf %84, %85 : vector<8x128xf32>
    %c0_30 = arith.constant 0 : index
    %c0_31 = arith.constant 0 : index
    %87 = vector.load %arg10[%c0_30, %c0_31] : memref<8x128xf32, #tpu.memory_space<vmem>>, vector<8x128xf32>
    %88 = arith.addf %87, %86 : vector<8x128xf32>
    %c0_32 = arith.constant 0 : index
    %c0_33 = arith.constant 0 : index
    %89 = vector.load %arg10[%c0_32, %c0_33] : memref<8x128xf32, #tpu.memory_space<vmem>>, vector<8x128xf32>
    tpu.vector_store %arg10[%c0_32, %c0_33], %88 {strides = array<i32>} : memref<8x128xf32, #tpu.memory_space<vmem>>, vector<8x128xf32>,
    %c0_34 = arith.constant 0 : index
    %c0_35 = arith.constant 0 : index
    %90 = vector.load %arg9[%c0_34, %c0_35] : memref<8x128xf32, #tpu.memory_space<vmem>>, vector<8x128xf32>
    tpu.vector_store %arg9[%c0_34, %c0_35], %86 {strides = array<i32>} : memref<8x128xf32, #tpu.memory_space<vmem>>, vector<8x128xf32>,
    %c2_i32 = arith.constant 2 : i32
    %c0_36 = arith.constant 0 : index
    %c0_37 = arith.constant 0 : index
    %91 = vector.load %arg9[%c0_36, %c0_37] : memref<8x128xf32, #tpu.memory_space<vmem>>, vector<8x128xf32>
    %92 = arith.index_cast %c2_i32 : i32 to index
    %c0_38 = arith.constant 0 : index
    %c0_39 = arith.constant 0 : index
    %93 = vector.load %arg2[%92, %c0_38, %c0_39] : memref<8x8x384xbf16, #tpu.memory_space<vmem>>, vector<1x8x384xbf16>
    %94 = vector.shape_cast %93 : vector<1x8x384xbf16> to vector<8x384xbf16>
    %95 = arith.truncf %91 : vector<8x128xf32> to vector<8x128xbf16>
    %cst_40 = arith.constant dense<0.000000e+00> : vector<8x384xf32>
    %96 = tpu.matmul %95, %3, %cst_40 {dimension_numbers = #tpu.dot_dimension_numbers<[1], [0], [0], [1], [0, 0, 1, 1], [], []>} : vector<8x128xbf16>, vector<128x384xbf16>, vector<8x384xf32> -> vector<8x384xf32>
    %97 = vector.extract_strided_slice %94 {offsets = [0, 0], sizes = [8, 128], strides = [1, 1]} : vector<8x384xbf16> to vector<8x128xbf16>
    %98 = vector.extract_strided_slice %96 {offsets = [0, 0], sizes = [8, 128], strides = [1, 1]} : vector<8x384xf32> to vector<8x128xf32>
    %99 = arith.extf %97 : vector<8x128xbf16> to vector<8x128xf32>
    %100 = arith.addf %99, %98 : vector<8x128xf32>
    %cst_41 = arith.constant 0.000000e+00 : f32
    %101 = vector.broadcast %cst_41 : f32 to vector<8x128xf32>
    %102 = arith.subf %101, %100 : vector<8x128xf32>
    %103 = math.exp %102 : vector<8x128xf32>
    %cst_42 = arith.constant 1.000000e+00 : f32
    %104 = vector.broadcast %cst_42 : f32 to vector<8x128xf32>
    %105 = arith.addf %104, %103 : vector<8x128xf32>
    %106 = tpu.reciprocal %105 {approx = true} : vector<8x128xf32> -> vector<8x128xf32>
    %107 = vector.extract_strided_slice %94 {offsets = [0, 128], sizes = [8, 128], strides = [1, 1]} : vector<8x384xbf16> to vector<8x128xbf16>
    %108 = vector.extract_strided_slice %96 {offsets = [0, 128], sizes = [8, 128], strides = [1, 1]} : vector<8x384xf32> to vector<8x128xf32>
    %109 = arith.extf %107 : vector<8x128xbf16> to vector<8x128xf32>
    %110 = arith.addf %109, %108 : vector<8x128xf32>
    %cst_43 = arith.constant 0.000000e+00 : f32
    %111 = vector.broadcast %cst_43 : f32 to vector<8x128xf32>
    %112 = arith.subf %111, %110 : vector<8x128xf32>
    %113 = math.exp %112 : vector<8x128xf32>
    %cst_44 = arith.constant 1.000000e+00 : f32
    %114 = vector.broadcast %cst_44 : f32 to vector<8x128xf32>
    %115 = arith.addf %114, %113 : vector<8x128xf32>
    %116 = tpu.reciprocal %115 {approx = true} : vector<8x128xf32> -> vector<8x128xf32>
    %117 = vector.extract_strided_slice %94 {offsets = [0, 256], sizes = [8, 128], strides = [1, 1]} : vector<8x384xbf16> to vector<8x128xbf16>
    %118 = vector.extract_strided_slice %96 {offsets = [0, 256], sizes = [8, 128], strides = [1, 1]} : vector<8x384xf32> to vector<8x128xf32>
    %119 = vector.broadcast %4 : vector<1x128xf32> to vector<8x128xf32>
    %120 = arith.addf %118, %119 : vector<8x128xf32>
    %121 = arith.mulf %106, %120 : vector<8x128xf32>
    %122 = arith.extf %117 : vector<8x128xbf16> to vector<8x128xf32>
    %123 = arith.addf %122, %121 : vector<8x128xf32>
    %124 = math.tanh %123 : vector<8x128xf32>
    %cst_45 = arith.constant 1.000000e+00 : f32
    %125 = vector.broadcast %cst_45 : f32 to vector<8x128xf32>
    %126 = arith.subf %125, %116 : vector<8x128xf32>
    %127 = arith.mulf %126, %124 : vector<8x128xf32>
    %128 = arith.mulf %116, %91 : vector<8x128xf32>
    %129 = arith.addf %127, %128 : vector<8x128xf32>
    %c0_46 = arith.constant 0 : index
    %c0_47 = arith.constant 0 : index
    %130 = vector.load %arg10[%c0_46, %c0_47] : memref<8x128xf32, #tpu.memory_space<vmem>>, vector<8x128xf32>
    %131 = arith.addf %130, %129 : vector<8x128xf32>
    %c0_48 = arith.constant 0 : index
    %c0_49 = arith.constant 0 : index
    %132 = vector.load %arg10[%c0_48, %c0_49] : memref<8x128xf32, #tpu.memory_space<vmem>>, vector<8x128xf32>
    tpu.vector_store %arg10[%c0_48, %c0_49], %131 {strides = array<i32>} : memref<8x128xf32, #tpu.memory_space<vmem>>, vector<8x128xf32>,
    %c0_50 = arith.constant 0 : index
    %c0_51 = arith.constant 0 : index
    %133 = vector.load %arg9[%c0_50, %c0_51] : memref<8x128xf32, #tpu.memory_space<vmem>>, vector<8x128xf32>
    tpu.vector_store %arg9[%c0_50, %c0_51], %129 {strides = array<i32>} : memref<8x128xf32, #tpu.memory_space<vmem>>, vector<8x128xf32>,
    %c3_i32 = arith.constant 3 : i32
    %c0_52 = arith.constant 0 : index
    %c0_53 = arith.constant 0 : index
    %134 = vector.load %arg9[%c0_52, %c0_53] : memref<8x128xf32, #tpu.memory_space<vmem>>, vector<8x128xf32>
    %135 = arith.index_cast %c3_i32 : i32 to index
    %c0_54 = arith.constant 0 : index
    %c0_55 = arith.constant 0 : index
    %136 = vector.load %arg2[%135, %c0_54, %c0_55] : memref<8x8x384xbf16, #tpu.memory_space<vmem>>, vector<1x8x384xbf16>
    %137 = vector.shape_cast %136 : vector<1x8x384xbf16> to vector<8x384xbf16>
    %138 = arith.truncf %134 : vector<8x128xf32> to vector<8x128xbf16>
    %cst_56 = arith.constant dense<0.000000e+00> : vector<8x384xf32>
    %139 = tpu.matmul %138, %3, %cst_56 {dimension_numbers = #tpu.dot_dimension_numbers<[1], [0], [0], [1], [0, 0, 1, 1], [], []>} : vector<8x128xbf16>, vector<128x384xbf16>, vector<8x384xf32> -> vector<8x384xf32>
    %140 = vector.extract_strided_slice %137 {offsets = [0, 0], sizes = [8, 128], strides = [1, 1]} : vector<8x384xbf16> to vector<8x128xbf16>
    %141 = vector.extract_strided_slice %139 {offsets = [0, 0], sizes = [8, 128], strides = [1, 1]} : vector<8x384xf32> to vector<8x128xf32>
    %142 = arith.extf %140 : vector<8x128xbf16> to vector<8x128xf32>
    %143 = arith.addf %142, %141 : vector<8x128xf32>
    %cst_57 = arith.constant 0.000000e+00 : f32
    %144 = vector.broadcast %cst_57 : f32 to vector<8x128xf32>
    %145 = arith.subf %144, %143 : vector<8x128xf32>
    %146 = math.exp %145 : vector<8x128xf32>
    %cst_58 = arith.constant 1.000000e+00 : f32
    %147 = vector.broadcast %cst_58 : f32 to vector<8x128xf32>
    %148 = arith.addf %147, %146 : vector<8x128xf32>
    %149 = tpu.reciprocal %148 {approx = true} : vector<8x128xf32> -> vector<8x128xf32>
    %150 = vector.extract_strided_slice %137 {offsets = [0, 128], sizes = [8, 128], strides = [1, 1]} : vector<8x384xbf16> to vector<8x128xbf16>
    %151 = vector.extract_strided_slice %139 {offsets = [0, 128], sizes = [8, 128], strides = [1, 1]} : vector<8x384xf32> to vector<8x128xf32>
    %152 = arith.extf %150 : vector<8x128xbf16> to vector<8x128xf32>
    %153 = arith.addf %152, %151 : vector<8x128xf32>
    %cst_59 = arith.constant 0.000000e+00 : f32
    %154 = vector.broadcast %cst_59 : f32 to vector<8x128xf32>
    %155 = arith.subf %154, %153 : vector<8x128xf32>
    %156 = math.exp %155 : vector<8x128xf32>
    %cst_60 = arith.constant 1.000000e+00 : f32
    %157 = vector.broadcast %cst_60 : f32 to vector<8x128xf32>
    %158 = arith.addf %157, %156 : vector<8x128xf32>
    %159 = tpu.reciprocal %158 {approx = true} : vector<8x128xf32> -> vector<8x128xf32>
    %160 = vector.extract_strided_slice %137 {offsets = [0, 256], sizes = [8, 128], strides = [1, 1]} : vector<8x384xbf16> to vector<8x128xbf16>
    %161 = vector.extract_strided_slice %139 {offsets = [0, 256], sizes = [8, 128], strides = [1, 1]} : vector<8x384xf32> to vector<8x128xf32>
    %162 = vector.broadcast %4 : vector<1x128xf32> to vector<8x128xf32>
    %163 = arith.addf %161, %162 : vector<8x128xf32>
    %164 = arith.mulf %149, %163 : vector<8x128xf32>
    %165 = arith.extf %160 : vector<8x128xbf16> to vector<8x128xf32>
    %166 = arith.addf %165, %164 : vector<8x128xf32>
    %167 = math.tanh %166 : vector<8x128xf32>
    %cst_61 = arith.constant 1.000000e+00 : f32
    %168 = vector.broadcast %cst_61 : f32 to vector<8x128xf32>
    %169 = arith.subf %168, %159 : vector<8x128xf32>
    %170 = arith.mulf %169, %167 : vector<8x128xf32>
    %171 = arith.mulf %159, %134 : vector<8x128xf32>
    %172 = arith.addf %170, %171 : vector<8x128xf32>
    %c0_62 = arith.constant 0 : index
    %c0_63 = arith.constant 0 : index
    %173 = vector.load %arg10[%c0_62, %c0_63] : memref<8x128xf32, #tpu.memory_space<vmem>>, vector<8x128xf32>
    %174 = arith.addf %173, %172 : vector<8x128xf32>
    %c0_64 = arith.constant 0 : index
    %c0_65 = arith.constant 0 : index
    %175 = vector.load %arg10[%c0_64, %c0_65] : memref<8x128xf32, #tpu.memory_space<vmem>>, vector<8x128xf32>
    tpu.vector_store %arg10[%c0_64, %c0_65], %174 {strides = array<i32>} : memref<8x128xf32, #tpu.memory_space<vmem>>, vector<8x128xf32>,
    %c0_66 = arith.constant 0 : index
    %c0_67 = arith.constant 0 : index
    %176 = vector.load %arg9[%c0_66, %c0_67] : memref<8x128xf32, #tpu.memory_space<vmem>>, vector<8x128xf32>
    tpu.vector_store %arg9[%c0_66, %c0_67], %172 {strides = array<i32>} : memref<8x128xf32, #tpu.memory_space<vmem>>, vector<8x128xf32>,
    %c4_i32 = arith.constant 4 : i32
    %c0_68 = arith.constant 0 : index
    %c0_69 = arith.constant 0 : index
    %177 = vector.load %arg9[%c0_68, %c0_69] : memref<8x128xf32, #tpu.memory_space<vmem>>, vector<8x128xf32>
    %178 = arith.index_cast %c4_i32 : i32 to index
    %c0_70 = arith.constant 0 : index
    %c0_71 = arith.constant 0 : index
    %179 = vector.load %arg2[%178, %c0_70, %c0_71] : memref<8x8x384xbf16, #tpu.memory_space<vmem>>, vector<1x8x384xbf16>
    %180 = vector.shape_cast %179 : vector<1x8x384xbf16> to vector<8x384xbf16>
    %181 = arith.truncf %177 : vector<8x128xf32> to vector<8x128xbf16>
    %cst_72 = arith.constant dense<0.000000e+00> : vector<8x384xf32>
    %182 = tpu.matmul %181, %3, %cst_72 {dimension_numbers = #tpu.dot_dimension_numbers<[1], [0], [0], [1], [0, 0, 1, 1], [], []>} : vector<8x128xbf16>, vector<128x384xbf16>, vector<8x384xf32> -> vector<8x384xf32>
    %183 = vector.extract_strided_slice %180 {offsets = [0, 0], sizes = [8, 128], strides = [1, 1]} : vector<8x384xbf16> to vector<8x128xbf16>
    %184 = vector.extract_strided_slice %182 {offsets = [0, 0], sizes = [8, 128], strides = [1, 1]} : vector<8x384xf32> to vector<8x128xf32>
    %185 = arith.extf %183 : vector<8x128xbf16> to vector<8x128xf32>
    %186 = arith.addf %185, %184 : vector<8x128xf32>
    %cst_73 = arith.constant 0.000000e+00 : f32
    %187 = vector.broadcast %cst_73 : f32 to vector<8x128xf32>
    %188 = arith.subf %187, %186 : vector<8x128xf32>
    %189 = math.exp %188 : vector<8x128xf32>
    %cst_74 = arith.constant 1.000000e+00 : f32
    %190 = vector.broadcast %cst_74 : f32 to vector<8x128xf32>
    %191 = arith.addf %190, %189 : vector<8x128xf32>
    %192 = tpu.reciprocal %191 {approx = true} : vector<8x128xf32> -> vector<8x128xf32>
    %193 = vector.extract_strided_slice %180 {offsets = [0, 128], sizes = [8, 128], strides = [1, 1]} : vector<8x384xbf16> to vector<8x128xbf16>
    %194 = vector.extract_strided_slice %182 {offsets = [0, 128], sizes = [8, 128], strides = [1, 1]} : vector<8x384xf32> to vector<8x128xf32>
    %195 = arith.extf %193 : vector<8x128xbf16> to vector<8x128xf32>
    %196 = arith.addf %195, %194 : vector<8x128xf32>
    %cst_75 = arith.constant 0.000000e+00 : f32
    %197 = vector.broadcast %cst_75 : f32 to vector<8x128xf32>
    %198 = arith.subf %197, %196 : vector<8x128xf32>
    %199 = math.exp %198 : vector<8x128xf32>
    %cst_76 = arith.constant 1.000000e+00 : f32
    %200 = vector.broadcast %cst_76 : f32 to vector<8x128xf32>
    %201 = arith.addf %200, %199 : vector<8x128xf32>
    %202 = tpu.reciprocal %201 {approx = true} : vector<8x128xf32> -> vector<8x128xf32>
    %203 = vector.extract_strided_slice %180 {offsets = [0, 256], sizes = [8, 128], strides = [1, 1]} : vector<8x384xbf16> to vector<8x128xbf16>
    %204 = vector.extract_strided_slice %182 {offsets = [0, 256], sizes = [8, 128], strides = [1, 1]} : vector<8x384xf32> to vector<8x128xf32>
    %205 = vector.broadcast %4 : vector<1x128xf32> to vector<8x128xf32>
    %206 = arith.addf %204, %205 : vector<8x128xf32>
    %207 = arith.mulf %192, %206 : vector<8x128xf32>
    %208 = arith.extf %203 : vector<8x128xbf16> to vector<8x128xf32>
    %209 = arith.addf %208, %207 : vector<8x128xf32>
    %210 = math.tanh %209 : vector<8x128xf32>
    %cst_77 = arith.constant 1.000000e+00 : f32
    %211 = vector.broadcast %cst_77 : f32 to vector<8x128xf32>
    %212 = arith.subf %211, %202 : vector<8x128xf32>
    %213 = arith.mulf %212, %210 : vector<8x128xf32>
    %214 = arith.mulf %202, %177 : vector<8x128xf32>
    %215 = arith.addf %213, %214 : vector<8x128xf32>
    %c0_78 = arith.constant 0 : index
    %c0_79 = arith.constant 0 : index
    %216 = vector.load %arg10[%c0_78, %c0_79] : memref<8x128xf32, #tpu.memory_space<vmem>>, vector<8x128xf32>
    %217 = arith.addf %216, %215 : vector<8x128xf32>
    %c0_80 = arith.constant 0 : index
    %c0_81 = arith.constant 0 : index
    %218 = vector.load %arg10[%c0_80, %c0_81] : memref<8x128xf32, #tpu.memory_space<vmem>>, vector<8x128xf32>
    tpu.vector_store %arg10[%c0_80, %c0_81], %217 {strides = array<i32>} : memref<8x128xf32, #tpu.memory_space<vmem>>, vector<8x128xf32>,
    %c0_82 = arith.constant 0 : index
    %c0_83 = arith.constant 0 : index
    %219 = vector.load %arg9[%c0_82, %c0_83] : memref<8x128xf32, #tpu.memory_space<vmem>>, vector<8x128xf32>
    tpu.vector_store %arg9[%c0_82, %c0_83], %215 {strides = array<i32>} : memref<8x128xf32, #tpu.memory_space<vmem>>, vector<8x128xf32>,
    %c5_i32 = arith.constant 5 : i32
    %c0_84 = arith.constant 0 : index
    %c0_85 = arith.constant 0 : index
    %220 = vector.load %arg9[%c0_84, %c0_85] : memref<8x128xf32, #tpu.memory_space<vmem>>, vector<8x128xf32>
    %221 = arith.index_cast %c5_i32 : i32 to index
    %c0_86 = arith.constant 0 : index
    %c0_87 = arith.constant 0 : index
    %222 = vector.load %arg2[%221, %c0_86, %c0_87] : memref<8x8x384xbf16, #tpu.memory_space<vmem>>, vector<1x8x384xbf16>
    %223 = vector.shape_cast %222 : vector<1x8x384xbf16> to vector<8x384xbf16>
    %224 = arith.truncf %220 : vector<8x128xf32> to vector<8x128xbf16>
    %cst_88 = arith.constant dense<0.000000e+00> : vector<8x384xf32>
    %225 = tpu.matmul %224, %3, %cst_88 {dimension_numbers = #tpu.dot_dimension_numbers<[1], [0], [0], [1], [0, 0, 1, 1], [], []>} : vector<8x128xbf16>, vector<128x384xbf16>, vector<8x384xf32> -> vector<8x384xf32>
    %226 = vector.extract_strided_slice %223 {offsets = [0, 0], sizes = [8, 128], strides = [1, 1]} : vector<8x384xbf16> to vector<8x128xbf16>
    %227 = vector.extract_strided_slice %225 {offsets = [0, 0], sizes = [8, 128], strides = [1, 1]} : vector<8x384xf32> to vector<8x128xf32>
    %228 = arith.extf %226 : vector<8x128xbf16> to vector<8x128xf32>
    %229 = arith.addf %228, %227 : vector<8x128xf32>
    %cst_89 = arith.constant 0.000000e+00 : f32
    %230 = vector.broadcast %cst_89 : f32 to vector<8x128xf32>
    %231 = arith.subf %230, %229 : vector<8x128xf32>
    %232 = math.exp %231 : vector<8x128xf32>
    %cst_90 = arith.constant 1.000000e+00 : f32
    %233 = vector.broadcast %cst_90 : f32 to vector<8x128xf32>
    %234 = arith.addf %233, %232 : vector<8x128xf32>
    %235 = tpu.reciprocal %234 {approx = true} : vector<8x128xf32> -> vector<8x128xf32>
    %236 = vector.extract_strided_slice %223 {offsets = [0, 128], sizes = [8, 128], strides = [1, 1]} : vector<8x384xbf16> to vector<8x128xbf16>
    %237 = vector.extract_strided_slice %225 {offsets = [0, 128], sizes = [8, 128], strides = [1, 1]} : vector<8x384xf32> to vector<8x128xf32>
    %238 = arith.extf %236 : vector<8x128xbf16> to vector<8x128xf32>
    %239 = arith.addf %238, %237 : vector<8x128xf32>
    %cst_91 = arith.constant 0.000000e+00 : f32
    %240 = vector.broadcast %cst_91 : f32 to vector<8x128xf32>
    %241 = arith.subf %240, %239 : vector<8x128xf32>
    %242 = math.exp %241 : vector<8x128xf32>
    %cst_92 = arith.constant 1.000000e+00 : f32
    %243 = vector.broadcast %cst_92 : f32 to vector<8x128xf32>
    %244 = arith.addf %243, %242 : vector<8x128xf32>
    %245 = tpu.reciprocal %244 {approx = true} : vector<8x128xf32> -> vector<8x128xf32>
    %246 = vector.extract_strided_slice %223 {offsets = [0, 256], sizes = [8, 128], strides = [1, 1]} : vector<8x384xbf16> to vector<8x128xbf16>
    %247 = vector.extract_strided_slice %225 {offsets = [0, 256], sizes = [8, 128], strides = [1, 1]} : vector<8x384xf32> to vector<8x128xf32>
    %248 = vector.broadcast %4 : vector<1x128xf32> to vector<8x128xf32>
    %249 = arith.addf %247, %248 : vector<8x128xf32>
    %250 = arith.mulf %235, %249 : vector<8x128xf32>
    %251 = arith.extf %246 : vector<8x128xbf16> to vector<8x128xf32>
    %252 = arith.addf %251, %250 : vector<8x128xf32>
    %253 = math.tanh %252 : vector<8x128xf32>
    %cst_93 = arith.constant 1.000000e+00 : f32
    %254 = vector.broadcast %cst_93 : f32 to vector<8x128xf32>
    %255 = arith.subf %254, %245 : vector<8x128xf32>
    %256 = arith.mulf %255, %253 : vector<8x128xf32>
    %257 = arith.mulf %245, %220 : vector<8x128xf32>
    %258 = arith.addf %256, %257 : vector<8x128xf32>
    %c0_94 = arith.constant 0 : index
    %c0_95 = arith.constant 0 : index
    %259 = vector.load %arg10[%c0_94, %c0_95] : memref<8x128xf32, #tpu.memory_space<vmem>>, vector<8x128xf32>
    %260 = arith.addf %259, %258 : vector<8x128xf32>
    %c0_96 = arith.constant 0 : index
    %c0_97 = arith.constant 0 : index
    %261 = vector.load %arg10[%c0_96, %c0_97] : memref<8x128xf32, #tpu.memory_space<vmem>>, vector<8x128xf32>
    tpu.vector_store %arg10[%c0_96, %c0_97], %260 {strides = array<i32>} : memref<8x128xf32, #tpu.memory_space<vmem>>, vector<8x128xf32>,
    %c0_98 = arith.constant 0 : index
    %c0_99 = arith.constant 0 : index
    %262 = vector.load %arg9[%c0_98, %c0_99] : memref<8x128xf32, #tpu.memory_space<vmem>>, vector<8x128xf32>
    tpu.vector_store %arg9[%c0_98, %c0_99], %258 {strides = array<i32>} : memref<8x128xf32, #tpu.memory_space<vmem>>, vector<8x128xf32>,
    %c6_i32 = arith.constant 6 : i32
    %c0_100 = arith.constant 0 : index
    %c0_101 = arith.constant 0 : index
    %263 = vector.load %arg9[%c0_100, %c0_101] : memref<8x128xf32, #tpu.memory_space<vmem>>, vector<8x128xf32>
    %264 = arith.index_cast %c6_i32 : i32 to index
    %c0_102 = arith.constant 0 : index
    %c0_103 = arith.constant 0 : index
    %265 = vector.load %arg2[%264, %c0_102, %c0_103] : memref<8x8x384xbf16, #tpu.memory_space<vmem>>, vector<1x8x384xbf16>
    %266 = vector.shape_cast %265 : vector<1x8x384xbf16> to vector<8x384xbf16>
    %267 = arith.truncf %263 : vector<8x128xf32> to vector<8x128xbf16>
    %cst_104 = arith.constant dense<0.000000e+00> : vector<8x384xf32>
    %268 = tpu.matmul %267, %3, %cst_104 {dimension_numbers = #tpu.dot_dimension_numbers<[1], [0], [0], [1], [0, 0, 1, 1], [], []>} : vector<8x128xbf16>, vector<128x384xbf16>, vector<8x384xf32> -> vector<8x384xf32>
    %269 = vector.extract_strided_slice %266 {offsets = [0, 0], sizes = [8, 128], strides = [1, 1]} : vector<8x384xbf16> to vector<8x128xbf16>
    %270 = vector.extract_strided_slice %268 {offsets = [0, 0], sizes = [8, 128], strides = [1, 1]} : vector<8x384xf32> to vector<8x128xf32>
    %271 = arith.extf %269 : vector<8x128xbf16> to vector<8x128xf32>
    %272 = arith.addf %271, %270 : vector<8x128xf32>
    %cst_105 = arith.constant 0.000000e+00 : f32
    %273 = vector.broadcast %cst_105 : f32 to vector<8x128xf32>
    %274 = arith.subf %273, %272 : vector<8x128xf32>
    %275 = math.exp %274 : vector<8x128xf32>
    %cst_106 = arith.constant 1.000000e+00 : f32
    %276 = vector.broadcast %cst_106 : f32 to vector<8x128xf32>
    %277 = arith.addf %276, %275 : vector<8x128xf32>
    %278 = tpu.reciprocal %277 {approx = true} : vector<8x128xf32> -> vector<8x128xf32>
    %279 = vector.extract_strided_slice %266 {offsets = [0, 128], sizes = [8, 128], strides = [1, 1]} : vector<8x384xbf16> to vector<8x128xbf16>
    %280 = vector.extract_strided_slice %268 {offsets = [0, 128], sizes = [8, 128], strides = [1, 1]} : vector<8x384xf32> to vector<8x128xf32>
    %281 = arith.extf %279 : vector<8x128xbf16> to vector<8x128xf32>
    %282 = arith.addf %281, %280 : vector<8x128xf32>
    %cst_107 = arith.constant 0.000000e+00 : f32
    %283 = vector.broadcast %cst_107 : f32 to vector<8x128xf32>
    %284 = arith.subf %283, %282 : vector<8x128xf32>
    %285 = math.exp %284 : vector<8x128xf32>
    %cst_108 = arith.constant 1.000000e+00 : f32
    %286 = vector.broadcast %cst_108 : f32 to vector<8x128xf32>
    %287 = arith.addf %286, %285 : vector<8x128xf32>
    %288 = tpu.reciprocal %287 {approx = true} : vector<8x128xf32> -> vector<8x128xf32>
    %289 = vector.extract_strided_slice %266 {offsets = [0, 256], sizes = [8, 128], strides = [1, 1]} : vector<8x384xbf16> to vector<8x128xbf16>
    %290 = vector.extract_strided_slice %268 {offsets = [0, 256], sizes = [8, 128], strides = [1, 1]} : vector<8x384xf32> to vector<8x128xf32>
    %291 = vector.broadcast %4 : vector<1x128xf32> to vector<8x128xf32>
    %292 = arith.addf %290, %291 : vector<8x128xf32>
    %293 = arith.mulf %278, %292 : vector<8x128xf32>
    %294 = arith.extf %289 : vector<8x128xbf16> to vector<8x128xf32>
    %295 = arith.addf %294, %293 : vector<8x128xf32>
    %296 = math.tanh %295 : vector<8x128xf32>
    %cst_109 = arith.constant 1.000000e+00 : f32
    %297 = vector.broadcast %cst_109 : f32 to vector<8x128xf32>
    %298 = arith.subf %297, %288 : vector<8x128xf32>
    %299 = arith.mulf %298, %296 : vector<8x128xf32>
    %300 = arith.mulf %288, %263 : vector<8x128xf32>
    %301 = arith.addf %299, %300 : vector<8x128xf32>
    %c0_110 = arith.constant 0 : index
    %c0_111 = arith.constant 0 : index
    %302 = vector.load %arg10[%c0_110, %c0_111] : memref<8x128xf32, #tpu.memory_space<vmem>>, vector<8x128xf32>
    %303 = arith.addf %302, %301 : vector<8x128xf32>
    %c0_112 = arith.constant 0 : index
    %c0_113 = arith.constant 0 : index
    %304 = vector.load %arg10[%c0_112, %c0_113] : memref<8x128xf32, #tpu.memory_space<vmem>>, vector<8x128xf32>
    tpu.vector_store %arg10[%c0_112, %c0_113], %303 {strides = array<i32>} : memref<8x128xf32, #tpu.memory_space<vmem>>, vector<8x128xf32>,
    %c0_114 = arith.constant 0 : index
    %c0_115 = arith.constant 0 : index
    %305 = vector.load %arg9[%c0_114, %c0_115] : memref<8x128xf32, #tpu.memory_space<vmem>>, vector<8x128xf32>
    tpu.vector_store %arg9[%c0_114, %c0_115], %301 {strides = array<i32>} : memref<8x128xf32, #tpu.memory_space<vmem>>, vector<8x128xf32>,
    %c7_i32 = arith.constant 7 : i32
    %c0_116 = arith.constant 0 : index
    %c0_117 = arith.constant 0 : index
    %306 = vector.load %arg9[%c0_116, %c0_117] : memref<8x128xf32, #tpu.memory_space<vmem>>, vector<8x128xf32>
    %307 = arith.index_cast %c7_i32 : i32 to index
    %c0_118 = arith.constant 0 : index
    %c0_119 = arith.constant 0 : index
    %308 = vector.load %arg2[%307, %c0_118, %c0_119] : memref<8x8x384xbf16, #tpu.memory_space<vmem>>, vector<1x8x384xbf16>
    %309 = vector.shape_cast %308 : vector<1x8x384xbf16> to vector<8x384xbf16>
    %310 = arith.truncf %306 : vector<8x128xf32> to vector<8x128xbf16>
    %cst_120 = arith.constant dense<0.000000e+00> : vector<8x384xf32>
    %311 = tpu.matmul %310, %3, %cst_120 {dimension_numbers = #tpu.dot_dimension_numbers<[1], [0], [0], [1], [0, 0, 1, 1], [], []>} : vector<8x128xbf16>, vector<128x384xbf16>, vector<8x384xf32> -> vector<8x384xf32>
    %312 = vector.extract_strided_slice %309 {offsets = [0, 0], sizes = [8, 128], strides = [1, 1]} : vector<8x384xbf16> to vector<8x128xbf16>
    %313 = vector.extract_strided_slice %311 {offsets = [0, 0], sizes = [8, 128], strides = [1, 1]} : vector<8x384xf32> to vector<8x128xf32>
    %314 = arith.extf %312 : vector<8x128xbf16> to vector<8x128xf32>
    %315 = arith.addf %314, %313 : vector<8x128xf32>
    %cst_121 = arith.constant 0.000000e+00 : f32
    %316 = vector.broadcast %cst_121 : f32 to vector<8x128xf32>
    %317 = arith.subf %316, %315 : vector<8x128xf32>
    %318 = math.exp %317 : vector<8x128xf32>
    %cst_122 = arith.constant 1.000000e+00 : f32
    %319 = vector.broadcast %cst_122 : f32 to vector<8x128xf32>
    %320 = arith.addf %319, %318 : vector<8x128xf32>
    %321 = tpu.reciprocal %320 {approx = true} : vector<8x128xf32> -> vector<8x128xf32>
    %322 = vector.extract_strided_slice %309 {offsets = [0, 128], sizes = [8, 128], strides = [1, 1]} : vector<8x384xbf16> to vector<8x128xbf16>
    %323 = vector.extract_strided_slice %311 {offsets = [0, 128], sizes = [8, 128], strides = [1, 1]} : vector<8x384xf32> to vector<8x128xf32>
    %324 = arith.extf %322 : vector<8x128xbf16> to vector<8x128xf32>
    %325 = arith.addf %324, %323 : vector<8x128xf32>
    %cst_123 = arith.constant 0.000000e+00 : f32
    %326 = vector.broadcast %cst_123 : f32 to vector<8x128xf32>
    %327 = arith.subf %326, %325 : vector<8x128xf32>
    %328 = math.exp %327 : vector<8x128xf32>
    %cst_124 = arith.constant 1.000000e+00 : f32
    %329 = vector.broadcast %cst_124 : f32 to vector<8x128xf32>
    %330 = arith.addf %329, %328 : vector<8x128xf32>
    %331 = tpu.reciprocal %330 {approx = true} : vector<8x128xf32> -> vector<8x128xf32>
    %332 = vector.extract_strided_slice %309 {offsets = [0, 256], sizes = [8, 128], strides = [1, 1]} : vector<8x384xbf16> to vector<8x128xbf16>
    %333 = vector.extract_strided_slice %311 {offsets = [0, 256], sizes = [8, 128], strides = [1, 1]} : vector<8x384xf32> to vector<8x128xf32>
    %334 = vector.broadcast %4 : vector<1x128xf32> to vector<8x128xf32>
    %335 = arith.addf %333, %334 : vector<8x128xf32>
    %336 = arith.mulf %321, %335 : vector<8x128xf32>
    %337 = arith.extf %332 : vector<8x128xbf16> to vector<8x128xf32>
    %338 = arith.addf %337, %336 : vector<8x128xf32>
    %339 = math.tanh %338 : vector<8x128xf32>
    %cst_125 = arith.constant 1.000000e+00 : f32
    %340 = vector.broadcast %cst_125 : f32 to vector<8x128xf32>
    %341 = arith.subf %340, %331 : vector<8x128xf32>
    %342 = arith.mulf %341, %339 : vector<8x128xf32>
    %343 = arith.mulf %331, %306 : vector<8x128xf32>
    %344 = arith.addf %342, %343 : vector<8x128xf32>
    %c0_126 = arith.constant 0 : index
    %c0_127 = arith.constant 0 : index
    %345 = vector.load %arg10[%c0_126, %c0_127] : memref<8x128xf32, #tpu.memory_space<vmem>>, vector<8x128xf32>
    %346 = arith.addf %345, %344 : vector<8x128xf32>
    %c0_128 = arith.constant 0 : index
    %c0_129 = arith.constant 0 : index
    %347 = vector.load %arg10[%c0_128, %c0_129] : memref<8x128xf32, #tpu.memory_space<vmem>>, vector<8x128xf32>
    tpu.vector_store %arg10[%c0_128, %c0_129], %346 {strides = array<i32>} : memref<8x128xf32, #tpu.memory_space<vmem>>, vector<8x128xf32>,
    %c0_130 = arith.constant 0 : index
    %c0_131 = arith.constant 0 : index
    %348 = vector.load %arg9[%c0_130, %c0_131] : memref<8x128xf32, #tpu.memory_space<vmem>>, vector<8x128xf32>
    tpu.vector_store %arg9[%c0_130, %c0_131], %344 {strides = array<i32>} : memref<8x128xf32, #tpu.memory_space<vmem>>, vector<8x128xf32>,
    %c8_i32 = arith.constant 8 : i32
    %c0_i32_132 = arith.constant 0 : i32
    %349 = arith.cmpi eq, %arg1, %c0_i32_132 : i32
    %350 = arith.extui %349 : i1 to i32
    %c0_i32_133 = arith.constant 0 : i32
    %351 = arith.cmpi ne, %350, %c0_i32_133 : i32
    scf.if %351 {
      %c0_134 = arith.constant 0 : index
      %c0_135 = arith.constant 0 : index
      %352 = vector.load %arg10[%c0_134, %c0_135] : memref<8x128xf32, #tpu.memory_space<vmem>>, vector<8x128xf32>
      %cst_136 = arith.constant 1.250000e-01 : f32
      %353 = vector.broadcast %cst_136 : f32 to vector<8x128xf32>
      %354 = arith.mulf %352, %353 : vector<8x128xf32>
      %c0_137 = arith.constant 0 : index
      %c0_138 = arith.constant 0 : index
      %355 = vector.load %arg8[%c0_137, %c0_138] : memref<8x128xf32, #tpu.memory_space<vmem>>, vector<8x128xf32>
      tpu.vector_store %arg8[%c0_137, %c0_138], %354 {strides = array<i32>} : memref<8x128xf32, #tpu.memory_space<vmem>>, vector<8x128xf32>,
      %356 = arith.truncf %354 : vector<8x128xf32> to vector<8x128xbf16>
      %c0_139 = arith.constant 0 : index
      %c0_140 = arith.constant 0 : index
      %357 = vector.load %arg5[%c0_139, %c0_140] : memref<128x128xbf16, #tpu.memory_space<vmem>>, vector<128x128xbf16>
      %cst_141 = arith.constant dense<0.000000e+00> : vector<8x128xf32>
      %358 = tpu.matmul %356, %357, %cst_141 {dimension_numbers = #tpu.dot_dimension_numbers<[1], [0], [0], [1], [0, 0, 1, 1], [], []>} : vector<8x128xbf16>, vector<128x128xbf16>, vector<8x128xf32> -> vector<8x128xf32>
      %c0_142 = arith.constant 0 : index
      %c0_143 = arith.constant 0 : index
      %359 = vector.load %arg6[%c0_142, %c0_143] : memref<1x128xf32, #tpu.memory_space<vmem>>, vector<1x128xf32>
      %360 = vector.broadcast %359 : vector<1x128xf32> to vector<8x128xf32>
      %361 = arith.addf %358, %360 : vector<8x128xf32>
      %c0_144 = arith.constant 0 : index
      %c0_145 = arith.constant 0 : index
      %362 = vector.load %arg7[%c0_144, %c0_145] : memref<8x128xf32, #tpu.memory_space<vmem>>, vector<8x128xf32>
      tpu.vector_store %arg7[%c0_144, %c0_145], %361 {strides = array<i32>} : memref<8x128xf32, #tpu.memory_space<vmem>>, vector<8x128xf32>,
    } else {
    }
    return
  }
  func.func @transform_0(%arg0: i32, %arg1: i32) -> (i32, i32, i32) {
    %c0_i32 = arith.constant 0 : i32
    %c0_i32_0 = arith.constant 0 : i32
    return %arg1, %arg0, %c0_i32 : i32, i32, i32
  }
  func.func @transform_1(%arg0: i32, %arg1: i32) -> (i32, i32) {
    %c0_i32 = arith.constant 0 : i32
    %c0_i32_0 = arith.constant 0 : i32
    %c0_i32_1 = arith.constant 0 : i32
    return %c0_i32, %c0_i32_0 : i32, i32
  }
  func.func @transform_2(%arg0: i32, %arg1: i32) -> (i32, i32) {
    %c0_i32 = arith.constant 0 : i32
    %c0_i32_0 = arith.constant 0 : i32
    %c0_i32_1 = arith.constant 0 : i32
    return %c0_i32, %c0_i32_0 : i32, i32
  }
  func.func @transform_3(%arg0: i32, %arg1: i32) -> (i32, i32) {
    %c0_i32 = arith.constant 0 : i32
    %c0_i32_0 = arith.constant 0 : i32
    %c0_i32_1 = arith.constant 0 : i32
    return %c0_i32, %c0_i32_0 : i32, i32
  }
  func.func @transform_4(%arg0: i32, %arg1: i32) -> (i32, i32) {
    %c0_i32 = arith.constant 0 : i32
    %c0_i32_0 = arith.constant 0 : i32
    %c0_i32_1 = arith.constant 0 : i32
    return %c0_i32, %c0_i32_0 : i32, i32
  }
  func.func @transform_5(%arg0: i32, %arg1: i32) -> (i32, i32) {
    %c0_i32 = arith.constant 0 : i32
    %c0_i32_0 = arith.constant 0 : i32
    return %arg0, %c0_i32 : i32, i32
  }
  func.func @transform_6(%arg0: i32, %arg1: i32) -> (i32, i32) {
    %c0_i32 = arith.constant 0 : i32
    %c0_i32_0 = arith.constant 0 : i32
    return %arg0, %c0_i32 : i32, i32
  }
}

module attributes {stable_mosaic.version = 11 : i64} {
  func.func @_gru_rec_kernel(%arg0: i32, %arg1: i32, %arg2: memref<8x8x384xbf16, #tpu.memory_space<vmem>>, %arg3: memref<128x384xbf16, #tpu.memory_space<vmem>>, %arg4: memref<1x128xf32, #tpu.memory_space<vmem>>, %arg5: memref<8x8x128xbf16, #tpu.memory_space<vmem>>, %arg6: memref<8x128xf32, #tpu.memory_space<vmem>>) attributes {dimension_semantics = [#tpu.dimension_semantics<parallel>, #tpu.dimension_semantics<arbitrary>], iteration_bounds = array<i64: 1, 1>, scalar_prefetch = 0 : i64, scratch_operands = 1 : i64, tpu.core_type = #tpu.core_type<tc>, window_params = [{transform_indices = @transform_0, window_bounds = array<i64: 8, 8, 384>}, {pipeline_mode = #tpu.pipeline_mode<synchronous>, transform_indices = @transform_1, window_bounds = array<i64: 128, 384>}, {pipeline_mode = #tpu.pipeline_mode<synchronous>, transform_indices = @transform_2, window_bounds = array<i64: 1, 128>}, {transform_indices = @transform_3, window_bounds = array<i64: 8, 8, 128>}]} {
    %c0_i32 = arith.constant 0 : i32
    %0 = arith.cmpi eq, %arg1, %c0_i32 : i32
    %1 = arith.extui %0 : i1 to i32
    %c0_i32_0 = arith.constant 0 : i32
    %2 = arith.cmpi ne, %1, %c0_i32_0 : i32
    scf.if %2 {
      %cst_116 = arith.constant 0.000000e+00 : f32
      %365 = vector.broadcast %cst_116 : f32 to vector<8x128xf32>
      %c0_117 = arith.constant 0 : index
      %c0_118 = arith.constant 0 : index
      %366 = vector.load %arg6[%c0_117, %c0_118] : memref<8x128xf32, #tpu.memory_space<vmem>>, vector<8x128xf32>
      tpu.vector_store %arg6[%c0_117, %c0_118], %365 {strides = array<i32>} : memref<8x128xf32, #tpu.memory_space<vmem>>, vector<8x128xf32>,
    } else {
    }
    %c0 = arith.constant 0 : index
    %c0_1 = arith.constant 0 : index
    %3 = vector.load %arg3[%c0, %c0_1] : memref<128x384xbf16, #tpu.memory_space<vmem>>, vector<128x384xbf16>
    %c0_2 = arith.constant 0 : index
    %c0_3 = arith.constant 0 : index
    %4 = vector.load %arg4[%c0_2, %c0_3] : memref<1x128xf32, #tpu.memory_space<vmem>>, vector<1x128xf32>
    %c0_i32_4 = arith.constant 0 : i32
    %c0_5 = arith.constant 0 : index
    %c0_6 = arith.constant 0 : index
    %5 = vector.load %arg6[%c0_5, %c0_6] : memref<8x128xf32, #tpu.memory_space<vmem>>, vector<8x128xf32>
    %6 = arith.index_cast %c0_i32_4 : i32 to index
    %c0_7 = arith.constant 0 : index
    %c0_8 = arith.constant 0 : index
    %7 = vector.load %arg2[%6, %c0_7, %c0_8] : memref<8x8x384xbf16, #tpu.memory_space<vmem>>, vector<1x8x384xbf16>
    %8 = vector.shape_cast %7 : vector<1x8x384xbf16> to vector<8x384xbf16>
    %9 = arith.truncf %5 : vector<8x128xf32> to vector<8x128xbf16>
    %cst = arith.constant dense<0.000000e+00> : vector<8x384xf32>
    %10 = tpu.matmul %9, %3, %cst {dimension_numbers = #tpu.dot_dimension_numbers<[1], [0], [0], [1], [0, 0, 1, 1], [], []>} : vector<8x128xbf16>, vector<128x384xbf16>, vector<8x384xf32> -> vector<8x384xf32>
    %11 = vector.extract_strided_slice %8 {offsets = [0, 0], sizes = [8, 128], strides = [1, 1]} : vector<8x384xbf16> to vector<8x128xbf16>
    %12 = vector.extract_strided_slice %10 {offsets = [0, 0], sizes = [8, 128], strides = [1, 1]} : vector<8x384xf32> to vector<8x128xf32>
    %13 = arith.extf %11 : vector<8x128xbf16> to vector<8x128xf32>
    %14 = arith.addf %13, %12 : vector<8x128xf32>
    %cst_9 = arith.constant 0.000000e+00 : f32
    %15 = vector.broadcast %cst_9 : f32 to vector<8x128xf32>
    %16 = arith.subf %15, %14 : vector<8x128xf32>
    %17 = math.exp %16 : vector<8x128xf32>
    %cst_10 = arith.constant 1.000000e+00 : f32
    %18 = vector.broadcast %cst_10 : f32 to vector<8x128xf32>
    %19 = arith.addf %18, %17 : vector<8x128xf32>
    %20 = tpu.reciprocal %19 {approx = true} : vector<8x128xf32> -> vector<8x128xf32>
    %21 = vector.extract_strided_slice %8 {offsets = [0, 128], sizes = [8, 128], strides = [1, 1]} : vector<8x384xbf16> to vector<8x128xbf16>
    %22 = vector.extract_strided_slice %10 {offsets = [0, 128], sizes = [8, 128], strides = [1, 1]} : vector<8x384xf32> to vector<8x128xf32>
    %23 = arith.extf %21 : vector<8x128xbf16> to vector<8x128xf32>
    %24 = arith.addf %23, %22 : vector<8x128xf32>
    %cst_11 = arith.constant 0.000000e+00 : f32
    %25 = vector.broadcast %cst_11 : f32 to vector<8x128xf32>
    %26 = arith.subf %25, %24 : vector<8x128xf32>
    %27 = math.exp %26 : vector<8x128xf32>
    %cst_12 = arith.constant 1.000000e+00 : f32
    %28 = vector.broadcast %cst_12 : f32 to vector<8x128xf32>
    %29 = arith.addf %28, %27 : vector<8x128xf32>
    %30 = tpu.reciprocal %29 {approx = true} : vector<8x128xf32> -> vector<8x128xf32>
    %31 = vector.extract_strided_slice %8 {offsets = [0, 256], sizes = [8, 128], strides = [1, 1]} : vector<8x384xbf16> to vector<8x128xbf16>
    %32 = vector.extract_strided_slice %10 {offsets = [0, 256], sizes = [8, 128], strides = [1, 1]} : vector<8x384xf32> to vector<8x128xf32>
    %33 = vector.broadcast %4 : vector<1x128xf32> to vector<8x128xf32>
    %34 = arith.addf %32, %33 : vector<8x128xf32>
    %35 = arith.mulf %20, %34 : vector<8x128xf32>
    %36 = arith.extf %31 : vector<8x128xbf16> to vector<8x128xf32>
    %37 = arith.addf %36, %35 : vector<8x128xf32>
    %38 = math.tanh %37 : vector<8x128xf32>
    %cst_13 = arith.constant 1.000000e+00 : f32
    %39 = vector.broadcast %cst_13 : f32 to vector<8x128xf32>
    %40 = arith.subf %39, %30 : vector<8x128xf32>
    %41 = arith.mulf %40, %38 : vector<8x128xf32>
    %42 = arith.mulf %30, %5 : vector<8x128xf32>
    %43 = arith.addf %41, %42 : vector<8x128xf32>
    %c0_14 = arith.constant 0 : index
    %c0_15 = arith.constant 0 : index
    %44 = vector.load %arg6[%c0_14, %c0_15] : memref<8x128xf32, #tpu.memory_space<vmem>>, vector<8x128xf32>
    tpu.vector_store %arg6[%c0_14, %c0_15], %43 {strides = array<i32>} : memref<8x128xf32, #tpu.memory_space<vmem>>, vector<8x128xf32>,
    %45 = arith.truncf %43 : vector<8x128xf32> to vector<8x128xbf16>
    %46 = arith.index_cast %c0_i32_4 : i32 to index
    %c0_16 = arith.constant 0 : index
    %c0_17 = arith.constant 0 : index
    %47 = vector.load %arg5[%46, %c0_16, %c0_17] : memref<8x8x128xbf16, #tpu.memory_space<vmem>>, vector<1x8x128xbf16>
    %48 = vector.shape_cast %47 : vector<1x8x128xbf16> to vector<8x128xbf16>
    %49 = vector.shape_cast %45 : vector<8x128xbf16> to vector<1x8x128xbf16>
    tpu.vector_store %arg5[%46, %c0_16, %c0_17], %49 {strides = array<i32>} : memref<8x8x128xbf16, #tpu.memory_space<vmem>>, vector<1x8x128xbf16>,
    %c1_i32 = arith.constant 1 : i32
    %c0_18 = arith.constant 0 : index
    %c0_19 = arith.constant 0 : index
    %50 = vector.load %arg6[%c0_18, %c0_19] : memref<8x128xf32, #tpu.memory_space<vmem>>, vector<8x128xf32>
    %51 = arith.index_cast %c1_i32 : i32 to index
    %c0_20 = arith.constant 0 : index
    %c0_21 = arith.constant 0 : index
    %52 = vector.load %arg2[%51, %c0_20, %c0_21] : memref<8x8x384xbf16, #tpu.memory_space<vmem>>, vector<1x8x384xbf16>
    %53 = vector.shape_cast %52 : vector<1x8x384xbf16> to vector<8x384xbf16>
    %54 = arith.truncf %50 : vector<8x128xf32> to vector<8x128xbf16>
    %cst_22 = arith.constant dense<0.000000e+00> : vector<8x384xf32>
    %55 = tpu.matmul %54, %3, %cst_22 {dimension_numbers = #tpu.dot_dimension_numbers<[1], [0], [0], [1], [0, 0, 1, 1], [], []>} : vector<8x128xbf16>, vector<128x384xbf16>, vector<8x384xf32> -> vector<8x384xf32>
    %56 = vector.extract_strided_slice %53 {offsets = [0, 0], sizes = [8, 128], strides = [1, 1]} : vector<8x384xbf16> to vector<8x128xbf16>
    %57 = vector.extract_strided_slice %55 {offsets = [0, 0], sizes = [8, 128], strides = [1, 1]} : vector<8x384xf32> to vector<8x128xf32>
    %58 = arith.extf %56 : vector<8x128xbf16> to vector<8x128xf32>
    %59 = arith.addf %58, %57 : vector<8x128xf32>
    %cst_23 = arith.constant 0.000000e+00 : f32
    %60 = vector.broadcast %cst_23 : f32 to vector<8x128xf32>
    %61 = arith.subf %60, %59 : vector<8x128xf32>
    %62 = math.exp %61 : vector<8x128xf32>
    %cst_24 = arith.constant 1.000000e+00 : f32
    %63 = vector.broadcast %cst_24 : f32 to vector<8x128xf32>
    %64 = arith.addf %63, %62 : vector<8x128xf32>
    %65 = tpu.reciprocal %64 {approx = true} : vector<8x128xf32> -> vector<8x128xf32>
    %66 = vector.extract_strided_slice %53 {offsets = [0, 128], sizes = [8, 128], strides = [1, 1]} : vector<8x384xbf16> to vector<8x128xbf16>
    %67 = vector.extract_strided_slice %55 {offsets = [0, 128], sizes = [8, 128], strides = [1, 1]} : vector<8x384xf32> to vector<8x128xf32>
    %68 = arith.extf %66 : vector<8x128xbf16> to vector<8x128xf32>
    %69 = arith.addf %68, %67 : vector<8x128xf32>
    %cst_25 = arith.constant 0.000000e+00 : f32
    %70 = vector.broadcast %cst_25 : f32 to vector<8x128xf32>
    %71 = arith.subf %70, %69 : vector<8x128xf32>
    %72 = math.exp %71 : vector<8x128xf32>
    %cst_26 = arith.constant 1.000000e+00 : f32
    %73 = vector.broadcast %cst_26 : f32 to vector<8x128xf32>
    %74 = arith.addf %73, %72 : vector<8x128xf32>
    %75 = tpu.reciprocal %74 {approx = true} : vector<8x128xf32> -> vector<8x128xf32>
    %76 = vector.extract_strided_slice %53 {offsets = [0, 256], sizes = [8, 128], strides = [1, 1]} : vector<8x384xbf16> to vector<8x128xbf16>
    %77 = vector.extract_strided_slice %55 {offsets = [0, 256], sizes = [8, 128], strides = [1, 1]} : vector<8x384xf32> to vector<8x128xf32>
    %78 = vector.broadcast %4 : vector<1x128xf32> to vector<8x128xf32>
    %79 = arith.addf %77, %78 : vector<8x128xf32>
    %80 = arith.mulf %65, %79 : vector<8x128xf32>
    %81 = arith.extf %76 : vector<8x128xbf16> to vector<8x128xf32>
    %82 = arith.addf %81, %80 : vector<8x128xf32>
    %83 = math.tanh %82 : vector<8x128xf32>
    %cst_27 = arith.constant 1.000000e+00 : f32
    %84 = vector.broadcast %cst_27 : f32 to vector<8x128xf32>
    %85 = arith.subf %84, %75 : vector<8x128xf32>
    %86 = arith.mulf %85, %83 : vector<8x128xf32>
    %87 = arith.mulf %75, %50 : vector<8x128xf32>
    %88 = arith.addf %86, %87 : vector<8x128xf32>
    %c0_28 = arith.constant 0 : index
    %c0_29 = arith.constant 0 : index
    %89 = vector.load %arg6[%c0_28, %c0_29] : memref<8x128xf32, #tpu.memory_space<vmem>>, vector<8x128xf32>
    tpu.vector_store %arg6[%c0_28, %c0_29], %88 {strides = array<i32>} : memref<8x128xf32, #tpu.memory_space<vmem>>, vector<8x128xf32>,
    %90 = arith.truncf %88 : vector<8x128xf32> to vector<8x128xbf16>
    %91 = arith.index_cast %c1_i32 : i32 to index
    %c0_30 = arith.constant 0 : index
    %c0_31 = arith.constant 0 : index
    %92 = vector.load %arg5[%91, %c0_30, %c0_31] : memref<8x8x128xbf16, #tpu.memory_space<vmem>>, vector<1x8x128xbf16>
    %93 = vector.shape_cast %92 : vector<1x8x128xbf16> to vector<8x128xbf16>
    %94 = vector.shape_cast %90 : vector<8x128xbf16> to vector<1x8x128xbf16>
    tpu.vector_store %arg5[%91, %c0_30, %c0_31], %94 {strides = array<i32>} : memref<8x8x128xbf16, #tpu.memory_space<vmem>>, vector<1x8x128xbf16>,
    %c2_i32 = arith.constant 2 : i32
    %c0_32 = arith.constant 0 : index
    %c0_33 = arith.constant 0 : index
    %95 = vector.load %arg6[%c0_32, %c0_33] : memref<8x128xf32, #tpu.memory_space<vmem>>, vector<8x128xf32>
    %96 = arith.index_cast %c2_i32 : i32 to index
    %c0_34 = arith.constant 0 : index
    %c0_35 = arith.constant 0 : index
    %97 = vector.load %arg2[%96, %c0_34, %c0_35] : memref<8x8x384xbf16, #tpu.memory_space<vmem>>, vector<1x8x384xbf16>
    %98 = vector.shape_cast %97 : vector<1x8x384xbf16> to vector<8x384xbf16>
    %99 = arith.truncf %95 : vector<8x128xf32> to vector<8x128xbf16>
    %cst_36 = arith.constant dense<0.000000e+00> : vector<8x384xf32>
    %100 = tpu.matmul %99, %3, %cst_36 {dimension_numbers = #tpu.dot_dimension_numbers<[1], [0], [0], [1], [0, 0, 1, 1], [], []>} : vector<8x128xbf16>, vector<128x384xbf16>, vector<8x384xf32> -> vector<8x384xf32>
    %101 = vector.extract_strided_slice %98 {offsets = [0, 0], sizes = [8, 128], strides = [1, 1]} : vector<8x384xbf16> to vector<8x128xbf16>
    %102 = vector.extract_strided_slice %100 {offsets = [0, 0], sizes = [8, 128], strides = [1, 1]} : vector<8x384xf32> to vector<8x128xf32>
    %103 = arith.extf %101 : vector<8x128xbf16> to vector<8x128xf32>
    %104 = arith.addf %103, %102 : vector<8x128xf32>
    %cst_37 = arith.constant 0.000000e+00 : f32
    %105 = vector.broadcast %cst_37 : f32 to vector<8x128xf32>
    %106 = arith.subf %105, %104 : vector<8x128xf32>
    %107 = math.exp %106 : vector<8x128xf32>
    %cst_38 = arith.constant 1.000000e+00 : f32
    %108 = vector.broadcast %cst_38 : f32 to vector<8x128xf32>
    %109 = arith.addf %108, %107 : vector<8x128xf32>
    %110 = tpu.reciprocal %109 {approx = true} : vector<8x128xf32> -> vector<8x128xf32>
    %111 = vector.extract_strided_slice %98 {offsets = [0, 128], sizes = [8, 128], strides = [1, 1]} : vector<8x384xbf16> to vector<8x128xbf16>
    %112 = vector.extract_strided_slice %100 {offsets = [0, 128], sizes = [8, 128], strides = [1, 1]} : vector<8x384xf32> to vector<8x128xf32>
    %113 = arith.extf %111 : vector<8x128xbf16> to vector<8x128xf32>
    %114 = arith.addf %113, %112 : vector<8x128xf32>
    %cst_39 = arith.constant 0.000000e+00 : f32
    %115 = vector.broadcast %cst_39 : f32 to vector<8x128xf32>
    %116 = arith.subf %115, %114 : vector<8x128xf32>
    %117 = math.exp %116 : vector<8x128xf32>
    %cst_40 = arith.constant 1.000000e+00 : f32
    %118 = vector.broadcast %cst_40 : f32 to vector<8x128xf32>
    %119 = arith.addf %118, %117 : vector<8x128xf32>
    %120 = tpu.reciprocal %119 {approx = true} : vector<8x128xf32> -> vector<8x128xf32>
    %121 = vector.extract_strided_slice %98 {offsets = [0, 256], sizes = [8, 128], strides = [1, 1]} : vector<8x384xbf16> to vector<8x128xbf16>
    %122 = vector.extract_strided_slice %100 {offsets = [0, 256], sizes = [8, 128], strides = [1, 1]} : vector<8x384xf32> to vector<8x128xf32>
    %123 = vector.broadcast %4 : vector<1x128xf32> to vector<8x128xf32>
    %124 = arith.addf %122, %123 : vector<8x128xf32>
    %125 = arith.mulf %110, %124 : vector<8x128xf32>
    %126 = arith.extf %121 : vector<8x128xbf16> to vector<8x128xf32>
    %127 = arith.addf %126, %125 : vector<8x128xf32>
    %128 = math.tanh %127 : vector<8x128xf32>
    %cst_41 = arith.constant 1.000000e+00 : f32
    %129 = vector.broadcast %cst_41 : f32 to vector<8x128xf32>
    %130 = arith.subf %129, %120 : vector<8x128xf32>
    %131 = arith.mulf %130, %128 : vector<8x128xf32>
    %132 = arith.mulf %120, %95 : vector<8x128xf32>
    %133 = arith.addf %131, %132 : vector<8x128xf32>
    %c0_42 = arith.constant 0 : index
    %c0_43 = arith.constant 0 : index
    %134 = vector.load %arg6[%c0_42, %c0_43] : memref<8x128xf32, #tpu.memory_space<vmem>>, vector<8x128xf32>
    tpu.vector_store %arg6[%c0_42, %c0_43], %133 {strides = array<i32>} : memref<8x128xf32, #tpu.memory_space<vmem>>, vector<8x128xf32>,
    %135 = arith.truncf %133 : vector<8x128xf32> to vector<8x128xbf16>
    %136 = arith.index_cast %c2_i32 : i32 to index
    %c0_44 = arith.constant 0 : index
    %c0_45 = arith.constant 0 : index
    %137 = vector.load %arg5[%136, %c0_44, %c0_45] : memref<8x8x128xbf16, #tpu.memory_space<vmem>>, vector<1x8x128xbf16>
    %138 = vector.shape_cast %137 : vector<1x8x128xbf16> to vector<8x128xbf16>
    %139 = vector.shape_cast %135 : vector<8x128xbf16> to vector<1x8x128xbf16>
    tpu.vector_store %arg5[%136, %c0_44, %c0_45], %139 {strides = array<i32>} : memref<8x8x128xbf16, #tpu.memory_space<vmem>>, vector<1x8x128xbf16>,
    %c3_i32 = arith.constant 3 : i32
    %c0_46 = arith.constant 0 : index
    %c0_47 = arith.constant 0 : index
    %140 = vector.load %arg6[%c0_46, %c0_47] : memref<8x128xf32, #tpu.memory_space<vmem>>, vector<8x128xf32>
    %141 = arith.index_cast %c3_i32 : i32 to index
    %c0_48 = arith.constant 0 : index
    %c0_49 = arith.constant 0 : index
    %142 = vector.load %arg2[%141, %c0_48, %c0_49] : memref<8x8x384xbf16, #tpu.memory_space<vmem>>, vector<1x8x384xbf16>
    %143 = vector.shape_cast %142 : vector<1x8x384xbf16> to vector<8x384xbf16>
    %144 = arith.truncf %140 : vector<8x128xf32> to vector<8x128xbf16>
    %cst_50 = arith.constant dense<0.000000e+00> : vector<8x384xf32>
    %145 = tpu.matmul %144, %3, %cst_50 {dimension_numbers = #tpu.dot_dimension_numbers<[1], [0], [0], [1], [0, 0, 1, 1], [], []>} : vector<8x128xbf16>, vector<128x384xbf16>, vector<8x384xf32> -> vector<8x384xf32>
    %146 = vector.extract_strided_slice %143 {offsets = [0, 0], sizes = [8, 128], strides = [1, 1]} : vector<8x384xbf16> to vector<8x128xbf16>
    %147 = vector.extract_strided_slice %145 {offsets = [0, 0], sizes = [8, 128], strides = [1, 1]} : vector<8x384xf32> to vector<8x128xf32>
    %148 = arith.extf %146 : vector<8x128xbf16> to vector<8x128xf32>
    %149 = arith.addf %148, %147 : vector<8x128xf32>
    %cst_51 = arith.constant 0.000000e+00 : f32
    %150 = vector.broadcast %cst_51 : f32 to vector<8x128xf32>
    %151 = arith.subf %150, %149 : vector<8x128xf32>
    %152 = math.exp %151 : vector<8x128xf32>
    %cst_52 = arith.constant 1.000000e+00 : f32
    %153 = vector.broadcast %cst_52 : f32 to vector<8x128xf32>
    %154 = arith.addf %153, %152 : vector<8x128xf32>
    %155 = tpu.reciprocal %154 {approx = true} : vector<8x128xf32> -> vector<8x128xf32>
    %156 = vector.extract_strided_slice %143 {offsets = [0, 128], sizes = [8, 128], strides = [1, 1]} : vector<8x384xbf16> to vector<8x128xbf16>
    %157 = vector.extract_strided_slice %145 {offsets = [0, 128], sizes = [8, 128], strides = [1, 1]} : vector<8x384xf32> to vector<8x128xf32>
    %158 = arith.extf %156 : vector<8x128xbf16> to vector<8x128xf32>
    %159 = arith.addf %158, %157 : vector<8x128xf32>
    %cst_53 = arith.constant 0.000000e+00 : f32
    %160 = vector.broadcast %cst_53 : f32 to vector<8x128xf32>
    %161 = arith.subf %160, %159 : vector<8x128xf32>
    %162 = math.exp %161 : vector<8x128xf32>
    %cst_54 = arith.constant 1.000000e+00 : f32
    %163 = vector.broadcast %cst_54 : f32 to vector<8x128xf32>
    %164 = arith.addf %163, %162 : vector<8x128xf32>
    %165 = tpu.reciprocal %164 {approx = true} : vector<8x128xf32> -> vector<8x128xf32>
    %166 = vector.extract_strided_slice %143 {offsets = [0, 256], sizes = [8, 128], strides = [1, 1]} : vector<8x384xbf16> to vector<8x128xbf16>
    %167 = vector.extract_strided_slice %145 {offsets = [0, 256], sizes = [8, 128], strides = [1, 1]} : vector<8x384xf32> to vector<8x128xf32>
    %168 = vector.broadcast %4 : vector<1x128xf32> to vector<8x128xf32>
    %169 = arith.addf %167, %168 : vector<8x128xf32>
    %170 = arith.mulf %155, %169 : vector<8x128xf32>
    %171 = arith.extf %166 : vector<8x128xbf16> to vector<8x128xf32>
    %172 = arith.addf %171, %170 : vector<8x128xf32>
    %173 = math.tanh %172 : vector<8x128xf32>
    %cst_55 = arith.constant 1.000000e+00 : f32
    %174 = vector.broadcast %cst_55 : f32 to vector<8x128xf32>
    %175 = arith.subf %174, %165 : vector<8x128xf32>
    %176 = arith.mulf %175, %173 : vector<8x128xf32>
    %177 = arith.mulf %165, %140 : vector<8x128xf32>
    %178 = arith.addf %176, %177 : vector<8x128xf32>
    %c0_56 = arith.constant 0 : index
    %c0_57 = arith.constant 0 : index
    %179 = vector.load %arg6[%c0_56, %c0_57] : memref<8x128xf32, #tpu.memory_space<vmem>>, vector<8x128xf32>
    tpu.vector_store %arg6[%c0_56, %c0_57], %178 {strides = array<i32>} : memref<8x128xf32, #tpu.memory_space<vmem>>, vector<8x128xf32>,
    %180 = arith.truncf %178 : vector<8x128xf32> to vector<8x128xbf16>
    %181 = arith.index_cast %c3_i32 : i32 to index
    %c0_58 = arith.constant 0 : index
    %c0_59 = arith.constant 0 : index
    %182 = vector.load %arg5[%181, %c0_58, %c0_59] : memref<8x8x128xbf16, #tpu.memory_space<vmem>>, vector<1x8x128xbf16>
    %183 = vector.shape_cast %182 : vector<1x8x128xbf16> to vector<8x128xbf16>
    %184 = vector.shape_cast %180 : vector<8x128xbf16> to vector<1x8x128xbf16>
    tpu.vector_store %arg5[%181, %c0_58, %c0_59], %184 {strides = array<i32>} : memref<8x8x128xbf16, #tpu.memory_space<vmem>>, vector<1x8x128xbf16>,
    %c4_i32 = arith.constant 4 : i32
    %c0_60 = arith.constant 0 : index
    %c0_61 = arith.constant 0 : index
    %185 = vector.load %arg6[%c0_60, %c0_61] : memref<8x128xf32, #tpu.memory_space<vmem>>, vector<8x128xf32>
    %186 = arith.index_cast %c4_i32 : i32 to index
    %c0_62 = arith.constant 0 : index
    %c0_63 = arith.constant 0 : index
    %187 = vector.load %arg2[%186, %c0_62, %c0_63] : memref<8x8x384xbf16, #tpu.memory_space<vmem>>, vector<1x8x384xbf16>
    %188 = vector.shape_cast %187 : vector<1x8x384xbf16> to vector<8x384xbf16>
    %189 = arith.truncf %185 : vector<8x128xf32> to vector<8x128xbf16>
    %cst_64 = arith.constant dense<0.000000e+00> : vector<8x384xf32>
    %190 = tpu.matmul %189, %3, %cst_64 {dimension_numbers = #tpu.dot_dimension_numbers<[1], [0], [0], [1], [0, 0, 1, 1], [], []>} : vector<8x128xbf16>, vector<128x384xbf16>, vector<8x384xf32> -> vector<8x384xf32>
    %191 = vector.extract_strided_slice %188 {offsets = [0, 0], sizes = [8, 128], strides = [1, 1]} : vector<8x384xbf16> to vector<8x128xbf16>
    %192 = vector.extract_strided_slice %190 {offsets = [0, 0], sizes = [8, 128], strides = [1, 1]} : vector<8x384xf32> to vector<8x128xf32>
    %193 = arith.extf %191 : vector<8x128xbf16> to vector<8x128xf32>
    %194 = arith.addf %193, %192 : vector<8x128xf32>
    %cst_65 = arith.constant 0.000000e+00 : f32
    %195 = vector.broadcast %cst_65 : f32 to vector<8x128xf32>
    %196 = arith.subf %195, %194 : vector<8x128xf32>
    %197 = math.exp %196 : vector<8x128xf32>
    %cst_66 = arith.constant 1.000000e+00 : f32
    %198 = vector.broadcast %cst_66 : f32 to vector<8x128xf32>
    %199 = arith.addf %198, %197 : vector<8x128xf32>
    %200 = tpu.reciprocal %199 {approx = true} : vector<8x128xf32> -> vector<8x128xf32>
    %201 = vector.extract_strided_slice %188 {offsets = [0, 128], sizes = [8, 128], strides = [1, 1]} : vector<8x384xbf16> to vector<8x128xbf16>
    %202 = vector.extract_strided_slice %190 {offsets = [0, 128], sizes = [8, 128], strides = [1, 1]} : vector<8x384xf32> to vector<8x128xf32>
    %203 = arith.extf %201 : vector<8x128xbf16> to vector<8x128xf32>
    %204 = arith.addf %203, %202 : vector<8x128xf32>
    %cst_67 = arith.constant 0.000000e+00 : f32
    %205 = vector.broadcast %cst_67 : f32 to vector<8x128xf32>
    %206 = arith.subf %205, %204 : vector<8x128xf32>
    %207 = math.exp %206 : vector<8x128xf32>
    %cst_68 = arith.constant 1.000000e+00 : f32
    %208 = vector.broadcast %cst_68 : f32 to vector<8x128xf32>
    %209 = arith.addf %208, %207 : vector<8x128xf32>
    %210 = tpu.reciprocal %209 {approx = true} : vector<8x128xf32> -> vector<8x128xf32>
    %211 = vector.extract_strided_slice %188 {offsets = [0, 256], sizes = [8, 128], strides = [1, 1]} : vector<8x384xbf16> to vector<8x128xbf16>
    %212 = vector.extract_strided_slice %190 {offsets = [0, 256], sizes = [8, 128], strides = [1, 1]} : vector<8x384xf32> to vector<8x128xf32>
    %213 = vector.broadcast %4 : vector<1x128xf32> to vector<8x128xf32>
    %214 = arith.addf %212, %213 : vector<8x128xf32>
    %215 = arith.mulf %200, %214 : vector<8x128xf32>
    %216 = arith.extf %211 : vector<8x128xbf16> to vector<8x128xf32>
    %217 = arith.addf %216, %215 : vector<8x128xf32>
    %218 = math.tanh %217 : vector<8x128xf32>
    %cst_69 = arith.constant 1.000000e+00 : f32
    %219 = vector.broadcast %cst_69 : f32 to vector<8x128xf32>
    %220 = arith.subf %219, %210 : vector<8x128xf32>
    %221 = arith.mulf %220, %218 : vector<8x128xf32>
    %222 = arith.mulf %210, %185 : vector<8x128xf32>
    %223 = arith.addf %221, %222 : vector<8x128xf32>
    %c0_70 = arith.constant 0 : index
    %c0_71 = arith.constant 0 : index
    %224 = vector.load %arg6[%c0_70, %c0_71] : memref<8x128xf32, #tpu.memory_space<vmem>>, vector<8x128xf32>
    tpu.vector_store %arg6[%c0_70, %c0_71], %223 {strides = array<i32>} : memref<8x128xf32, #tpu.memory_space<vmem>>, vector<8x128xf32>,
    %225 = arith.truncf %223 : vector<8x128xf32> to vector<8x128xbf16>
    %226 = arith.index_cast %c4_i32 : i32 to index
    %c0_72 = arith.constant 0 : index
    %c0_73 = arith.constant 0 : index
    %227 = vector.load %arg5[%226, %c0_72, %c0_73] : memref<8x8x128xbf16, #tpu.memory_space<vmem>>, vector<1x8x128xbf16>
    %228 = vector.shape_cast %227 : vector<1x8x128xbf16> to vector<8x128xbf16>
    %229 = vector.shape_cast %225 : vector<8x128xbf16> to vector<1x8x128xbf16>
    tpu.vector_store %arg5[%226, %c0_72, %c0_73], %229 {strides = array<i32>} : memref<8x8x128xbf16, #tpu.memory_space<vmem>>, vector<1x8x128xbf16>,
    %c5_i32 = arith.constant 5 : i32
    %c0_74 = arith.constant 0 : index
    %c0_75 = arith.constant 0 : index
    %230 = vector.load %arg6[%c0_74, %c0_75] : memref<8x128xf32, #tpu.memory_space<vmem>>, vector<8x128xf32>
    %231 = arith.index_cast %c5_i32 : i32 to index
    %c0_76 = arith.constant 0 : index
    %c0_77 = arith.constant 0 : index
    %232 = vector.load %arg2[%231, %c0_76, %c0_77] : memref<8x8x384xbf16, #tpu.memory_space<vmem>>, vector<1x8x384xbf16>
    %233 = vector.shape_cast %232 : vector<1x8x384xbf16> to vector<8x384xbf16>
    %234 = arith.truncf %230 : vector<8x128xf32> to vector<8x128xbf16>
    %cst_78 = arith.constant dense<0.000000e+00> : vector<8x384xf32>
    %235 = tpu.matmul %234, %3, %cst_78 {dimension_numbers = #tpu.dot_dimension_numbers<[1], [0], [0], [1], [0, 0, 1, 1], [], []>} : vector<8x128xbf16>, vector<128x384xbf16>, vector<8x384xf32> -> vector<8x384xf32>
    %236 = vector.extract_strided_slice %233 {offsets = [0, 0], sizes = [8, 128], strides = [1, 1]} : vector<8x384xbf16> to vector<8x128xbf16>
    %237 = vector.extract_strided_slice %235 {offsets = [0, 0], sizes = [8, 128], strides = [1, 1]} : vector<8x384xf32> to vector<8x128xf32>
    %238 = arith.extf %236 : vector<8x128xbf16> to vector<8x128xf32>
    %239 = arith.addf %238, %237 : vector<8x128xf32>
    %cst_79 = arith.constant 0.000000e+00 : f32
    %240 = vector.broadcast %cst_79 : f32 to vector<8x128xf32>
    %241 = arith.subf %240, %239 : vector<8x128xf32>
    %242 = math.exp %241 : vector<8x128xf32>
    %cst_80 = arith.constant 1.000000e+00 : f32
    %243 = vector.broadcast %cst_80 : f32 to vector<8x128xf32>
    %244 = arith.addf %243, %242 : vector<8x128xf32>
    %245 = tpu.reciprocal %244 {approx = true} : vector<8x128xf32> -> vector<8x128xf32>
    %246 = vector.extract_strided_slice %233 {offsets = [0, 128], sizes = [8, 128], strides = [1, 1]} : vector<8x384xbf16> to vector<8x128xbf16>
    %247 = vector.extract_strided_slice %235 {offsets = [0, 128], sizes = [8, 128], strides = [1, 1]} : vector<8x384xf32> to vector<8x128xf32>
    %248 = arith.extf %246 : vector<8x128xbf16> to vector<8x128xf32>
    %249 = arith.addf %248, %247 : vector<8x128xf32>
    %cst_81 = arith.constant 0.000000e+00 : f32
    %250 = vector.broadcast %cst_81 : f32 to vector<8x128xf32>
    %251 = arith.subf %250, %249 : vector<8x128xf32>
    %252 = math.exp %251 : vector<8x128xf32>
    %cst_82 = arith.constant 1.000000e+00 : f32
    %253 = vector.broadcast %cst_82 : f32 to vector<8x128xf32>
    %254 = arith.addf %253, %252 : vector<8x128xf32>
    %255 = tpu.reciprocal %254 {approx = true} : vector<8x128xf32> -> vector<8x128xf32>
    %256 = vector.extract_strided_slice %233 {offsets = [0, 256], sizes = [8, 128], strides = [1, 1]} : vector<8x384xbf16> to vector<8x128xbf16>
    %257 = vector.extract_strided_slice %235 {offsets = [0, 256], sizes = [8, 128], strides = [1, 1]} : vector<8x384xf32> to vector<8x128xf32>
    %258 = vector.broadcast %4 : vector<1x128xf32> to vector<8x128xf32>
    %259 = arith.addf %257, %258 : vector<8x128xf32>
    %260 = arith.mulf %245, %259 : vector<8x128xf32>
    %261 = arith.extf %256 : vector<8x128xbf16> to vector<8x128xf32>
    %262 = arith.addf %261, %260 : vector<8x128xf32>
    %263 = math.tanh %262 : vector<8x128xf32>
    %cst_83 = arith.constant 1.000000e+00 : f32
    %264 = vector.broadcast %cst_83 : f32 to vector<8x128xf32>
    %265 = arith.subf %264, %255 : vector<8x128xf32>
    %266 = arith.mulf %265, %263 : vector<8x128xf32>
    %267 = arith.mulf %255, %230 : vector<8x128xf32>
    %268 = arith.addf %266, %267 : vector<8x128xf32>
    %c0_84 = arith.constant 0 : index
    %c0_85 = arith.constant 0 : index
    %269 = vector.load %arg6[%c0_84, %c0_85] : memref<8x128xf32, #tpu.memory_space<vmem>>, vector<8x128xf32>
    tpu.vector_store %arg6[%c0_84, %c0_85], %268 {strides = array<i32>} : memref<8x128xf32, #tpu.memory_space<vmem>>, vector<8x128xf32>,
    %270 = arith.truncf %268 : vector<8x128xf32> to vector<8x128xbf16>
    %271 = arith.index_cast %c5_i32 : i32 to index
    %c0_86 = arith.constant 0 : index
    %c0_87 = arith.constant 0 : index
    %272 = vector.load %arg5[%271, %c0_86, %c0_87] : memref<8x8x128xbf16, #tpu.memory_space<vmem>>, vector<1x8x128xbf16>
    %273 = vector.shape_cast %272 : vector<1x8x128xbf16> to vector<8x128xbf16>
    %274 = vector.shape_cast %270 : vector<8x128xbf16> to vector<1x8x128xbf16>
    tpu.vector_store %arg5[%271, %c0_86, %c0_87], %274 {strides = array<i32>} : memref<8x8x128xbf16, #tpu.memory_space<vmem>>, vector<1x8x128xbf16>,
    %c6_i32 = arith.constant 6 : i32
    %c0_88 = arith.constant 0 : index
    %c0_89 = arith.constant 0 : index
    %275 = vector.load %arg6[%c0_88, %c0_89] : memref<8x128xf32, #tpu.memory_space<vmem>>, vector<8x128xf32>
    %276 = arith.index_cast %c6_i32 : i32 to index
    %c0_90 = arith.constant 0 : index
    %c0_91 = arith.constant 0 : index
    %277 = vector.load %arg2[%276, %c0_90, %c0_91] : memref<8x8x384xbf16, #tpu.memory_space<vmem>>, vector<1x8x384xbf16>
    %278 = vector.shape_cast %277 : vector<1x8x384xbf16> to vector<8x384xbf16>
    %279 = arith.truncf %275 : vector<8x128xf32> to vector<8x128xbf16>
    %cst_92 = arith.constant dense<0.000000e+00> : vector<8x384xf32>
    %280 = tpu.matmul %279, %3, %cst_92 {dimension_numbers = #tpu.dot_dimension_numbers<[1], [0], [0], [1], [0, 0, 1, 1], [], []>} : vector<8x128xbf16>, vector<128x384xbf16>, vector<8x384xf32> -> vector<8x384xf32>
    %281 = vector.extract_strided_slice %278 {offsets = [0, 0], sizes = [8, 128], strides = [1, 1]} : vector<8x384xbf16> to vector<8x128xbf16>
    %282 = vector.extract_strided_slice %280 {offsets = [0, 0], sizes = [8, 128], strides = [1, 1]} : vector<8x384xf32> to vector<8x128xf32>
    %283 = arith.extf %281 : vector<8x128xbf16> to vector<8x128xf32>
    %284 = arith.addf %283, %282 : vector<8x128xf32>
    %cst_93 = arith.constant 0.000000e+00 : f32
    %285 = vector.broadcast %cst_93 : f32 to vector<8x128xf32>
    %286 = arith.subf %285, %284 : vector<8x128xf32>
    %287 = math.exp %286 : vector<8x128xf32>
    %cst_94 = arith.constant 1.000000e+00 : f32
    %288 = vector.broadcast %cst_94 : f32 to vector<8x128xf32>
    %289 = arith.addf %288, %287 : vector<8x128xf32>
    %290 = tpu.reciprocal %289 {approx = true} : vector<8x128xf32> -> vector<8x128xf32>
    %291 = vector.extract_strided_slice %278 {offsets = [0, 128], sizes = [8, 128], strides = [1, 1]} : vector<8x384xbf16> to vector<8x128xbf16>
    %292 = vector.extract_strided_slice %280 {offsets = [0, 128], sizes = [8, 128], strides = [1, 1]} : vector<8x384xf32> to vector<8x128xf32>
    %293 = arith.extf %291 : vector<8x128xbf16> to vector<8x128xf32>
    %294 = arith.addf %293, %292 : vector<8x128xf32>
    %cst_95 = arith.constant 0.000000e+00 : f32
    %295 = vector.broadcast %cst_95 : f32 to vector<8x128xf32>
    %296 = arith.subf %295, %294 : vector<8x128xf32>
    %297 = math.exp %296 : vector<8x128xf32>
    %cst_96 = arith.constant 1.000000e+00 : f32
    %298 = vector.broadcast %cst_96 : f32 to vector<8x128xf32>
    %299 = arith.addf %298, %297 : vector<8x128xf32>
    %300 = tpu.reciprocal %299 {approx = true} : vector<8x128xf32> -> vector<8x128xf32>
    %301 = vector.extract_strided_slice %278 {offsets = [0, 256], sizes = [8, 128], strides = [1, 1]} : vector<8x384xbf16> to vector<8x128xbf16>
    %302 = vector.extract_strided_slice %280 {offsets = [0, 256], sizes = [8, 128], strides = [1, 1]} : vector<8x384xf32> to vector<8x128xf32>
    %303 = vector.broadcast %4 : vector<1x128xf32> to vector<8x128xf32>
    %304 = arith.addf %302, %303 : vector<8x128xf32>
    %305 = arith.mulf %290, %304 : vector<8x128xf32>
    %306 = arith.extf %301 : vector<8x128xbf16> to vector<8x128xf32>
    %307 = arith.addf %306, %305 : vector<8x128xf32>
    %308 = math.tanh %307 : vector<8x128xf32>
    %cst_97 = arith.constant 1.000000e+00 : f32
    %309 = vector.broadcast %cst_97 : f32 to vector<8x128xf32>
    %310 = arith.subf %309, %300 : vector<8x128xf32>
    %311 = arith.mulf %310, %308 : vector<8x128xf32>
    %312 = arith.mulf %300, %275 : vector<8x128xf32>
    %313 = arith.addf %311, %312 : vector<8x128xf32>
    %c0_98 = arith.constant 0 : index
    %c0_99 = arith.constant 0 : index
    %314 = vector.load %arg6[%c0_98, %c0_99] : memref<8x128xf32, #tpu.memory_space<vmem>>, vector<8x128xf32>
    tpu.vector_store %arg6[%c0_98, %c0_99], %313 {strides = array<i32>} : memref<8x128xf32, #tpu.memory_space<vmem>>, vector<8x128xf32>,
    %315 = arith.truncf %313 : vector<8x128xf32> to vector<8x128xbf16>
    %316 = arith.index_cast %c6_i32 : i32 to index
    %c0_100 = arith.constant 0 : index
    %c0_101 = arith.constant 0 : index
    %317 = vector.load %arg5[%316, %c0_100, %c0_101] : memref<8x8x128xbf16, #tpu.memory_space<vmem>>, vector<1x8x128xbf16>
    %318 = vector.shape_cast %317 : vector<1x8x128xbf16> to vector<8x128xbf16>
    %319 = vector.shape_cast %315 : vector<8x128xbf16> to vector<1x8x128xbf16>
    tpu.vector_store %arg5[%316, %c0_100, %c0_101], %319 {strides = array<i32>} : memref<8x8x128xbf16, #tpu.memory_space<vmem>>, vector<1x8x128xbf16>,
    %c7_i32 = arith.constant 7 : i32
    %c0_102 = arith.constant 0 : index
    %c0_103 = arith.constant 0 : index
    %320 = vector.load %arg6[%c0_102, %c0_103] : memref<8x128xf32, #tpu.memory_space<vmem>>, vector<8x128xf32>
    %321 = arith.index_cast %c7_i32 : i32 to index
    %c0_104 = arith.constant 0 : index
    %c0_105 = arith.constant 0 : index
    %322 = vector.load %arg2[%321, %c0_104, %c0_105] : memref<8x8x384xbf16, #tpu.memory_space<vmem>>, vector<1x8x384xbf16>
    %323 = vector.shape_cast %322 : vector<1x8x384xbf16> to vector<8x384xbf16>
    %324 = arith.truncf %320 : vector<8x128xf32> to vector<8x128xbf16>
    %cst_106 = arith.constant dense<0.000000e+00> : vector<8x384xf32>
    %325 = tpu.matmul %324, %3, %cst_106 {dimension_numbers = #tpu.dot_dimension_numbers<[1], [0], [0], [1], [0, 0, 1, 1], [], []>} : vector<8x128xbf16>, vector<128x384xbf16>, vector<8x384xf32> -> vector<8x384xf32>
    %326 = vector.extract_strided_slice %323 {offsets = [0, 0], sizes = [8, 128], strides = [1, 1]} : vector<8x384xbf16> to vector<8x128xbf16>
    %327 = vector.extract_strided_slice %325 {offsets = [0, 0], sizes = [8, 128], strides = [1, 1]} : vector<8x384xf32> to vector<8x128xf32>
    %328 = arith.extf %326 : vector<8x128xbf16> to vector<8x128xf32>
    %329 = arith.addf %328, %327 : vector<8x128xf32>
    %cst_107 = arith.constant 0.000000e+00 : f32
    %330 = vector.broadcast %cst_107 : f32 to vector<8x128xf32>
    %331 = arith.subf %330, %329 : vector<8x128xf32>
    %332 = math.exp %331 : vector<8x128xf32>
    %cst_108 = arith.constant 1.000000e+00 : f32
    %333 = vector.broadcast %cst_108 : f32 to vector<8x128xf32>
    %334 = arith.addf %333, %332 : vector<8x128xf32>
    %335 = tpu.reciprocal %334 {approx = true} : vector<8x128xf32> -> vector<8x128xf32>
    %336 = vector.extract_strided_slice %323 {offsets = [0, 128], sizes = [8, 128], strides = [1, 1]} : vector<8x384xbf16> to vector<8x128xbf16>
    %337 = vector.extract_strided_slice %325 {offsets = [0, 128], sizes = [8, 128], strides = [1, 1]} : vector<8x384xf32> to vector<8x128xf32>
    %338 = arith.extf %336 : vector<8x128xbf16> to vector<8x128xf32>
    %339 = arith.addf %338, %337 : vector<8x128xf32>
    %cst_109 = arith.constant 0.000000e+00 : f32
    %340 = vector.broadcast %cst_109 : f32 to vector<8x128xf32>
    %341 = arith.subf %340, %339 : vector<8x128xf32>
    %342 = math.exp %341 : vector<8x128xf32>
    %cst_110 = arith.constant 1.000000e+00 : f32
    %343 = vector.broadcast %cst_110 : f32 to vector<8x128xf32>
    %344 = arith.addf %343, %342 : vector<8x128xf32>
    %345 = tpu.reciprocal %344 {approx = true} : vector<8x128xf32> -> vector<8x128xf32>
    %346 = vector.extract_strided_slice %323 {offsets = [0, 256], sizes = [8, 128], strides = [1, 1]} : vector<8x384xbf16> to vector<8x128xbf16>
    %347 = vector.extract_strided_slice %325 {offsets = [0, 256], sizes = [8, 128], strides = [1, 1]} : vector<8x384xf32> to vector<8x128xf32>
    %348 = vector.broadcast %4 : vector<1x128xf32> to vector<8x128xf32>
    %349 = arith.addf %347, %348 : vector<8x128xf32>
    %350 = arith.mulf %335, %349 : vector<8x128xf32>
    %351 = arith.extf %346 : vector<8x128xbf16> to vector<8x128xf32>
    %352 = arith.addf %351, %350 : vector<8x128xf32>
    %353 = math.tanh %352 : vector<8x128xf32>
    %cst_111 = arith.constant 1.000000e+00 : f32
    %354 = vector.broadcast %cst_111 : f32 to vector<8x128xf32>
    %355 = arith.subf %354, %345 : vector<8x128xf32>
    %356 = arith.mulf %355, %353 : vector<8x128xf32>
    %357 = arith.mulf %345, %320 : vector<8x128xf32>
    %358 = arith.addf %356, %357 : vector<8x128xf32>
    %c0_112 = arith.constant 0 : index
    %c0_113 = arith.constant 0 : index
    %359 = vector.load %arg6[%c0_112, %c0_113] : memref<8x128xf32, #tpu.memory_space<vmem>>, vector<8x128xf32>
    tpu.vector_store %arg6[%c0_112, %c0_113], %358 {strides = array<i32>} : memref<8x128xf32, #tpu.memory_space<vmem>>, vector<8x128xf32>,
    %360 = arith.truncf %358 : vector<8x128xf32> to vector<8x128xbf16>
    %361 = arith.index_cast %c7_i32 : i32 to index
    %c0_114 = arith.constant 0 : index
    %c0_115 = arith.constant 0 : index
    %362 = vector.load %arg5[%361, %c0_114, %c0_115] : memref<8x8x128xbf16, #tpu.memory_space<vmem>>, vector<1x8x128xbf16>
    %363 = vector.shape_cast %362 : vector<1x8x128xbf16> to vector<8x128xbf16>
    %364 = vector.shape_cast %360 : vector<8x128xbf16> to vector<1x8x128xbf16>
    tpu.vector_store %arg5[%361, %c0_114, %c0_115], %364 {strides = array<i32>} : memref<8x8x128xbf16, #tpu.memory_space<vmem>>, vector<1x8x128xbf16>,
    %c8_i32 = arith.constant 8 : i32
    return
  }
  func.func @transform_0(%arg0: i32, %arg1: i32) -> (i32, i32, i32) {
    %c0_i32 = arith.constant 0 : i32
    %c0_i32_0 = arith.constant 0 : i32
    return %arg1, %arg0, %c0_i32 : i32, i32, i32
  }
  func.func @transform_1(%arg0: i32, %arg1: i32) -> (i32, i32) {
    %c0_i32 = arith.constant 0 : i32
    %c0_i32_0 = arith.constant 0 : i32
    %c0_i32_1 = arith.constant 0 : i32
    return %c0_i32, %c0_i32_0 : i32, i32
  }
  func.func @transform_2(%arg0: i32, %arg1: i32) -> (i32, i32) {
    %c0_i32 = arith.constant 0 : i32
    %c0_i32_0 = arith.constant 0 : i32
    %c0_i32_1 = arith.constant 0 : i32
    return %c0_i32, %c0_i32_0 : i32, i32
  }
  func.func @transform_3(%arg0: i32, %arg1: i32) -> (i32, i32, i32) {
    %c0_i32 = arith.constant 0 : i32
    %c0_i32_0 = arith.constant 0 : i32
    return %arg1, %arg0, %c0_i32 : i32, i32, i32
  }
}

</mosaic_0001>

<bundles_post_ra>
// kernel: gru_forward.4
= control target key start
LH: loop header
LB: loop body
LE: loop exit
PB: predicated region body
PF: predicated region fallthrough
CT: control target
= control target key end

     0   :  { %8 = vsyncpa [#allocation3], 0  ;;  %s299_s15 = smov [#allocation2]   ;;  %s443_s0 = inlined_call_operand.vmem [shape: bf16[64,16], index: 0, kind: input, shape index: {}]   ;;  %s444_s1 = inlined_call_operand.vmem [shape: bf16[16,384], index: 1, kind: input, shape index: {}]   ;;  %s445_s2 = inlined_call_operand.hbm [shape: f32[1,384], index: 2, kind: input, shape index: {}]   ;;  %s446_s3 = inlined_call_operand.vmem [shape: bf16[64,384], index: 3, kind: output, shape index: {}]  }
   0x1   :  { %s18_s14 = sshll.u32 %s445_s2, 4  ;;  %s20_s16 = sshll.u32 %s299_s15, 4  ;;  %s19_s14 = int_to_ptr.hbm [resolvable:$true] %s18_s14  ;;  %s21_s16 = int_to_ptr.vmem [resolvable:$true] %s20_s16 }
   0x2   :  { %23 = dma.hbm_to_vmem [thread:$0]  %s19_s14, 48, %s21_s16, [#allocation3]  }
   0x3   :  { %297 = dma.done.wait [#allocation3], 48  }
   0x4   :  { %298 = vsyncadd [#allocation3], 4294967248  ;;  %v240_v0 = vld [vmem:[%s444_s1] sm:$0xf]  ;;  %v267_v1 = vld [vmem:[%s444_s1 + $0x8] sm:$0xf0] }
   0x5   :  { %v266_v2 = vld [vmem:[%s444_s1 + $0x4] sm:$0xf]  ;;  %v241_v3 = vor.u32 %v267_v1, %v240_v0  ;;  %v242_v4 = vld [vmem:[%s444_s1 + $0xc] sm:$0xf0]  ;;  %v248_v5 = vld [vmem:[%s444_s1 + $0x8] sm:$0xf] }
   0x6   :  { %v268_v6 = vld [vmem:[%s444_s1 + $0x10] sm:$0xf0]  ;;  %v245_v7 = vor.u32 %v266_v2, %v242_v4  ;;  %v262_v9 = vld [vmem:[%s443_s0] sm:$0xff]  ;;  %v263_v10 = vld [vmem:[%s443_s0 + $0x8] sm:$0xff]  ;;  %vm85_vm0 = vcmask 130048  }
   0x7   :  { %v249_v8 = vor.u32 %v268_v6, %v248_v5  ;;  %105 = vmatpush.bf16.msra.mxu0 %v241_v3  ;;  %269 = vmatpush.bf16.msra.mxu3 %v241_v3  ;;  %v264_v11 = vld [vmem:[%s443_s0 + $0x10] sm:$0xff]  ;;  %v265_v12 = vld [vmem:[%s443_s0 + $0x18] sm:$0xff]  ;;  %v41_v13 = vld [vmem:[#allocation2] sm:$0x7] }
   0x8   :  { %270 = vmatpush.bf16.msra.mxu1 %v245_v7  ;;  %v365_v15 = vperm.slane %v41_v13, 1  ;;  %v367_v17 = vperm.slane %v41_v13, 0  ;;  %v369_v18 = vperm.slane %v41_v13, 2 }
   0x9   :  { %271 = vmatpush.bf16.msra.mxu2 %v249_v8 }
   0xa   :  { %250 = vmatmul.msk.bf16.vlgmr.msra.gmra.mxu0 %vm85_vm0, %v262_v9  ;;  %251 = vmatmul.msk.bf16.vlgmr.msra.gmra.mxu3 %vm85_vm0, %v263_v10 }
   0xb   :  { %134 = vmatpush.bf16.msrb.mxu0 %v245_v7  ;;  %255 = vmatmul.msk.bf16.vlgmr.msra.gmra.mxu1 %vm85_vm0, %v263_v10 }
   0xc   :  { %259 = vmatmul.msk.bf16.vlgmr.msra.gmra.mxu2 %vm85_vm0, %v263_v10 }
   0xf   :  { %163 = vmatpush.bf16.msra.mxu0 %v249_v8 }
  0x1a   :  { %252 = vmatmul.msk.bf16.gmra.mxu3 %vm85_vm0, %v264_v11  ;;  %254 = vmatmul.msk.bf16.vlgmr.msrb.gmra.mxu0 %vm85_vm0, %v262_v9 }
  0x1b   :  { %256 = vmatmul.msk.bf16.gmra.mxu1 %vm85_vm0, %v264_v11 }
  0x1c   :  { %260 = vmatmul.msk.bf16.gmra.mxu2 %vm85_vm0, %v264_v11 }
  0x2a   :  { %253 = vmatmul.msk.bf16.gmra.mxu3 %vm85_vm0, %v265_v12  ;;  %258 = vmatmul.msk.bf16.vlgmr.msra.gmra.mxu0 %vm85_vm0, %v262_v9 }
  0x2b   :  { %257 = vmatmul.msk.bf16.gmra.mxu1 %vm85_vm0, %v265_v12 }
  0x2c   :  { %261 = vmatmul.msk.bf16.gmra.mxu2 %vm85_vm0, %v265_v12 }
  0x87   :  { %v107_v14 = vpop.f32.mrf.mxu0 }
  0x88   :  { %v141_v16 = vpop.f32.mrf.mxu1  ;;  %v108_v34 = vadd.f32 %v107_v14, %v367_v17 }
  0x89   :  { %v142_v19 = vadd.f32 %v141_v16, %v365_v15 }
  0x8d   :  { %v112_v20 = vpop.f32.mrf.mxu3 }
  0x8e   :  { %v113_v21 = vadd.f32 %v112_v20, %v367_v17 }
  0x8f   :  { %v170_v22 = vpop.f32.mrf.mxu2  ;;  %v109_v24 = vpop.f32.mrf.mxu0 }
  0x90   :  { %v171_v23 = vadd.f32 %v170_v22, %v369_v18  ;;  %v189_v25 = vpack.c.bf16 %v142_v19, %v113_v21  ;;  %v143_v26 = vpop.f32.mrf.mxu1  ;;  %v110_v46 = vadd.f32 %v109_v24, %v367_v17 }
  0x91   :  { %v144_v29 = vadd.f32 %v143_v26, %v365_v15 }
  0x92   :  { %v190_v27 = vpack.c.bf16 %v171_v23, %v171_v23  ;;  %205 = vst [vmem:[%s446_s3 + $0x18] sm:$0xff] %v189_v25 }
  0x94   :  { %206 = vst [vmem:[%s446_s3 + $0x20] sm:$0xf] %v190_v27 }
  0x95   :  { %v114_v28 = vpop.f32.mrf.mxu3 }
  0x96   :  { %v115_v30 = vadd.f32 %v114_v28, %v367_v17 }
  0x97   :  { %v172_v31 = vpop.f32.mrf.mxu2  ;;  %v136_v33 = vpop.f32.mrf.mxu0 }
  0x98   :  { %v173_v32 = vadd.f32 %v172_v31, %v369_v18  ;;  %v191_v35 = vpack.c.bf16 %v144_v29, %v115_v30  ;;  %v137_v36 = vadd.f32 %v136_v33, %v365_v15  ;;  %v146_v37 = vpop.f32.mrf.mxu1 }
  0x99   :  { %v147_v40 = vadd.f32 %v146_v37, %v365_v15 }
  0x9a   :  { %v192_v38 = vpack.c.bf16 %v173_v32, %v173_v32  ;;  %207 = vst [vmem:[%s446_s3 + $0x24] sm:$0xff] %v191_v35  ;;  %v185_v39 = vpack.c.bf16 %v137_v36, %v108_v34 }
  0x9c   :  { %208 = vst [vmem:[%s446_s3 + $0x2c] sm:$0xf] %v192_v38 }
  0x9d   :  { %201 = vst [vmem:[%s446_s3] sm:$0xff] %v185_v39  ;;  %v117_v41 = vpop.f32.mrf.mxu3 }
  0x9e   :  { %v118_v42 = vadd.f32 %v117_v41, %v367_v17 }
  0x9f   :  { %v175_v43 = vpop.f32.mrf.mxu2  ;;  %v138_v45 = vpop.f32.mrf.mxu0 }
  0xa0   :  { %v176_v44 = vadd.f32 %v175_v43, %v369_v18  ;;  %v193_v47 = vpack.c.bf16 %v147_v40, %v118_v42  ;;  %v139_v48 = vadd.f32 %v138_v45, %v365_v15  ;;  %v148_v49 = vpop.f32.mrf.mxu1 }
  0xa1   :  { %v149_v53 = vadd.f32 %v148_v49, %v365_v15 }
  0xa2   :  { %v194_v50 = vpack.c.bf16 %v176_v44, %v176_v44  ;;  %209 = vst [vmem:[%s446_s3 + $0x30] sm:$0xff] %v193_v47  ;;  %v187_v51 = vpack.c.bf16 %v139_v48, %v110_v46 }
  0xa4   :  { %210 = vst [vmem:[%s446_s3 + $0x38] sm:$0xf] %v194_v50 }
  0xa5   :  { %203 = vst [vmem:[%s446_s3 + $0xc] sm:$0xff] %v187_v51  ;;  %v119_v52 = vpop.f32.mrf.mxu3 }
  0xa6   :  { %v120_v54 = vadd.f32 %v119_v52, %v367_v17 }
  0xa7   :  { %v177_v55 = vpop.f32.mrf.mxu2  ;;  %v165_v57 = vpop.f32.mrf.mxu0 }
  0xa8   :  { %v178_v56 = vadd.f32 %v177_v55, %v369_v18  ;;  %v195_v58 = vpack.c.bf16 %v149_v53, %v120_v54  ;;  %v166_v59 = vadd.f32 %v165_v57, %v369_v18  ;;  %v151_v61 = vpop.f32.mrf.mxu1 }
  0xa9   :  { %v152_v63 = vadd.f32 %v151_v61, %v365_v15 }
  0xaa   :  { %v196_v60 = vpack.c.bf16 %v178_v56, %v178_v56  ;;  %211 = vst [vmem:[%s446_s3 + $0x3c] sm:$0xff] %v195_v58  ;;  %v186_v62 = vpack.c.bf16 %v166_v59, %v166_v59 }
  0xac   :  { %212 = vst [vmem:[%s446_s3 + $0x44] sm:$0xf] %v196_v60 }
  0xad   :  { %202 = vst [vmem:[%s446_s3 + $0x8] sm:$0xf] %v186_v62  ;;  %v122_v0 = vpop.f32.mrf.mxu3 }
  0xae   :  { %v123_v1 = vadd.f32 %v122_v0, %v367_v17 }
  0xaf   :  { %v180_v2 = vpop.f32.mrf.mxu2  ;;  %v167_v4 = vpop.f32.mrf.mxu0 }
  0xb0   :  { %v181_v3 = vadd.f32 %v180_v2, %v369_v18  ;;  %v197_v5 = vpack.c.bf16 %v152_v63, %v123_v1  ;;  %v168_v6 = vadd.f32 %v167_v4, %v369_v18  ;;  %v153_v9 = vpop.f32.mrf.mxu1 }
  0xb1   :  { %v154_v11 = vadd.f32 %v153_v9, %v365_v15 }
  0xb2   :  { %v198_v7 = vpack.c.bf16 %v181_v3, %v181_v3  ;;  %213 = vst [vmem:[%s446_s3 + $0x48] sm:$0xff] %v197_v5  ;;  %v188_v8 = vpack.c.bf16 %v168_v6, %v168_v6 }
  0xb4   :  { %214 = vst [vmem:[%s446_s3 + $0x50] sm:$0xf] %v198_v7 }
  0xb5   :  { %204 = vst [vmem:[%s446_s3 + $0x14] sm:$0xf] %v188_v8  ;;  %v124_v10 = vpop.f32.mrf.mxu3 }
  0xb6   :  { %v125_v12 = vadd.f32 %v124_v10, %v367_v17 }
  0xb7   :  { %v182_v13 = vpop.f32.mrf.mxu2 }
  0xb8   :  { %v183_v14 = vadd.f32 %v182_v13, %v369_v18  ;;  %v199_v16 = vpack.c.bf16 %v154_v11, %v125_v12 }
  0xba   :  { %v200_v19 = vpack.c.bf16 %v183_v14, %v183_v14  ;;  %215 = vst [vmem:[%s446_s3 + $0x54] sm:$0xff] %v199_v16 }
  0xbc   :  { %216 = vst [vmem:[%s446_s3 + $0x5c] sm:$0xf] %v200_v19 }
  0xbd   :  { %221 = vsyncpa [#allocation3], 1 }

// kernel: gru_forward.6
= control target key start
LH: loop header
LB: loop body
LE: loop exit
PB: predicated region body
PF: predicated region fallthrough
CT: control target
= control target key end

     0   :  { %8 = vsyncpa [#allocation3], 0  ;;  %s531_s15 = smov [#allocation2]   ;;  %s532_s17 = smov 192   ;;  %s650_s0 = inlined_call_operand.vmem [shape: bf16[64,128], index: 0, kind: input, shape index: {}]   ;;  %s651_s1 = inlined_call_operand.hbm [shape: bf16[128,384], index: 1, kind: input, shape index: {}]   ;;  %s652_s2 = inlined_call_operand.vmem [shape: f32[1,384], index: 2, kind: input, shape index: {}]   ;;  %s653_s3 = inlined_call_operand.vmem [shape: bf16[64,384], index: 3, kind: output, shape index: {}]  }
   0x1   :  { %s15_s14 = sshll.u32 %s651_s1, 4  ;;  %s17_s16 = sshll.u32 %s531_s15, 4  ;;  %s16_s14 = int_to_ptr.hbm [resolvable:$true] %s15_s14  ;;  %s18_s16 = int_to_ptr.vmem [resolvable:$true] %s17_s16 }
   0x2   :  { %s533_s18 = smov 12  }
   0x3   :  { %23 = dma.hbm_to_vmem [thread:$0]  %s16_s14, 3072, %s18_s16, [#allocation3], %s532_s17, %s532_s17, %s533_s18  }
   0x4   :  { %529 = dma.done.wait [#allocation3], 3072  }
   0x5   :  { %530 = vsyncadd [#allocation3], 4294964224  ;;  %v456_v0 = vld [vmem:[#allocation2 + $0xa8] sm:$0xf]  ;;  %v492_v1 = vld [vmem:[#allocation2 + $0xb0] sm:$0xf0] }
   0x6   :  { %v491_v2 = vld [vmem:[#allocation2 + $0xac] sm:$0xf]  ;;  %v457_v3 = vor.u32 %v492_v1, %v456_v0  ;;  %v458_v4 = vld [vmem:[#allocation2 + $0xb4] sm:$0xf0]  ;;  %v464_v5 = vld [vmem:[#allocation2 + $0xb0] sm:$0xf] }
   0x7   :  { %v493_v6 = vld [vmem:[#allocation2 + $0xb8] sm:$0xf0]  ;;  %v461_v7 = vor.u32 %v491_v2, %v458_v4  ;;  %v444_v9 = vld [vmem:[#allocation2 + $0x90] sm:$0xf]  ;;  %v488_v11 = vld [vmem:[#allocation2 + $0x94] sm:$0xf] }
   0x8   :  { %v465_v8 = vor.u32 %v493_v6, %v464_v5  ;;  %v489_v10 = vld [vmem:[#allocation2 + $0x98] sm:$0xf0]  ;;  %230 = vmatpush.bf16.msra.mxu0 %v457_v3  ;;  %v446_v13 = vld [vmem:[#allocation2 + $0x9c] sm:$0xf0]  ;;  %v452_v14 = vld [vmem:[#allocation2 + $0x98] sm:$0xf]  ;;  %494 = vmatpush.bf16.msra.mxu3 %v457_v3 }
   0x9   :  { %v445_v12 = vor.u32 %v489_v10, %v444_v9  ;;  %v490_v15 = vld [vmem:[#allocation2 + $0xa0] sm:$0xf0]  ;;  %259 = vmatpush.bf16.msra.mxu1 %v461_v7  ;;  %v449_v16 = vor.u32 %v488_v11, %v446_v13  ;;  %v432_v18 = vld [vmem:[#allocation2 + $0x78] sm:$0xf]  ;;  %v485_v20 = vld [vmem:[#allocation2 + $0x7c] sm:$0xf] }
   0xa   :  { %288 = vmatpush.bf16.msra.mxu2 %v465_v8  ;;  %v453_v17 = vor.u32 %v490_v15, %v452_v14  ;;  %v486_v19 = vld [vmem:[#allocation2 + $0x80] sm:$0xf0]  ;;  %v434_v21 = vld [vmem:[#allocation2 + $0x84] sm:$0xf0]  ;;  %v440_v22 = vld [vmem:[#allocation2 + $0x80] sm:$0xf] }
   0xb   :  { %v487_v23 = vld [vmem:[#allocation2 + $0x88] sm:$0xf0]  ;;  %v433_v24 = vor.u32 %v486_v19, %v432_v18  ;;  %v437_v25 = vor.u32 %v485_v20, %v434_v21  ;;  %v420_v27 = vld [vmem:[#allocation2 + $0x60] sm:$0xf]  ;;  %v482_v29 = vld [vmem:[#allocation2 + $0x64] sm:$0xf] }
   0xc   :  { %231 = vmatpush.bf16.msra.mxu0 %v445_v12  ;;  %495 = vmatpush.bf16.msra.mxu3 %v445_v12  ;;  %v441_v26 = vor.u32 %v487_v23, %v440_v22  ;;  %v483_v28 = vld [vmem:[#allocation2 + $0x68] sm:$0xf0]  ;;  %v422_v30 = vld [vmem:[#allocation2 + $0x6c] sm:$0xf0]  ;;  %v428_v31 = vld [vmem:[#allocation2 + $0x68] sm:$0xf] }
   0xd   :  { %260 = vmatpush.bf16.msra.mxu1 %v449_v16  ;;  %v484_v32 = vld [vmem:[#allocation2 + $0x70] sm:$0xf0]  ;;  %v421_v33 = vor.u32 %v483_v28, %v420_v27  ;;  %v425_v34 = vor.u32 %v482_v29, %v422_v30  ;;  %v408_v36 = vld [vmem:[#allocation2 + $0x48] sm:$0xf]  ;;  %v479_v38 = vld [vmem:[#allocation2 + $0x4c] sm:$0xf] }
   0xe   :  { %289 = vmatpush.bf16.msra.mxu2 %v453_v17  ;;  %v429_v35 = vor.u32 %v484_v32, %v428_v31  ;;  %v480_v37 = vld [vmem:[#allocation2 + $0x50] sm:$0xf0]  ;;  %v410_v39 = vld [vmem:[#allocation2 + $0x54] sm:$0xf0]  ;;  %v416_v40 = vld [vmem:[#allocation2 + $0x50] sm:$0xf] }
   0xf   :  { %v481_v41 = vld [vmem:[#allocation2 + $0x58] sm:$0xf0]  ;;  %v409_v42 = vor.u32 %v480_v37, %v408_v36  ;;  %v413_v43 = vor.u32 %v479_v38, %v410_v39  ;;  %v396_v45 = vld [vmem:[#allocation2 + $0x30] sm:$0xf]  ;;  %v476_v47 = vld [vmem:[#allocation2 + $0x34] sm:$0xf] }
  0x10   :  { %232 = vmatpush.bf16.msra.mxu0 %v433_v24  ;;  %496 = vmatpush.bf16.msra.mxu3 %v433_v24  ;;  %v417_v44 = vor.u32 %v481_v41, %v416_v40  ;;  %v477_v46 = vld [vmem:[#allocation2 + $0x38] sm:$0xf0]  ;;  %v398_v48 = vld [vmem:[#allocation2 + $0x3c] sm:$0xf0]  ;;  %v404_v49 = vld [vmem:[#allocation2 + $0x38] sm:$0xf] }
  0x11   :  { %261 = vmatpush.bf16.msra.mxu1 %v437_v25  ;;  %v478_v50 = vld [vmem:[#allocation2 + $0x40] sm:$0xf0]  ;;  %v397_v51 = vor.u32 %v477_v46, %v396_v45  ;;  %v401_v52 = vor.u32 %v476_v47, %v398_v48  ;;  %v384_v54 = vld [vmem:[#allocation2 + $0x18] sm:$0xf]  ;;  %v473_v56 = vld [vmem:[#allocation2 + $0x1c] sm:$0xf] }
  0x12   :  { %290 = vmatpush.bf16.msra.mxu2 %v441_v26  ;;  %v405_v53 = vor.u32 %v478_v50, %v404_v49  ;;  %v474_v55 = vld [vmem:[#allocation2 + $0x20] sm:$0xf0]  ;;  %v386_v57 = vld [vmem:[#allocation2 + $0x24] sm:$0xf0]  ;;  %v392_v58 = vld [vmem:[#allocation2 + $0x20] sm:$0xf] }
  0x13   :  { %v475_v59 = vld [vmem:[#allocation2 + $0x28] sm:$0xf0]  ;;  %v385_v60 = vor.u32 %v474_v55, %v384_v54  ;;  %v389_v61 = vor.u32 %v473_v56, %v386_v57  ;;  %v372_v63 = vld [vmem:[#allocation2] sm:$0xf]  ;;  %v470_v1 = vld [vmem:[#allocation2 + $0x4] sm:$0xf] }
  0x14   :  { %233 = vmatpush.bf16.msra.mxu0 %v421_v33  ;;  %497 = vmatpush.bf16.msra.mxu3 %v421_v33  ;;  %v393_v62 = vor.u32 %v475_v59, %v392_v58  ;;  %v471_v0 = vld [vmem:[#allocation2 + $0x8] sm:$0xf0]  ;;  %v374_v2 = vld [vmem:[#allocation2 + $0xc] sm:$0xf0]  ;;  %v380_v3 = vld [vmem:[#allocation2 + $0x8] sm:$0xf] }
  0x15   :  { %262 = vmatpush.bf16.msra.mxu1 %v425_v34  ;;  %v472_v4 = vld [vmem:[#allocation2 + $0x10] sm:$0xf0]  ;;  %v373_v5 = vor.u32 %v471_v0, %v372_v63  ;;  %v377_v6 = vor.u32 %v470_v1, %v374_v2  ;;  %v466_v8 = vld [vmem:[%s650_s0] sm:$0xff]  ;;  %v467_v9 = vld [vmem:[%s650_s0 + $0x8] sm:$0xff] }
  0x16   :  { %291 = vmatpush.bf16.msra.mxu2 %v429_v35  ;;  %v381_v7 = vor.u32 %v472_v4, %v380_v3  ;;  %v468_v10 = vld [vmem:[%s650_s0 + $0x10] sm:$0xff]  ;;  %v469_v11 = vld [vmem:[%s650_s0 + $0x18] sm:$0xff]  ;;  %v70_v12 = vld [vmem:[%s652_s2] sm:$0x7] }
  0x17   :  { %v572_v13 = vperm.slane %v70_v12, 0  ;;  %v574_v14 = vperm.slane %v70_v12, 1  ;;  %v578_v20 = vperm.slane %v70_v12, 2 }
  0x18   :  { %234 = vmatpush.bf16.msra.mxu0 %v409_v42  ;;  %498 = vmatpush.bf16.msra.mxu3 %v409_v42 }
  0x19   :  { %263 = vmatpush.bf16.msra.mxu1 %v413_v43 }
  0x1a   :  { %292 = vmatpush.bf16.msra.mxu2 %v417_v44 }
  0x1c   :  { %235 = vmatpush.bf16.msra.mxu0 %v397_v51  ;;  %499 = vmatpush.bf16.msra.mxu3 %v397_v51 }
  0x1d   :  { %264 = vmatpush.bf16.msra.mxu1 %v401_v52 }
  0x1e   :  { %293 = vmatpush.bf16.msra.mxu2 %v405_v53 }
  0x20   :  { %236 = vmatpush.bf16.msra.mxu0 %v385_v60  ;;  %500 = vmatpush.bf16.msra.mxu3 %v385_v60 }
  0x21   :  { %265 = vmatpush.bf16.msra.mxu1 %v389_v61 }
  0x22   :  { %294 = vmatpush.bf16.msra.mxu2 %v393_v62 }
  0x24   :  { %237 = vmatpush.bf16.msra.mxu0 %v373_v5  ;;  %501 = vmatpush.bf16.msra.mxu3 %v373_v5 }
  0x25   :  { %266 = vmatpush.bf16.msra.mxu1 %v377_v6 }
  0x26   :  { %295 = vmatpush.bf16.msra.mxu2 %v381_v7 }
  0x27   :  { %238 = vmatmul.bf16.vlgmr.msra.gmra.mxu0 %v466_v8  ;;  %243 = vmatmul.bf16.vlgmr.msra.gmra.mxu3 %v467_v9 }
  0x28   :  { %267 = vmatmul.bf16.vlgmr.msra.gmra.mxu1 %v466_v8 }
  0x29   :  { %296 = vmatmul.bf16.vlgmr.msra.gmra.mxu2 %v466_v8 }
  0x37   :  { %248 = vmatmul.bf16.gmra.mxu3 %v468_v10 }
  0x38   :  { %272 = vmatmul.bf16.gmra.mxu1 %v467_v9 }
  0x39   :  { %301 = vmatmul.bf16.gmra.mxu2 %v467_v9 }
  0x47   :  { %253 = vmatmul.bf16.gmra.mxu3 %v469_v11 }
  0x48   :  { %277 = vmatmul.bf16.gmra.mxu1 %v468_v10 }
  0x49   :  { %306 = vmatmul.bf16.gmra.mxu2 %v468_v10 }
  0x58   :  { %282 = vmatmul.bf16.gmra.mxu1 %v469_v11 }
  0x59   :  { %311 = vmatmul.bf16.gmra.mxu2 %v469_v11 }
  0xa4   :  { %v239_v15 = vpop.f32.mrf.mxu0 }
  0xa5   :  { %v240_v16 = vadd.f32 %v239_v15, %v572_v13  ;;  %v268_v17 = vpop.f32.mrf.mxu1 }
  0xa6   :  { %v269_v18 = vadd.f32 %v268_v17, %v574_v14 }
  0xa8   :  { %v317_v19 = vpack.c.bf16 %v269_v18, %v240_v16 }
  0xaa   :  { %333 = vst [vmem:[%s653_s3] sm:$0xff] %v317_v19  ;;  %v244_v21 = vpop.f32.mrf.mxu3 }
  0xab   :  { %v245_v32 = vadd.f32 %v244_v21, %v572_v13 }
  0xac   :  { %v297_v22 = vpop.f32.mrf.mxu2  ;;  %v241_v24 = vpop.f32.mrf.mxu0 }
  0xad   :  { %v298_v23 = vadd.f32 %v297_v22, %v578_v20  ;;  %v242_v25 = vadd.f32 %v241_v24, %v572_v13  ;;  %v270_v26 = vpop.f32.mrf.mxu1 }
  0xae   :  { %v271_v28 = vadd.f32 %v270_v26, %v574_v14 }
  0xaf   :  { %v318_v27 = vpack.c.bf16 %v298_v23, %v298_v23 }
  0xb0   :  { %v319_v29 = vpack.c.bf16 %v271_v28, %v242_v25 }
  0xb1   :  { %334 = vst [vmem:[%s653_s3 + $0x8] sm:$0xf] %v318_v27 }
  0xb2   :  { %335 = vst [vmem:[%s653_s3 + $0xc] sm:$0xff] %v319_v29  ;;  %v246_v31 = vpop.f32.mrf.mxu3 }
  0xb3   :  { %v247_v42 = vadd.f32 %v246_v31, %v572_v13 }
  0xb4   :  { %v299_v30 = vpop.f32.mrf.mxu2 }
  0xb5   :  { %v300_v33 = vadd.f32 %v299_v30, %v578_v20  ;;  %v273_v34 = vpop.f32.mrf.mxu1 }
  0xb6   :  { %v274_v36 = vadd.f32 %v273_v34, %v574_v14 }
  0xb7   :  { %v320_v35 = vpack.c.bf16 %v300_v33, %v300_v33 }
  0xb8   :  { %v321_v37 = vpack.c.bf16 %v274_v36, %v245_v32 }
  0xb9   :  { %336 = vst [vmem:[%s653_s3 + $0x14] sm:$0xf] %v320_v35 }
  0xba   :  { %337 = vst [vmem:[%s653_s3 + $0x18] sm:$0xff] %v321_v37  ;;  %v249_v41 = vpop.f32.mrf.mxu3 }
  0xbb   :  { %v250_v47 = vadd.f32 %v249_v41, %v572_v13 }
  0xbc   :  { %v302_v38 = vpop.f32.mrf.mxu2 }
  0xbd   :  { %v303_v39 = vadd.f32 %v302_v38, %v578_v20  ;;  %v275_v40 = vpop.f32.mrf.mxu1 }
  0xbe   :  { %v276_v44 = vadd.f32 %v275_v40, %v574_v14 }
  0xbf   :  { %v322_v43 = vpack.c.bf16 %v303_v39, %v303_v39 }
  0xc0   :  { %v323_v45 = vpack.c.bf16 %v276_v44, %v247_v42 }
  0xc1   :  { %338 = vst [vmem:[%s653_s3 + $0x20] sm:$0xf] %v322_v43 }
  0xc2   :  { %339 = vst [vmem:[%s653_s3 + $0x24] sm:$0xff] %v323_v45  ;;  %v251_v52 = vpop.f32.mrf.mxu3 }
  0xc3   :  { %v252_v57 = vadd.f32 %v251_v52, %v572_v13 }
  0xc4   :  { %v304_v46 = vpop.f32.mrf.mxu2 }
  0xc5   :  { %v305_v48 = vadd.f32 %v304_v46, %v578_v20  ;;  %v278_v49 = vpop.f32.mrf.mxu1 }
  0xc6   :  { %v279_v51 = vadd.f32 %v278_v49, %v574_v14 }
  0xc7   :  { %v324_v50 = vpack.c.bf16 %v305_v48, %v305_v48 }
  0xc8   :  { %v325_v53 = vpack.c.bf16 %v279_v51, %v250_v47 }
  0xc9   :  { %340 = vst [vmem:[%s653_s3 + $0x2c] sm:$0xf] %v324_v50 }
  0xca   :  { %341 = vst [vmem:[%s653_s3 + $0x30] sm:$0xff] %v325_v53  ;;  %v254_v61 = vpop.f32.mrf.mxu3 }
  0xcb   :  { %v255_v63 = vadd.f32 %v254_v61, %v572_v13 }
  0xcc   :  { %v307_v54 = vpop.f32.mrf.mxu2 }
  0xcd   :  { %v308_v55 = vadd.f32 %v307_v54, %v578_v20  ;;  %v280_v56 = vpop.f32.mrf.mxu1 }
  0xce   :  { %v281_v59 = vadd.f32 %v280_v56, %v574_v14 }
  0xcf   :  { %v326_v58 = vpack.c.bf16 %v308_v55, %v308_v55 }
  0xd0   :  { %v327_v60 = vpack.c.bf16 %v281_v59, %v252_v57 }
  0xd1   :  { %342 = vst [vmem:[%s653_s3 + $0x38] sm:$0xf] %v326_v58 }
  0xd2   :  { %343 = vst [vmem:[%s653_s3 + $0x3c] sm:$0xff] %v327_v60  ;;  %v256_v5 = vpop.f32.mrf.mxu3 }
  0xd3   :  { %v257_v9 = vadd.f32 %v256_v5, %v572_v13 }
  0xd4   :  { %v309_v62 = vpop.f32.mrf.mxu2 }
  0xd5   :  { %v310_v0 = vadd.f32 %v309_v62, %v578_v20  ;;  %v283_v1 = vpop.f32.mrf.mxu1 }
  0xd6   :  { %v284_v3 = vadd.f32 %v283_v1, %v574_v14 }
  0xd7   :  { %v328_v2 = vpack.c.bf16 %v310_v0, %v310_v0 }
  0xd8   :  { %v329_v4 = vpack.c.bf16 %v284_v3, %v255_v63 }
  0xd9   :  { %344 = vst [vmem:[%s653_s3 + $0x44] sm:$0xf] %v328_v2 }
  0xda   :  { %345 = vst [vmem:[%s653_s3 + $0x48] sm:$0xff] %v329_v4 }
  0xdc   :  { %v312_v6 = vpop.f32.mrf.mxu2 }
  0xdd   :  { %v313_v7 = vadd.f32 %v312_v6, %v578_v20  ;;  %v285_v8 = vpop.f32.mrf.mxu1 }
  0xde   :  { %v286_v11 = vadd.f32 %v285_v8, %v574_v14 }
  0xdf   :  { %v330_v10 = vpack.c.bf16 %v313_v7, %v313_v7 }
  0xe0   :  { %v331_v12 = vpack.c.bf16 %v286_v11, %v257_v9 }
  0xe1   :  { %346 = vst [vmem:[%s653_s3 + $0x50] sm:$0xf] %v330_v10 }
  0xe2   :  { %347 = vst [vmem:[%s653_s3 + $0x54] sm:$0xff] %v331_v12 }
  0xe4   :  { %v314_v15 = vpop.f32.mrf.mxu2 }
  0xe5   :  { %v315_v16 = vadd.f32 %v314_v15, %v578_v20 }
  0xe7   :  { %v332_v17 = vpack.c.bf16 %v315_v16, %v315_v16 }
  0xe9   :  { %348 = vst [vmem:[%s653_s3 + $0x5c] sm:$0xf] %v332_v17 }
  0xea   :  { %353 = vsyncpa [#allocation3], 1 }

// kernel: gru_forward.5
= control target key start
LH: loop header
LB: loop body
LE: loop exit
PB: predicated region body
PF: predicated region fallthrough
CT: control target
= control target key end

     0   :  { %8 = vsyncpa [#allocation4], 0  ;;  %s1461_s0 = inlined_call_operand.vmem [shape: bf16[8,8,384], index: 0, kind: input, shape index: {}]   ;;  %s1462_s1 = inlined_call_operand.hbm [shape: bf16[128,384], index: 1, kind: input, shape index: {}]   ;;  %s1463_s2 = inlined_call_operand.hbm [shape: f32[1,128], index: 2, kind: input, shape index: {}]   ;;  %s1464_s3 = inlined_call_operand.vmem [shape: bf16[8,8,128], index: 3, kind: output, shape index: {}]  }
   0x1   :  { %s16_s14 = sshll.u32 %s1462_s1, 4  ;;  %s17_s14 = int_to_ptr.hbm [resolvable:$true] %s16_s14 }
   0x2   :  { %9 = vsyncpa [#allocation6], 0  ;;  %s1088_s15 = smov [#allocation3]   ;;  %s30_s19 = sshll.u32 %s1463_s2, 4  ;;  %s31_s19 = int_to_ptr.hbm [resolvable:$true] %s30_s19 }
   0x3   :  { %s18_s16 = sshll.u32 %s1088_s15, 4  ;;  %s1089_s20 = smov 192   ;;  %s19_s16 = int_to_ptr.vmem [resolvable:$true] %s18_s16 }
   0x4   :  { %s1090_s21 = smov 12   ;;  %s1091_s22 = smov [#allocation5]  }
   0x5   :  { %24 = dma.hbm_to_vmem [thread:$0]  %s17_s14, 3072, %s19_s16, [#allocation4], %s1089_s20, %s1089_s20, %s1090_s21  }
   0x6   :  { %s32_s23 = sshll.u32 %s1091_s22, 4  ;;  %s33_s23 = int_to_ptr.vmem [resolvable:$true] %s32_s23 }
   0x7   :  { %35 = dma.hbm_to_vmem [thread:$0]  %s31_s19, 16, %s33_s23, [#allocation6]  }
   0x8   :  { %1084 = dma.done.wait [#allocation4], 3072  }
   0x9   :  { %1085 = vsyncadd [#allocation4], 4294964224 }
   0xa   :  { %1086 = dma.done.wait [#allocation6], 16  }
   0xb   :  { %1087 = vsyncadd [#allocation6], 4294967280  ;;  %v895_v0 = vld [vmem:[#allocation3 + $0xa8] sm:$0xf]  ;;  %v948_v1 = vld [vmem:[#allocation3 + $0xb0] sm:$0xf0] }
   0xc   :  { %v947_v2 = vld [vmem:[#allocation3 + $0xac] sm:$0xf]  ;;  %v1119_v3 = vor.u32 %v948_v1, %v895_v0  ;;  %v897_v4 = vld [vmem:[#allocation3 + $0xb4] sm:$0xf0]  ;;  %v883_v5 = vld [vmem:[#allocation3 + $0x90] sm:$0xf] }
   0xd   :  { %v945_v6 = vld [vmem:[#allocation3 + $0x98] sm:$0xf0]  ;;  %v1121_v7 = vor.u32 %v947_v2, %v897_v4  ;;  %v944_v8 = vld [vmem:[#allocation3 + $0x94] sm:$0xf]  ;;  %v885_v9 = vld [vmem:[#allocation3 + $0x9c] sm:$0xf0] }
   0xe   :  { %v903_v10 = vld [vmem:[#allocation3 + $0xb0] sm:$0xf]  ;;  %214 = vmatpush.bf16.msra.mxu0 %v1119_v3  ;;  %v1124_v11 = vor.u32 %v945_v6, %v883_v5  ;;  %v949_v12 = vld [vmem:[#allocation3 + $0xb8] sm:$0xf0]  ;;  %290 = vmatpush.bf16.msra.mxu3 %v1119_v3  ;;  %v1128_v13 = vor.u32 %v944_v8, %v885_v9  ;;  %v871_v15 = vld [vmem:[#allocation3 + $0x78] sm:$0xf] }
   0xf   :  { %227 = vmatpush.bf16.msra.mxu1 %v1121_v7  ;;  %v1130_v14 = vor.u32 %v949_v12, %v903_v10  ;;  %v942_v16 = vld [vmem:[#allocation3 + $0x80] sm:$0xf0]  ;;  %v891_v17 = vld [vmem:[#allocation3 + $0x98] sm:$0xf]  ;;  %v941_v18 = vld [vmem:[#allocation3 + $0x7c] sm:$0xf] }
  0x10   :  { %v873_v19 = vld [vmem:[#allocation3 + $0x84] sm:$0xf0]  ;;  %v946_v20 = vld [vmem:[#allocation3 + $0xa0] sm:$0xf0]  ;;  %v1136_v22 = vor.u32 %v942_v16, %v871_v15  ;;  %v879_v23 = vld [vmem:[#allocation3 + $0x80] sm:$0xf] }
  0x11   :  { %240 = vmatpush.bf16.msra.mxu2 %v1130_v14  ;;  %v1133_v21 = vor.u32 %v946_v20, %v891_v17  ;;  %v943_v24 = vld [vmem:[#allocation3 + $0x88] sm:$0xf0]  ;;  %v1140_v25 = vor.u32 %v941_v18, %v873_v19  ;;  %v859_v26 = vld [vmem:[#allocation3 + $0x60] sm:$0xf]  ;;  %v938_v28 = vld [vmem:[#allocation3 + $0x64] sm:$0xf] }
  0x12   :  { %215 = vmatpush.bf16.msra.mxu0 %v1124_v11  ;;  %291 = vmatpush.bf16.msra.mxu3 %v1124_v11  ;;  %v939_v27 = vld [vmem:[#allocation3 + $0x68] sm:$0xf0]  ;;  %v861_v29 = vld [vmem:[#allocation3 + $0x6c] sm:$0xf0]  ;;  %v1143_v30 = vor.u32 %v943_v24, %v879_v23  ;;  %v867_v32 = vld [vmem:[#allocation3 + $0x68] sm:$0xf] }
  0x13   :  { %228 = vmatpush.bf16.msra.mxu1 %v1128_v13  ;;  %v1146_v31 = vor.u32 %v939_v27, %v859_v26  ;;  %v940_v33 = vld [vmem:[#allocation3 + $0x70] sm:$0xf0]  ;;  %v1150_v34 = vor.u32 %v938_v28, %v861_v29  ;;  %v847_v35 = vld [vmem:[#allocation3 + $0x48] sm:$0xf]  ;;  %v935_v37 = vld [vmem:[#allocation3 + $0x4c] sm:$0xf] }
  0x14   :  { %v936_v36 = vld [vmem:[#allocation3 + $0x50] sm:$0xf0]  ;;  %v849_v38 = vld [vmem:[#allocation3 + $0x54] sm:$0xf0]  ;;  %v1153_v39 = vor.u32 %v940_v33, %v867_v32  ;;  %v855_v41 = vld [vmem:[#allocation3 + $0x50] sm:$0xf] }
  0x15   :  { %241 = vmatpush.bf16.msra.mxu2 %v1133_v21  ;;  %v1156_v40 = vor.u32 %v936_v36, %v847_v35  ;;  %v937_v42 = vld [vmem:[#allocation3 + $0x58] sm:$0xf0]  ;;  %v1160_v43 = vor.u32 %v935_v37, %v849_v38  ;;  %v835_v44 = vld [vmem:[#allocation3 + $0x30] sm:$0xf]  ;;  %v932_v46 = vld [vmem:[#allocation3 + $0x34] sm:$0xf] }
  0x16   :  { %216 = vmatpush.bf16.msra.mxu0 %v1136_v22  ;;  %292 = vmatpush.bf16.msra.mxu3 %v1136_v22  ;;  %v933_v45 = vld [vmem:[#allocation3 + $0x38] sm:$0xf0]  ;;  %v837_v47 = vld [vmem:[#allocation3 + $0x3c] sm:$0xf0]  ;;  %v1163_v48 = vor.u32 %v937_v42, %v855_v41  ;;  %v843_v50 = vld [vmem:[#allocation3 + $0x38] sm:$0xf] }
  0x17   :  { %229 = vmatpush.bf16.msra.mxu1 %v1140_v25  ;;  %v1166_v49 = vor.u32 %v933_v45, %v835_v44  ;;  %v934_v51 = vld [vmem:[#allocation3 + $0x40] sm:$0xf0]  ;;  %v1170_v52 = vor.u32 %v932_v46, %v837_v47  ;;  %v823_v53 = vld [vmem:[#allocation3 + $0x18] sm:$0xf]  ;;  %v929_v55 = vld [vmem:[#allocation3 + $0x1c] sm:$0xf] }
  0x18   :  { %v930_v54 = vld [vmem:[#allocation3 + $0x20] sm:$0xf0]  ;;  %v825_v56 = vld [vmem:[#allocation3 + $0x24] sm:$0xf0]  ;;  %v1173_v57 = vor.u32 %v934_v51, %v843_v50  ;;  %v831_v59 = vld [vmem:[#allocation3 + $0x20] sm:$0xf] }
  0x19   :  { %242 = vmatpush.bf16.msra.mxu2 %v1143_v30  ;;  %v1176_v58 = vor.u32 %v930_v54, %v823_v53  ;;  %v931_v60 = vld [vmem:[#allocation3 + $0x28] sm:$0xf0]  ;;  %v1180_v61 = vor.u32 %v929_v55, %v825_v56  ;;  %v811_v62 = vld [vmem:[#allocation3] sm:$0xf]  ;;  %v926_v0 = vld [vmem:[#allocation3 + $0x4] sm:$0xf] }
  0x1a   :  { %217 = vmatpush.bf16.msra.mxu0 %v1146_v31  ;;  %293 = vmatpush.bf16.msra.mxu3 %v1146_v31  ;;  %v927_v63 = vld [vmem:[#allocation3 + $0x8] sm:$0xf0]  ;;  %v813_v1 = vld [vmem:[#allocation3 + $0xc] sm:$0xf0]  ;;  %v1183_v2 = vor.u32 %v931_v60, %v831_v59  ;;  %v819_v5 = vld [vmem:[#allocation3 + $0x8] sm:$0xf] }
  0x1b   :  { %230 = vmatpush.bf16.msra.mxu1 %v1150_v34  ;;  %v1186_v4 = vor.u32 %v927_v63, %v811_v62  ;;  %v928_v6 = vld [vmem:[#allocation3 + $0x10] sm:$0xf0]  ;;  %v1190_v8 = vor.u32 %v926_v0, %v813_v1  ;;  %v1092_v10 = vmov 0.0|0.0   ;;  %v83_v12 = vld [vmem:[%s1461_s0] sm:$0xff]  ;;  %v84_v44 = vld [vmem:[%s1461_s0 + $0x8] sm:$0xf] }
  0x1c   :  { %v1193_v9 = vor.u32 %v928_v6, %v819_v5  ;;  %v261_v15 = vrot.slane %v83_v12, 4  ;;  %v253_v16 = vunpack.c.l.bf16 %v83_v12  ;;  %v1258_v38 = vld [vmem:[#allocation5] ss:$0 sm:$0xff]  ;;  %v275_v46 = vunpack.c.l.bf16 %v84_v44  ;;  %v905_v63 = vld [vmem:[%s1461_s0 + $0xc] sm:$0xff] }
  0x1d   :  { %243 = vmatpush.bf16.msra.mxu2 %v1153_v39  ;;  %v337_v0 = vrot.slane %v905_v63, 4 }
  0x1e   :  { %218 = vmatpush.bf16.msra.mxu0 %v1156_v40  ;;  %294 = vmatpush.bf16.msra.mxu3 %v1156_v40  ;;  %v263_v17 = vunpack.c.l.bf16 %v261_v15 }
  0x1f   :  { %231 = vmatpush.bf16.msra.mxu1 %v1160_v43  ;;  %v339_v5 = vunpack.c.l.bf16 %v337_v0 }
  0x21   :  { %244 = vmatpush.bf16.msra.mxu2 %v1163_v48 }
  0x22   :  { %219 = vmatpush.bf16.msra.mxu0 %v1166_v49  ;;  %295 = vmatpush.bf16.msra.mxu3 %v1166_v49 }
  0x23   :  { %232 = vmatpush.bf16.msra.mxu1 %v1170_v52 }
  0x25   :  { %245 = vmatpush.bf16.msra.mxu2 %v1173_v57 }
  0x26   :  { %220 = vmatpush.bf16.msra.mxu0 %v1176_v58  ;;  %296 = vmatpush.bf16.msra.mxu3 %v1176_v58 }
  0x27   :  { %233 = vmatpush.bf16.msra.mxu1 %v1180_v61 }
  0x29   :  { %246 = vmatpush.bf16.msra.mxu2 %v1183_v2 }
  0x2a   :  { %221 = vmatpush.bf16.msra.mxu0 %v1186_v4  ;;  %297 = vmatpush.bf16.msra.mxu3 %v1186_v4 }
  0x2b   :  { %234 = vmatpush.bf16.msra.mxu1 %v1190_v8 }
  0x2d   :  { %222 = vmatmul.bf16.vlgmr.msra.gmra.mxu0 %v1092_v10  ;;  %247 = vmatpush.bf16.msra.mxu2 %v1193_v9 }
  0x2e   :  { %303 = vmatpush.bf16.msrb.mxu0 %v1121_v7  ;;  %377 = vmatpush.bf16.msrb.mxu3 %v1121_v7 }
  0x2f   :  { %316 = vmatpush.bf16.msrb.mxu1 %v1130_v14 }
  0x30   :  { %235 = vmatmul.bf16.vlgmr.msra.gmra.mxu1 %v1092_v10  ;;  %248 = vmatmul.bf16.vlgmr.msra.gmra.mxu2 %v1092_v10  ;;  %v329_v10 = vunpack.c.l.bf16 %v905_v63 }
  0x31   :  { %364 = vmatpush.bf16.msrb.mxu2 %v1119_v3 }
  0x32   :  { %304 = vmatpush.bf16.msrb.mxu0 %v1128_v13  ;;  %378 = vmatpush.bf16.msrb.mxu3 %v1128_v13 }
  0x33   :  { %317 = vmatpush.bf16.msrb.mxu1 %v1133_v21 }
  0x35   :  { %365 = vmatpush.bf16.msrb.mxu2 %v1124_v11 }
  0x36   :  { %305 = vmatpush.bf16.msrb.mxu0 %v1140_v25  ;;  %379 = vmatpush.bf16.msrb.mxu3 %v1140_v25 }
  0x37   :  { %318 = vmatpush.bf16.msrb.mxu1 %v1143_v30 }
  0x39   :  { %366 = vmatpush.bf16.msrb.mxu2 %v1136_v22 }
  0x3a   :  { %306 = vmatpush.bf16.msrb.mxu0 %v1150_v34  ;;  %380 = vmatpush.bf16.msrb.mxu3 %v1150_v34 }
  0x3b   :  { %319 = vmatpush.bf16.msrb.mxu1 %v1153_v39 }
  0x3d   :  { %367 = vmatpush.bf16.msrb.mxu2 %v1146_v31 }
  0x3e   :  { %307 = vmatpush.bf16.msrb.mxu0 %v1160_v43  ;;  %381 = vmatpush.bf16.msrb.mxu3 %v1160_v43 }
  0x3f   :  { %320 = vmatpush.bf16.msrb.mxu1 %v1163_v48 }
  0x41   :  { %368 = vmatpush.bf16.msrb.mxu2 %v1156_v40 }
  0x42   :  { %308 = vmatpush.bf16.msrb.mxu0 %v1170_v52  ;;  %382 = vmatpush.bf16.msrb.mxu3 %v1170_v52 }
  0x43   :  { %321 = vmatpush.bf16.msrb.mxu1 %v1173_v57 }
  0x45   :  { %369 = vmatpush.bf16.msrb.mxu2 %v1166_v49 }
  0x46   :  { %309 = vmatpush.bf16.msrb.mxu0 %v1180_v61  ;;  %383 = vmatpush.bf16.msrb.mxu3 %v1180_v61 }
  0x47   :  { %322 = vmatpush.bf16.msrb.mxu1 %v1183_v2 }
  0x49   :  { %370 = vmatpush.bf16.msrb.mxu2 %v1176_v58 }
  0x4a   :  { %310 = vmatpush.bf16.msrb.mxu0 %v1190_v8  ;;  %384 = vmatpush.bf16.msrb.mxu3 %v1190_v8 }
  0x4b   :  { %323 = vmatpush.bf16.msrb.mxu1 %v1193_v9 }
  0x4d   :  { %371 = vmatpush.bf16.msrb.mxu2 %v1186_v4 }
  0x4e   :  { %390 = vmatpush.bf16.msra.mxu0 %v1130_v14 }
  0x4f   :  { %438 = vmatpush.bf16.msra.mxu1 %v1119_v3 }
  0x51   :  { %451 = vmatpush.bf16.msra.mxu2 %v1121_v7 }
  0x52   :  { %391 = vmatpush.bf16.msra.mxu0 %v1133_v21 }
  0x53   :  { %439 = vmatpush.bf16.msra.mxu1 %v1124_v11 }
  0x55   :  { %452 = vmatpush.bf16.msra.mxu2 %v1128_v13 }
  0x56   :  { %392 = vmatpush.bf16.msra.mxu0 %v1143_v30 }
  0x57   :  { %440 = vmatpush.bf16.msra.mxu1 %v1136_v22 }
  0x59   :  { %453 = vmatpush.bf16.msra.mxu2 %v1140_v25 }
  0x5a   :  { %393 = vmatpush.bf16.msra.mxu0 %v1153_v39 }
  0x5b   :  { %441 = vmatpush.bf16.msra.mxu1 %v1146_v31 }
  0x5d   :  { %454 = vmatpush.bf16.msra.mxu2 %v1150_v34 }
  0x5e   :  { %394 = vmatpush.bf16.msra.mxu0 %v1163_v48 }
  0x5f   :  { %442 = vmatpush.bf16.msra.mxu1 %v1156_v40 }
  0x61   :  { %455 = vmatpush.bf16.msra.mxu2 %v1160_v43 }
  0x62   :  { %395 = vmatpush.bf16.msra.mxu0 %v1173_v57 }
  0x63   :  { %443 = vmatpush.bf16.msra.mxu1 %v1166_v49 }
  0x65   :  { %456 = vmatpush.bf16.msra.mxu2 %v1170_v52 }
  0x66   :  { %396 = vmatpush.bf16.msra.mxu0 %v1183_v2 }
  0x67   :  { %444 = vmatpush.bf16.msra.mxu1 %v1176_v58 }
  0x69   :  { %457 = vmatpush.bf16.msra.mxu2 %v1180_v61 }
  0x6a   :  { %397 = vmatpush.bf16.msra.mxu0 %v1193_v9 }
  0x6b   :  { %445 = vmatpush.bf16.msra.mxu1 %v1186_v4 }
  0x6d   :  { %458 = vmatpush.bf16.msra.mxu2 %v1190_v8 }
  0xaa   :  { %v223_v18 = vpop.f32.mrf.mxu0 }
  0xab   :  { %v254_v19 = vadd.f32 %v253_v16, %v223_v18 }
  0xad   :  { %v236_v20 = vpop.f32.mrf.mxu1  ;;  %v255_v24 = vsub.f32 0.0, %v254_v19 }
  0xae   :  { %v264_v23 = vadd.f32 %v263_v17, %v236_v20 }
  0xaf   :  { %v256_v27 = vmul.f32 1.442695, %v255_v24 }
  0xb0   :  { %v265_v26 = vsub.f32 0.0, %v264_v23 }
  0xb1   :  { %956 = vpow2.f32 %v256_v27 }
  0xb2   :  { %v266_v28 = vmul.f32 1.442695, %v265_v26  ;;  %v225_v29 = vpop.f32.mrf.mxu0 }
  0xb3   :  { %v249_v33 = vpop.f32.mrf.mxu2 }
  0xb4   :  { %958 = vpow2.f32 %v266_v28  ;;  %v273_v45 = vadd.f32 %v1258_v38, %v249_v33 }
  0xb5   :  { %v238_v32 = vpop.f32.mrf.mxu1 }
  0xb6   :  { %v906_v32 = vld [vmem:[%s1461_s0 + $0x14] sm:$0xf] }
  0xb7   :  { %v957_v35 = vpop.eup %956 }
  0xb8   :  { %v258_v37 = vadd.f32 1.0, %v957_v35 }
  0xba   :  { %v959_v36 = vpop.eup %958  ;;  %960 = vrcp.f32 %v258_v37 }
  0xbb   :  { %v268_v41 = vadd.f32 1.0, %v959_v36  ;;  %v251_v42 = vpop.f32.mrf.mxu2  ;;  %v348_v36 = vunpack.c.l.bf16 %v906_v32 }
  0xbd   :  { %962 = vrcp.f32 %v268_v41 }
  0xc0   :  { %v961_v47 = vpop.eup %960 }
  0xc1   :  { %v274_v50 = vmul.f32 %v961_v47, %v273_v45 }
  0xc3   :  { %v276_v51 = vadd.f32 %v275_v46, %v274_v50  ;;  %v963_v53 = vpop.eup %962 }
  0xc4   :  { %v278_v54 = vsub.f32 1.0, %v963_v53  ;;  %v280_v56 = vmul.f32 0.0, %v963_v53 }
  0xc5   :  { %964 = vtanh.f32 %v276_v51 }
  0xcb   :  { %v965_v55 = vpop.eup %964 }
  0xcc   :  { %v279_v59 = vmul.f32 %v965_v55, %v278_v54  ;;  %v908_v54 = vld [vmem:[%s1461_s0 + $0x18] sm:$0xff] }
  0xcd   :  { %v411_v55 = vrot.slane %v908_v54, 4 }
  0xce   :  { %v1264_v60 = vadd.f32 %v280_v56, %v279_v59  ;;  %v403_v59 = vunpack.c.l.bf16 %v908_v54 }
  0xd0   :  { %v283_v62 = vpack.c.bf16 %v1264_v60, %v1264_v60 }
  0xd2   :  { %284 = vst [vmem:[%s1464_s3] sm:$0xf] %v283_v62  ;;  %298 = vmatmul.bf16.vlgmr.msra.gmra.mxu3 %v283_v62  ;;  %311 = vmatmul.bf16.vlgmr.msrb.gmra.mxu0 %v283_v62 }
  0xd3   :  { %324 = vmatmul.bf16.vlgmr.msrb.gmra.mxu1 %v283_v62  ;;  %464 = vmatpush.bf16.msra.mxu3 %v1130_v14 }
  0xd4   :  { %512 = vmatpush.bf16.msrb.mxu0 %v1119_v3  ;;  %525 = vmatpush.bf16.msrb.mxu1 %v1121_v7 }
  0xd7   :  { %465 = vmatpush.bf16.msra.mxu3 %v1133_v21 }
  0xd8   :  { %513 = vmatpush.bf16.msrb.mxu0 %v1124_v11  ;;  %526 = vmatpush.bf16.msrb.mxu1 %v1128_v13 }
  0xdb   :  { %466 = vmatpush.bf16.msra.mxu3 %v1143_v30 }
  0xdc   :  { %514 = vmatpush.bf16.msrb.mxu0 %v1136_v22  ;;  %527 = vmatpush.bf16.msrb.mxu1 %v1140_v25 }
  0xdf   :  { %467 = vmatpush.bf16.msra.mxu3 %v1153_v39 }
  0xe0   :  { %515 = vmatpush.bf16.msrb.mxu0 %v1146_v31  ;;  %528 = vmatpush.bf16.msrb.mxu1 %v1150_v34 }
  0xe3   :  { %468 = vmatpush.bf16.msra.mxu3 %v1163_v48 }
  0xe4   :  { %516 = vmatpush.bf16.msrb.mxu0 %v1156_v40  ;;  %529 = vmatpush.bf16.msrb.mxu1 %v1160_v43 }
  0xe7   :  { %469 = vmatpush.bf16.msra.mxu3 %v1173_v57 }
  0xe8   :  { %517 = vmatpush.bf16.msrb.mxu0 %v1166_v49  ;;  %530 = vmatpush.bf16.msrb.mxu1 %v1170_v52 }
  0xeb   :  { %470 = vmatpush.bf16.msra.mxu3 %v1183_v2 }
  0xec   :  { %518 = vmatpush.bf16.msrb.mxu0 %v1176_v58  ;;  %531 = vmatpush.bf16.msrb.mxu1 %v1180_v61 }
  0xef   :  { %471 = vmatpush.bf16.msra.mxu3 %v1193_v9 }
  0xf0   :  { %519 = vmatpush.bf16.msrb.mxu0 %v1186_v4  ;;  %532 = vmatpush.bf16.msrb.mxu1 %v1190_v8 }
 0x14f   :  { %v312_v1 = vpop.f32.mrf.mxu0 }
 0x150   :  { %v325_v6 = vpop.f32.mrf.mxu1  ;;  %v340_v12 = vadd.f32 %v339_v5, %v312_v1 }
 0x151   :  { %v346_v35 = vadd.f32 %v1258_v38, %v325_v6 }
 0x152   :  { %v341_v17 = vsub.f32 0.0, %v340_v12 }
 0x154   :  { %v342_v24 = vmul.f32 1.442695, %v341_v17 }
 0x155   :  { %v299_v15 = vpop.f32.mrf.mxu3 }
 0x156   :  { %v330_v16 = vadd.f32 %v329_v10, %v299_v15 }
 0x157   :  { %v314_v18 = vpop.f32.mrf.mxu0 }
 0x158   :  { %v331_v19 = vsub.f32 0.0, %v330_v16  ;;  %v327_v20 = vpop.f32.mrf.mxu1 }
 0x15a   :  { %v332_v23 = vmul.f32 1.442695, %v331_v19 }
 0x15c   :  { %966 = vpow2.f32 %v332_v23  ;;  %v909_v23 = vld [vmem:[%s1461_s0 + $0x20] sm:$0xf] }
 0x15d   :  { %v301_v26 = vpop.f32.mrf.mxu3  ;;  %968 = vpow2.f32 %v342_v24 }
 0x162   :  { %v967_v27 = vpop.eup %966 }
 0x163   :  { %v334_v28 = vadd.f32 1.0, %v967_v27  ;;  %v969_v29 = vpop.eup %968  ;;  %v422_v27 = vunpack.c.l.bf16 %v909_v23 }
 0x164   :  { %v344_v33 = vadd.f32 1.0, %v969_v29 }
 0x165   :  { %970 = vrcp.f32 %v334_v28 }
 0x166   :  { %972 = vrcp.f32 %v344_v33 }
 0x16b   :  { %v971_v37 = vpop.eup %970 }
 0x16c   :  { %v347_v41 = vmul.f32 %v971_v37, %v346_v35  ;;  %v973_v44 = vpop.eup %972 }
 0x16d   :  { %v351_v45 = vsub.f32 1.0, %v973_v44  ;;  %v353_v47 = vmul.f32 %v973_v44, %v1264_v60  ;;  %v413_v60 = vunpack.c.l.bf16 %v411_v55 }
 0x16e   :  { %v349_v42 = vadd.f32 %v348_v36, %v347_v41 }
 0x170   :  { %974 = vtanh.f32 %v349_v42 }
 0x176   :  { %v975_v46 = vpop.eup %974 }
 0x177   :  { %v352_v50 = vmul.f32 %v975_v46, %v351_v45  ;;  %v911_v45 = vld [vmem:[%s1461_s0 + $0x24] sm:$0xff] }
 0x178   :  { %v477_v46 = vunpack.c.l.bf16 %v911_v45 }
 0x179   :  { %v1303_v51 = vadd.f32 %v353_v47, %v352_v50  ;;  %v485_v47 = vrot.slane %v911_v45, 4 }
 0x17b   :  { %v356_v53 = vpack.c.bf16 %v1303_v51, %v1303_v51  ;;  %v487_v54 = vunpack.c.l.bf16 %v485_v47 }
 0x17d   :  { %907 = vst [vmem:[%s1464_s3 + $0x4] sm:$0xf] %v356_v53  ;;  %372 = vmatmul.bf16.vlgmr.msrb.gmra.mxu2 %v356_v53  ;;  %385 = vmatmul.bf16.vlgmr.msrb.gmra.mxu3 %v356_v53 }
 0x17e   :  { %398 = vmatmul.bf16.vlgmr.msra.gmra.mxu0 %v356_v53  ;;  %538 = vmatpush.bf16.msrb.mxu2 %v1130_v14 }
 0x17f   :  { %586 = vmatpush.bf16.msrb.mxu3 %v1119_v3  ;;  %599 = vmatpush.bf16.msra.mxu0 %v1121_v7 }
 0x182   :  { %539 = vmatpush.bf16.msrb.mxu2 %v1133_v21 }
 0x183   :  { %587 = vmatpush.bf16.msrb.mxu3 %v1124_v11  ;;  %600 = vmatpush.bf16.msra.mxu0 %v1128_v13 }
 0x186   :  { %540 = vmatpush.bf16.msrb.mxu2 %v1143_v30 }
 0x187   :  { %588 = vmatpush.bf16.msrb.mxu3 %v1136_v22  ;;  %601 = vmatpush.bf16.msra.mxu0 %v1140_v25 }
 0x18a   :  { %541 = vmatpush.bf16.msrb.mxu2 %v1153_v39 }
 0x18b   :  { %589 = vmatpush.bf16.msrb.mxu3 %v1146_v31  ;;  %602 = vmatpush.bf16.msra.mxu0 %v1150_v34 }
 0x18e   :  { %542 = vmatpush.bf16.msrb.mxu2 %v1163_v48 }
 0x18f   :  { %590 = vmatpush.bf16.msrb.mxu3 %v1156_v40  ;;  %603 = vmatpush.bf16.msra.mxu0 %v1160_v43 }
 0x192   :  { %543 = vmatpush.bf16.msrb.mxu2 %v1173_v57 }
 0x193   :  { %591 = vmatpush.bf16.msrb.mxu3 %v1166_v49  ;;  %604 = vmatpush.bf16.msra.mxu0 %v1170_v52 }
 0x196   :  { %544 = vmatpush.bf16.msrb.mxu2 %v1183_v2 }
 0x197   :  { %592 = vmatpush.bf16.msrb.mxu3 %v1176_v58  ;;  %605 = vmatpush.bf16.msra.mxu0 %v1180_v61 }
 0x19a   :  { %545 = vmatpush.bf16.msrb.mxu2 %v1193_v9 }
 0x19b   :  { %593 = vmatpush.bf16.msrb.mxu3 %v1186_v4  ;;  %606 = vmatpush.bf16.msra.mxu0 %v1190_v8 }
 0x1fb   :  { %v399_v56 = vpop.f32.mrf.mxu0 }
 0x1fc   :  { %v420_v26 = vadd.f32 %v1258_v38, %v399_v56 }
 0x200   :  { %v373_v62 = vpop.f32.mrf.mxu2  ;;  %v386_v63 = vpop.f32.mrf.mxu3 }
 0x201   :  { %v404_v0 = vadd.f32 %v403_v59, %v373_v62  ;;  %v414_v1 = vadd.f32 %v413_v60, %v386_v63 }
 0x203   :  { %v405_v5 = vsub.f32 0.0, %v404_v0  ;;  %v415_v6 = vsub.f32 0.0, %v414_v1  ;;  %v401_v10 = vpop.f32.mrf.mxu0 }
 0x205   :  { %v406_v12 = vmul.f32 1.442695, %v405_v5  ;;  %v416_v15 = vmul.f32 1.442695, %v415_v6 }
 0x207   :  { %976 = vpow2.f32 %v406_v12  ;;  %v912_v12 = vld [vmem:[%s1461_s0 + $0x2c] sm:$0xf] }
 0x208   :  { %v375_v16 = vpop.f32.mrf.mxu2  ;;  %v388_v17 = vpop.f32.mrf.mxu3  ;;  %978 = vpow2.f32 %v416_v15 }
 0x20d   :  { %v977_v18 = vpop.eup %976 }
 0x20e   :  { %v408_v19 = vadd.f32 1.0, %v977_v18  ;;  %v979_v20 = vpop.eup %978  ;;  %v496_v18 = vunpack.c.l.bf16 %v912_v12 }
 0x20f   :  { %v418_v24 = vadd.f32 1.0, %v979_v20 }
 0x210   :  { %980 = vrcp.f32 %v408_v19 }
 0x211   :  { %982 = vrcp.f32 %v418_v24 }
 0x216   :  { %v981_v28 = vpop.eup %980 }
 0x217   :  { %v421_v29 = vmul.f32 %v981_v28, %v420_v26  ;;  %v983_v33 = vpop.eup %982 }
 0x218   :  { %v425_v35 = vsub.f32 1.0, %v983_v33  ;;  %v427_v37 = vmul.f32 %v983_v33, %v1303_v51 }
 0x219   :  { %v423_v32 = vadd.f32 %v422_v27, %v421_v29 }
 0x21b   :  { %984 = vtanh.f32 %v423_v32 }
 0x221   :  { %v985_v36 = vpop.eup %984 }
 0x222   :  { %v426_v41 = vmul.f32 %v985_v36, %v425_v35 }
 0x224   :  { %v1342_v42 = vadd.f32 %v427_v37, %v426_v41  ;;  %v915_v41 = vld [vmem:[%s1461_s0 + $0x38] sm:$0xf] }
 0x225   :  { %v570_v45 = vunpack.c.l.bf16 %v915_v41 }
 0x226   :  { %v430_v44 = vpack.c.bf16 %v1342_v42, %v1342_v42 }
 0x228   :  { %910 = vst [vmem:[%s1464_s3 + $0x8] sm:$0xf] %v430_v44  ;;  %446 = vmatmul.bf16.vlgmr.msra.gmra.mxu1 %v430_v44  ;;  %459 = vmatmul.bf16.vlgmr.msra.gmra.mxu2 %v430_v44 }
 0x229   :  { %472 = vmatmul.bf16.vlgmr.msra.gmra.mxu3 %v430_v44  ;;  %612 = vmatpush.bf16.msra.mxu1 %v1130_v14 }
 0x22a   :  { %660 = vmatpush.bf16.msra.mxu2 %v1119_v3  ;;  %673 = vmatpush.bf16.msra.mxu3 %v1121_v7 }
 0x22d   :  { %613 = vmatpush.bf16.msra.mxu1 %v1133_v21 }
 0x22e   :  { %661 = vmatpush.bf16.msra.mxu2 %v1124_v11  ;;  %674 = vmatpush.bf16.msra.mxu3 %v1128_v13 }
 0x231   :  { %614 = vmatpush.bf16.msra.mxu1 %v1143_v30 }
 0x232   :  { %662 = vmatpush.bf16.msra.mxu2 %v1136_v22  ;;  %675 = vmatpush.bf16.msra.mxu3 %v1140_v25 }
 0x235   :  { %615 = vmatpush.bf16.msra.mxu1 %v1153_v39 }
 0x236   :  { %663 = vmatpush.bf16.msra.mxu2 %v1146_v31  ;;  %676 = vmatpush.bf16.msra.mxu3 %v1150_v34 }
 0x239   :  { %616 = vmatpush.bf16.msra.mxu1 %v1163_v48 }
 0x23a   :  { %664 = vmatpush.bf16.msra.mxu2 %v1156_v40  ;;  %677 = vmatpush.bf16.msra.mxu3 %v1160_v43 }
 0x23d   :  { %617 = vmatpush.bf16.msra.mxu1 %v1173_v57 }
 0x23e   :  { %665 = vmatpush.bf16.msra.mxu2 %v1166_v49  ;;  %678 = vmatpush.bf16.msra.mxu3 %v1170_v52 }
 0x241   :  { %618 = vmatpush.bf16.msra.mxu1 %v1183_v2 }
 0x242   :  { %666 = vmatpush.bf16.msra.mxu2 %v1176_v58  ;;  %679 = vmatpush.bf16.msra.mxu3 %v1180_v61 }
 0x245   :  { %619 = vmatpush.bf16.msra.mxu1 %v1193_v9 }
 0x246   :  { %667 = vmatpush.bf16.msra.mxu2 %v1186_v4  ;;  %680 = vmatpush.bf16.msra.mxu3 %v1190_v8 }
 0x2a5   :  { %v447_v50 = vpop.f32.mrf.mxu1 }
 0x2a6   :  { %v478_v51 = vadd.f32 %v477_v46, %v447_v50 }
 0x2a8   :  { %v479_v53 = vsub.f32 0.0, %v478_v51 }
 0x2aa   :  { %v480_v55 = vmul.f32 1.442695, %v479_v53 }
 0x2ab   :  { %v460_v56 = vpop.f32.mrf.mxu2 }
 0x2ac   :  { %986 = vpow2.f32 %v480_v55  ;;  %v488_v59 = vadd.f32 %v487_v54, %v460_v56  ;;  %v473_v60 = vpop.f32.mrf.mxu3 }
 0x2ad   :  { %v449_v62 = vpop.f32.mrf.mxu1  ;;  %v494_v17 = vadd.f32 %v1258_v38, %v473_v60 }
 0x2ae   :  { %v489_v63 = vsub.f32 0.0, %v488_v59  ;;  %v917_v62 = vld [vmem:[%s1461_s0 + $0x3c] sm:$0xff] }
 0x2b0   :  { %v490_v0 = vmul.f32 1.442695, %v489_v63  ;;  %v633_v63 = vrot.slane %v917_v62, 4 }
 0x2b2   :  { %v987_v1 = vpop.eup %986  ;;  %988 = vpow2.f32 %v490_v0  ;;  %v635_v0 = vunpack.c.l.bf16 %v633_v63 }
 0x2b3   :  { %v482_v5 = vadd.f32 1.0, %v987_v1  ;;  %v462_v6 = vpop.f32.mrf.mxu2  ;;  %v625_v1 = vunpack.c.l.bf16 %v917_v62 }
 0x2b4   :  { %v475_v10 = vpop.f32.mrf.mxu3 }
 0x2b5   :  { %990 = vrcp.f32 %v482_v5 }
 0x2b8   :  { %v989_v15 = vpop.eup %988 }
 0x2b9   :  { %v492_v16 = vadd.f32 1.0, %v989_v15 }
 0x2bb   :  { %v991_v19 = vpop.eup %990  ;;  %992 = vrcp.f32 %v492_v16 }
 0x2bc   :  { %v495_v20 = vmul.f32 %v991_v19, %v494_v17 }
 0x2be   :  { %v497_v23 = vadd.f32 %v496_v18, %v495_v20  ;;  %v918_v18 = vld [vmem:[%s1461_s0 + $0x44] sm:$0xf] }
 0x2c0   :  { %994 = vtanh.f32 %v497_v23  ;;  %v644_v23 = vunpack.c.l.bf16 %v918_v18 }
 0x2c1   :  { %v993_v24 = vpop.eup %992 }
 0x2c2   :  { %v499_v26 = vsub.f32 1.0, %v993_v24  ;;  %v501_v28 = vmul.f32 %v993_v24, %v1342_v42 }
 0x2c6   :  { %v995_v27 = vpop.eup %994 }
 0x2c7   :  { %v500_v29 = vmul.f32 %v995_v27, %v499_v26 }
 0x2c9   :  { %v1381_v32 = vadd.f32 %v501_v28, %v500_v29 }
 0x2cb   :  { %v504_v33 = vpack.c.bf16 %v1381_v32, %v1381_v32 }
 0x2cd   :  { %913 = vst [vmem:[%s1464_s3 + $0xc] sm:$0xf] %v504_v33  ;;  %520 = vmatmul.bf16.vlgmr.msrb.gmra.mxu0 %v504_v33  ;;  %533 = vmatmul.bf16.vlgmr.msrb.gmra.mxu1 %v504_v33 }
 0x2ce   :  { %546 = vmatmul.bf16.vlgmr.msrb.gmra.mxu2 %v504_v33  ;;  %686 = vmatpush.bf16.msrb.mxu0 %v1130_v14 }
 0x2cf   :  { %734 = vmatpush.bf16.msrb.mxu1 %v1119_v3  ;;  %747 = vmatpush.bf16.msrb.mxu2 %v1121_v7  ;;  %v914_v3 = vld [vmem:[%s1461_s0 + $0x30] sm:$0xff] }
 0x2d0   :  { %v559_v7 = vrot.slane %v914_v3, 4 }
 0x2d2   :  { %687 = vmatpush.bf16.msrb.mxu0 %v1133_v21 }
 0x2d3   :  { %735 = vmatpush.bf16.msrb.mxu1 %v1124_v11  ;;  %748 = vmatpush.bf16.msrb.mxu2 %v1128_v13  ;;  %v551_v11 = vunpack.c.l.bf16 %v914_v3  ;;  %v561_v13 = vunpack.c.l.bf16 %v559_v7 }
 0x2d6   :  { %688 = vmatpush.bf16.msrb.mxu0 %v1143_v30 }
 0x2d7   :  { %736 = vmatpush.bf16.msrb.mxu1 %v1136_v22  ;;  %749 = vmatpush.bf16.msrb.mxu2 %v1140_v25 }
 0x2da   :  { %689 = vmatpush.bf16.msrb.mxu0 %v1153_v39 }
 0x2db   :  { %737 = vmatpush.bf16.msrb.mxu1 %v1146_v31  ;;  %750 = vmatpush.bf16.msrb.mxu2 %v1150_v34 }
 0x2de   :  { %690 = vmatpush.bf16.msrb.mxu0 %v1163_v48 }
 0x2df   :  { %738 = vmatpush.bf16.msrb.mxu1 %v1156_v40  ;;  %751 = vmatpush.bf16.msrb.mxu2 %v1160_v43 }
 0x2e2   :  { %691 = vmatpush.bf16.msrb.mxu0 %v1173_v57 }
 0x2e3   :  { %739 = vmatpush.bf16.msrb.mxu1 %v1166_v49  ;;  %752 = vmatpush.bf16.msrb.mxu2 %v1170_v52 }
 0x2e6   :  { %692 = vmatpush.bf16.msrb.mxu0 %v1183_v2 }
 0x2e7   :  { %740 = vmatpush.bf16.msrb.mxu1 %v1176_v58  ;;  %753 = vmatpush.bf16.msrb.mxu2 %v1180_v61 }
 0x2ea   :  { %693 = vmatpush.bf16.msrb.mxu0 %v1193_v9 }
 0x2eb   :  { %741 = vmatpush.bf16.msrb.mxu1 %v1186_v4  ;;  %754 = vmatpush.bf16.msrb.mxu2 %v1190_v8 }
 0x34a   :  { %v521_v22 = vpop.f32.mrf.mxu0  ;;  %v534_v25 = vpop.f32.mrf.mxu1 }
 0x34b   :  { %v552_v31 = vadd.f32 %v551_v11, %v521_v22  ;;  %v562_v34 = vadd.f32 %v561_v13, %v534_v25  ;;  %v920_v13 = vld [vmem:[%s1461_s0 + $0x48] sm:$0xff] }
 0x34c   :  { %v707_v22 = vrot.slane %v920_v13, 4 }
 0x34d   :  { %v553_v40 = vsub.f32 0.0, %v552_v31  ;;  %v563_v43 = vsub.f32 0.0, %v562_v34  ;;  %v699_v31 = vunpack.c.l.bf16 %v920_v13 }
 0x34e   :  { %v709_v34 = vunpack.c.l.bf16 %v707_v22 }
 0x34f   :  { %v554_v49 = vmul.f32 1.442695, %v553_v40  ;;  %v564_v52 = vmul.f32 1.442695, %v563_v43 }
 0x351   :  { %996 = vpow2.f32 %v554_v49  ;;  %v547_v58 = vpop.f32.mrf.mxu2 }
 0x352   :  { %v523_v61 = vpop.f32.mrf.mxu0  ;;  %v536_v4 = vpop.f32.mrf.mxu1  ;;  %998 = vpow2.f32 %v564_v52  ;;  %v568_v44 = vadd.f32 %v1258_v38, %v547_v58 }
 0x357   :  { %v997_v8 = vpop.eup %996 }
 0x358   :  { %v556_v35 = vadd.f32 1.0, %v997_v8  ;;  %v999_v37 = vpop.eup %998 }
 0x359   :  { %v549_v36 = vpop.f32.mrf.mxu2  ;;  %v566_v42 = vadd.f32 1.0, %v999_v37 }
 0x35a   :  { %1000 = vrcp.f32 %v556_v35 }
 0x35b   :  { %1002 = vrcp.f32 %v566_v42 }
 0x360   :  { %v1001_v46 = vpop.eup %1000 }
 0x361   :  { %v569_v47 = vmul.f32 %v1001_v46, %v568_v44  ;;  %v1003_v51 = vpop.eup %1002 }
 0x362   :  { %v573_v53 = vsub.f32 1.0, %v1003_v51  ;;  %v575_v55 = vmul.f32 %v1003_v51, %v1381_v32 }
 0x363   :  { %v571_v50 = vadd.f32 %v570_v45, %v569_v47  ;;  %v921_v45 = vld [vmem:[%s1461_s0 + $0x50] sm:$0xf] }
 0x365   :  { %1004 = vtanh.f32 %v571_v50  ;;  %v718_v50 = vunpack.c.l.bf16 %v921_v45 }
 0x36b   :  { %v1005_v54 = vpop.eup %1004 }
 0x36c   :  { %v574_v56 = vmul.f32 %v1005_v54, %v573_v53 }
 0x36e   :  { %v576_v59 = vadd.f32 %v575_v55, %v574_v56 }
 0x370   :  { %v578_v60 = vpack.c.bf16 %v576_v59, %v576_v59 }
 0x372   :  { %916 = vst [vmem:[%s1464_s3 + $0x10] sm:$0xf] %v578_v60  ;;  %594 = vmatmul.bf16.vlgmr.msrb.gmra.mxu3 %v578_v60  ;;  %607 = vmatmul.bf16.vlgmr.msra.gmra.mxu0 %v578_v60 }
 0x373   :  { %620 = vmatmul.bf16.vlgmr.msra.gmra.mxu1 %v578_v60  ;;  %760 = vmatpush.bf16.msrb.mxu3 %v1130_v14 }
 0x377   :  { %761 = vmatpush.bf16.msrb.mxu3 %v1133_v21 }
 0x37b   :  { %762 = vmatpush.bf16.msrb.mxu3 %v1143_v30 }
 0x37f   :  { %763 = vmatpush.bf16.msrb.mxu3 %v1153_v39 }
 0x383   :  { %764 = vmatpush.bf16.msrb.mxu3 %v1163_v48 }
 0x387   :  { %765 = vmatpush.bf16.msrb.mxu3 %v1173_v57 }
 0x38b   :  { %766 = vmatpush.bf16.msrb.mxu3 %v1183_v2 }
 0x38f   :  { %767 = vmatpush.bf16.msrb.mxu3 %v1193_v9 }
 0x3ef   :  { %v608_v14 = vpop.f32.mrf.mxu0 }
 0x3f0   :  { %v621_v21 = vpop.f32.mrf.mxu1  ;;  %v636_v30 = vadd.f32 %v635_v0, %v608_v14  ;;  %v923_v0 = vld [vmem:[%s1461_s0 + $0x54] sm:$0xff] }
 0x3f1   :  { %v642_v20 = vadd.f32 %v1258_v38, %v621_v21  ;;  %v773_v21 = vunpack.c.l.bf16 %v923_v0 }
 0x3f2   :  { %v637_v6 = vsub.f32 0.0, %v636_v30 }
 0x3f4   :  { %v638_v2 = vmul.f32 1.442695, %v637_v6 }
 0x3f5   :  { %v595_v5 = vpop.f32.mrf.mxu3 }
 0x3f6   :  { %v626_v39 = vadd.f32 %v625_v1, %v595_v5  ;;  %v781_v1 = vrot.slane %v923_v0, 4 }
 0x3f7   :  { %v610_v48 = vpop.f32.mrf.mxu0 }
 0x3f8   :  { %v627_v10 = vsub.f32 0.0, %v626_v39  ;;  %v623_v57 = vpop.f32.mrf.mxu1  ;;  %v783_v6 = vunpack.c.l.bf16 %v781_v1 }
 0x3fa   :  { %v628_v12 = vmul.f32 1.442695, %v627_v10 }
 0x3fc   :  { %1006 = vpow2.f32 %v628_v12 }
 0x3fd   :  { %v597_v9 = vpop.f32.mrf.mxu3  ;;  %1008 = vpow2.f32 %v638_v2 }
 0x402   :  { %v1007_v15 = vpop.eup %1006 }
 0x403   :  { %v630_v16 = vadd.f32 1.0, %v1007_v15  ;;  %v1009_v17 = vpop.eup %1008 }
 0x404   :  { %v640_v19 = vadd.f32 1.0, %v1009_v17 }
 0x405   :  { %1010 = vrcp.f32 %v630_v16 }
 0x406   :  { %1012 = vrcp.f32 %v640_v19 }
 0x40b   :  { %v1011_v24 = vpop.eup %1010 }
 0x40c   :  { %v643_v26 = vmul.f32 %v1011_v24, %v642_v20  ;;  %v1013_v28 = vpop.eup %1012  ;;  %v924_v20 = vld [vmem:[%s1461_s0 + $0x5c] sm:$0xf] }
 0x40d   :  { %v647_v29 = vsub.f32 1.0, %v1013_v28  ;;  %v649_v33 = vmul.f32 %v1013_v28, %v576_v59 }
 0x40e   :  { %v645_v27 = vadd.f32 %v644_v23, %v643_v26 }
 0x410   :  { %1014 = vtanh.f32 %v645_v27  ;;  %v792_v27 = vunpack.c.l.bf16 %v924_v20 }
 0x416   :  { %v1015_v32 = vpop.eup %1014 }
 0x417   :  { %v648_v3 = vmul.f32 %v1015_v32, %v647_v29 }
 0x419   :  { %v650_v7 = vadd.f32 %v649_v33, %v648_v3 }
 0x41b   :  { %v652_v11 = vpack.c.bf16 %v650_v7, %v650_v7 }
 0x41d   :  { %919 = vst [vmem:[%s1464_s3 + $0x14] sm:$0xf] %v652_v11  ;;  %668 = vmatmul.bf16.vlgmr.msra.gmra.mxu2 %v652_v11  ;;  %681 = vmatmul.bf16.vlgmr.msra.gmra.mxu3 %v652_v11 }
 0x41e   :  { %694 = vmatmul.bf16.vlgmr.msrb.gmra.mxu0 %v652_v11 }
 0x49b   :  { %v695_v25 = vpop.f32.mrf.mxu0 }
 0x49c   :  { %v716_v47 = vadd.f32 %v1258_v38, %v695_v25 }
 0x4a0   :  { %v669_v40 = vpop.f32.mrf.mxu2  ;;  %v682_v43 = vpop.f32.mrf.mxu3 }
 0x4a1   :  { %v700_v49 = vadd.f32 %v699_v31, %v669_v40  ;;  %v710_v52 = vadd.f32 %v709_v34, %v682_v43 }
 0x4a3   :  { %v701_v58 = vsub.f32 0.0, %v700_v49  ;;  %v711_v61 = vsub.f32 0.0, %v710_v52  ;;  %v697_v4 = vpop.f32.mrf.mxu0 }
 0x4a5   :  { %v702_v8 = vmul.f32 1.442695, %v701_v58  ;;  %v712_v35 = vmul.f32 1.442695, %v711_v61 }
 0x4a7   :  { %1016 = vpow2.f32 %v702_v8 }
 0x4a8   :  { %v671_v36 = vpop.f32.mrf.mxu2  ;;  %v684_v37 = vpop.f32.mrf.mxu3  ;;  %1018 = vpow2.f32 %v712_v35 }
 0x4ad   :  { %v1017_v41 = vpop.eup %1016 }
 0x4ae   :  { %v704_v42 = vadd.f32 1.0, %v1017_v41  ;;  %v1019_v44 = vpop.eup %1018 }
 0x4af   :  { %v714_v46 = vadd.f32 1.0, %v1019_v44 }
 0x4b0   :  { %1020 = vrcp.f32 %v704_v42 }
 0x4b1   :  { %1022 = vrcp.f32 %v714_v46 }
 0x4b6   :  { %v1021_v51 = vpop.eup %1020 }
 0x4b7   :  { %v717_v53 = vmul.f32 %v1021_v51, %v716_v47  ;;  %v1023_v55 = vpop.eup %1022 }
 0x4b8   :  { %v721_v56 = vsub.f32 1.0, %v1023_v55  ;;  %v723_v60 = vmul.f32 %v1023_v55, %v650_v7 }
 0x4b9   :  { %v719_v54 = vadd.f32 %v718_v50, %v717_v53 }
 0x4bb   :  { %1024 = vtanh.f32 %v719_v54 }
 0x4c1   :  { %v1025_v59 = vpop.eup %1024 }
 0x4c2   :  { %v722_v62 = vmul.f32 %v1025_v59, %v721_v56 }
 0x4c4   :  { %v724_v63 = vadd.f32 %v723_v60, %v722_v62 }
 0x4c6   :  { %v726_v14 = vpack.c.bf16 %v724_v63, %v724_v63 }
 0x4c8   :  { %922 = vst [vmem:[%s1464_s3 + $0x18] sm:$0xf] %v726_v14  ;;  %742 = vmatmul.bf16.vlgmr.msrb.gmra.mxu1 %v726_v14  ;;  %755 = vmatmul.bf16.vlgmr.msrb.gmra.mxu2 %v726_v14 }
 0x4c9   :  { %768 = vmatmul.bf16.vlgmr.msrb.gmra.mxu3 %v726_v14 }
 0x545   :  { %v743_v30 = vpop.f32.mrf.mxu1 }
 0x546   :  { %v774_v5 = vadd.f32 %v773_v21, %v743_v30 }
 0x548   :  { %v775_v39 = vsub.f32 0.0, %v774_v5 }
 0x54a   :  { %v776_v48 = vmul.f32 1.442695, %v775_v39 }
 0x54b   :  { %v756_v10 = vpop.f32.mrf.mxu2 }
 0x54c   :  { %1026 = vpow2.f32 %v776_v48  ;;  %v784_v57 = vadd.f32 %v783_v6, %v756_v10  ;;  %v769_v12 = vpop.f32.mrf.mxu3 }
 0x54d   :  { %v745_v2 = vpop.f32.mrf.mxu1  ;;  %v790_v26 = vadd.f32 %v1258_v38, %v769_v12 }
 0x54e   :  { %v785_v9 = vsub.f32 0.0, %v784_v57 }
 0x550   :  { %v786_v15 = vmul.f32 1.442695, %v785_v9 }
 0x552   :  { %v1027_v16 = vpop.eup %1026  ;;  %1028 = vpow2.f32 %v786_v15 }
 0x553   :  { %v778_v17 = vadd.f32 1.0, %v1027_v16  ;;  %v758_v18 = vpop.f32.mrf.mxu2 }
 0x554   :  { %v771_v19 = vpop.f32.mrf.mxu3 }
 0x555   :  { %1030 = vrcp.f32 %v778_v17 }
 0x558   :  { %v1029_v23 = vpop.eup %1028 }
 0x559   :  { %v788_v24 = vadd.f32 1.0, %v1029_v23 }
 0x55b   :  { %v1031_v28 = vpop.eup %1030  ;;  %1032 = vrcp.f32 %v788_v24 }
 0x55c   :  { %v791_v29 = vmul.f32 %v1031_v28, %v790_v26 }
 0x55e   :  { %v793_v32 = vadd.f32 %v792_v27, %v791_v29 }
 0x560   :  { %1034 = vtanh.f32 %v793_v32 }
 0x561   :  { %v1033_v33 = vpop.eup %1032 }
 0x562   :  { %v795_v3 = vsub.f32 1.0, %v1033_v33  ;;  %v797_v11 = vmul.f32 %v1033_v33, %v724_v63 }
 0x566   :  { %v1035_v7 = vpop.eup %1034 }
 0x567   :  { %v796_v13 = vmul.f32 %v1035_v7, %v795_v3 }
 0x569   :  { %v798_v22 = vadd.f32 %v797_v11, %v796_v13 }
 0x56b   :  { %v800_v25 = vpack.c.bf16 %v798_v22, %v798_v22 }
 0x56d   :  { %925 = vst [vmem:[%s1464_s3 + $0x1c] sm:$0xf] %v800_v25 }
 0x56e   :  { %807 = vsyncpa [#allocation4], 1 }
 0x56f   :  { %808 = vsyncpa [#allocation6], 1 }

// kernel: gru_forward.7
= control target key start
LH: loop header
LB: loop body
LE: loop exit
PB: predicated region body
PF: predicated region fallthrough
CT: control target
= control target key end

     0   :  { %12 = vsyncpa [#allocation5], 0  ;;  %s1638_s0 = inlined_call_operand.vmem [shape: bf16[8,8,384], index: 0, kind: input, shape index: {}]   ;;  %s1639_s1 = inlined_call_operand.hbm [shape: bf16[128,384], index: 1, kind: input, shape index: {}]   ;;  %s1640_s2 = inlined_call_operand.vmem [shape: f32[1,128], index: 2, kind: input, shape index: {}]   ;;  %s1641_s3 = inlined_call_operand.vmem [shape: bf16[128,128], index: 3, kind: input, shape index: {}]   ;;  %s1642_s4 = inlined_call_operand.hbm [shape: f32[1,128], index: 4, kind: input, shape index: {}]   ;;  %s1643_s5 = inlined_call_operand.vmem [shape: f32[8,128], index: 5, kind: output, shape index: {0}]   ;;  %s1644_s6 = inlined_call_operand.vmem [shape: f32[8,128], index: 6, kind: output, shape index: {1}]  }
   0x1   :  { %s20_s23 = sshll.u32 %s1639_s1, 4  ;;  %s21_s23 = int_to_ptr.hbm [resolvable:$true] %s20_s23 }
   0x2   :  { %13 = vsyncpa [#allocation7], 0  ;;  %s1225_s24 = smov [#allocation4]   ;;  %s38_s28 = sshll.u32 %s1642_s4, 4  ;;  %s39_s28 = int_to_ptr.hbm [resolvable:$true] %s38_s28 }
   0x3   :  { %s22_s25 = sshll.u32 %s1225_s24, 4  ;;  %s1226_s29 = smov 192   ;;  %s23_s25 = int_to_ptr.vmem [resolvable:$true] %s22_s25 }
   0x4   :  { %s1227_s30 = smov 12   ;;  %s1228_s7 = smov [#allocation6]  }
   0x5   :  { %28 = dma.hbm_to_vmem [thread:$0]  %s21_s23, 3072, %s23_s25, [#allocation5], %s1226_s29, %s1226_s29, %s1227_s30  }
   0x6   :  { %s40_s8 = sshll.u32 %s1228_s7, 4  ;;  %s41_s8 = int_to_ptr.vmem [resolvable:$true] %s40_s8 }
   0x7   :  { %43 = dma.hbm_to_vmem [thread:$0]  %s39_s28, 16, %s41_s8, [#allocation7]  }
   0x8   :  { %1221 = dma.done.wait [#allocation5], 3072  }
   0x9   :  { %1222 = vsyncadd [#allocation5], 4294964224 }
   0xa   :  { %1223 = dma.done.wait [#allocation7], 16  }
   0xb   :  { %1224 = vsyncadd [#allocation7], 4294967280  ;;  %v998_v0 = vld [vmem:[#allocation4 + $0xa8] sm:$0xf]  ;;  %v1076_v1 = vld [vmem:[#allocation4 + $0xb0] sm:$0xf0] }
   0xc   :  { %v1075_v2 = vld [vmem:[#allocation4 + $0xac] sm:$0xf]  ;;  %v1271_v3 = vor.u32 %v1076_v1, %v998_v0  ;;  %v1000_v4 = vld [vmem:[#allocation4 + $0xb4] sm:$0xf0]  ;;  %v986_v5 = vld [vmem:[#allocation4 + $0x90] sm:$0xf] }
   0xd   :  { %v1073_v6 = vld [vmem:[#allocation4 + $0x98] sm:$0xf0]  ;;  %v1273_v7 = vor.u32 %v1075_v2, %v1000_v4  ;;  %v1072_v8 = vld [vmem:[#allocation4 + $0x94] sm:$0xf]  ;;  %v988_v9 = vld [vmem:[#allocation4 + $0x9c] sm:$0xf0] }
   0xe   :  { %v1006_v10 = vld [vmem:[#allocation4 + $0xb0] sm:$0xf]  ;;  %223 = vmatpush.bf16.msra.mxu0 %v1271_v3  ;;  %v1276_v11 = vor.u32 %v1073_v6, %v986_v5  ;;  %v1077_v12 = vld [vmem:[#allocation4 + $0xb8] sm:$0xf0]  ;;  %300 = vmatpush.bf16.msra.mxu3 %v1271_v3  ;;  %v1280_v13 = vor.u32 %v1072_v8, %v988_v9  ;;  %v974_v15 = vld [vmem:[#allocation4 + $0x78] sm:$0xf] }
   0xf   :  { %236 = vmatpush.bf16.msra.mxu1 %v1273_v7  ;;  %v1282_v14 = vor.u32 %v1077_v12, %v1006_v10  ;;  %v1070_v16 = vld [vmem:[#allocation4 + $0x80] sm:$0xf0]  ;;  %v994_v17 = vld [vmem:[#allocation4 + $0x98] sm:$0xf]  ;;  %v1069_v18 = vld [vmem:[#allocation4 + $0x7c] sm:$0xf] }
  0x10   :  { %v976_v19 = vld [vmem:[#allocation4 + $0x84] sm:$0xf0]  ;;  %v1074_v20 = vld [vmem:[#allocation4 + $0xa0] sm:$0xf0]  ;;  %v1288_v22 = vor.u32 %v1070_v16, %v974_v15  ;;  %v982_v23 = vld [vmem:[#allocation4 + $0x80] sm:$0xf] }
  0x11   :  { %249 = vmatpush.bf16.msra.mxu2 %v1282_v14  ;;  %v1285_v21 = vor.u32 %v1074_v20, %v994_v17  ;;  %v1071_v24 = vld [vmem:[#allocation4 + $0x88] sm:$0xf0]  ;;  %v1292_v25 = vor.u32 %v1069_v18, %v976_v19  ;;  %v962_v26 = vld [vmem:[#allocation4 + $0x60] sm:$0xf]  ;;  %v1066_v28 = vld [vmem:[#allocation4 + $0x64] sm:$0xf] }
  0x12   :  { %224 = vmatpush.bf16.msra.mxu0 %v1276_v11  ;;  %301 = vmatpush.bf16.msra.mxu3 %v1276_v11  ;;  %v1067_v27 = vld [vmem:[#allocation4 + $0x68] sm:$0xf0]  ;;  %v964_v29 = vld [vmem:[#allocation4 + $0x6c] sm:$0xf0]  ;;  %v1295_v30 = vor.u32 %v1071_v24, %v982_v23  ;;  %v970_v32 = vld [vmem:[#allocation4 + $0x68] sm:$0xf] }
  0x13   :  { %237 = vmatpush.bf16.msra.mxu1 %v1280_v13  ;;  %v1298_v31 = vor.u32 %v1067_v27, %v962_v26  ;;  %v1068_v33 = vld [vmem:[#allocation4 + $0x70] sm:$0xf0]  ;;  %v1302_v34 = vor.u32 %v1066_v28, %v964_v29  ;;  %v950_v35 = vld [vmem:[#allocation4 + $0x48] sm:$0xf]  ;;  %v1063_v37 = vld [vmem:[#allocation4 + $0x4c] sm:$0xf] }
  0x14   :  { %v1064_v36 = vld [vmem:[#allocation4 + $0x50] sm:$0xf0]  ;;  %v952_v38 = vld [vmem:[#allocation4 + $0x54] sm:$0xf0]  ;;  %v1305_v39 = vor.u32 %v1068_v33, %v970_v32  ;;  %v938_v41 = vld [vmem:[#allocation4 + $0x30] sm:$0xf] }
  0x15   :  { %250 = vmatpush.bf16.msra.mxu2 %v1285_v21  ;;  %v1308_v40 = vor.u32 %v1064_v36, %v950_v35  ;;  %v958_v42 = vld [vmem:[#allocation4 + $0x50] sm:$0xf]  ;;  %v1065_v43 = vld [vmem:[#allocation4 + $0x58] sm:$0xf0]  ;;  %v1312_v44 = vor.u32 %v1063_v37, %v952_v38  ;;  %v1060_v46 = vld [vmem:[#allocation4 + $0x34] sm:$0xf] }
  0x16   :  { %225 = vmatpush.bf16.msra.mxu0 %v1288_v22  ;;  %302 = vmatpush.bf16.msra.mxu3 %v1288_v22  ;;  %v1061_v45 = vld [vmem:[#allocation4 + $0x38] sm:$0xf0]  ;;  %v940_v47 = vld [vmem:[#allocation4 + $0x3c] sm:$0xf0]  ;;  %v1315_v48 = vor.u32 %v1065_v43, %v958_v42  ;;  %v946_v50 = vld [vmem:[#allocation4 + $0x38] sm:$0xf] }
  0x17   :  { %238 = vmatpush.bf16.msra.mxu1 %v1292_v25  ;;  %v1318_v49 = vor.u32 %v1061_v45, %v938_v41  ;;  %v1062_v51 = vld [vmem:[#allocation4 + $0x40] sm:$0xf0]  ;;  %v1322_v52 = vor.u32 %v1060_v46, %v940_v47  ;;  %v926_v53 = vld [vmem:[#allocation4 + $0x18] sm:$0xf]  ;;  %v1057_v55 = vld [vmem:[#allocation4 + $0x1c] sm:$0xf] }
  0x18   :  { %v1058_v54 = vld [vmem:[#allocation4 + $0x20] sm:$0xf0]  ;;  %v928_v56 = vld [vmem:[#allocation4 + $0x24] sm:$0xf0]  ;;  %v1325_v57 = vor.u32 %v1062_v51, %v946_v50  ;;  %v934_v59 = vld [vmem:[#allocation4 + $0x20] sm:$0xf] }
  0x19   :  { %251 = vmatpush.bf16.msra.mxu2 %v1295_v30  ;;  %v1328_v58 = vor.u32 %v1058_v54, %v926_v53  ;;  %v1059_v60 = vld [vmem:[#allocation4 + $0x28] sm:$0xf0]  ;;  %v1332_v61 = vor.u32 %v1057_v55, %v928_v56  ;;  %v914_v62 = vld [vmem:[#allocation4] sm:$0xf]  ;;  %v1054_v0 = vld [vmem:[#allocation4 + $0x4] sm:$0xf] }
  0x1a   :  { %226 = vmatpush.bf16.msra.mxu0 %v1298_v31  ;;  %303 = vmatpush.bf16.msra.mxu3 %v1298_v31  ;;  %v1055_v63 = vld [vmem:[#allocation4 + $0x8] sm:$0xf0]  ;;  %v916_v1 = vld [vmem:[#allocation4 + $0xc] sm:$0xf0]  ;;  %v1335_v2 = vor.u32 %v1059_v60, %v934_v59  ;;  %v922_v5 = vld [vmem:[#allocation4 + $0x8] sm:$0xf] }
  0x1b   :  { %239 = vmatpush.bf16.msra.mxu1 %v1302_v34  ;;  %v1338_v4 = vor.u32 %v1055_v63, %v914_v62  ;;  %v1056_v6 = vld [vmem:[#allocation4 + $0x10] sm:$0xf0]  ;;  %v1342_v8 = vor.u32 %v1054_v0, %v916_v1  ;;  %v1229_v10 = vmov 0.0|0.0   ;;  %v92_v12 = vld [vmem:[%s1638_s0] sm:$0xff]  ;;  %v93_v43 = vld [vmem:[%s1638_s0 + $0x8] sm:$0xf] }
  0x1c   :  { %v1345_v9 = vor.u32 %v1056_v6, %v922_v5  ;;  %v270_v15 = vrot.slane %v92_v12, 4  ;;  %v262_v16 = vunpack.c.l.bf16 %v92_v12  ;;  %v1413_v38 = vld [vmem:[%s1640_s2] ss:$0 sm:$0xff]  ;;  %v284_v46 = vunpack.c.l.bf16 %v93_v43  ;;  %v1008_v63 = vld [vmem:[%s1638_s0 + $0xc] sm:$0xff] }
  0x1d   :  { %252 = vmatpush.bf16.msra.mxu2 %v1305_v39  ;;  %v347_v0 = vrot.slane %v1008_v63, 4 }
  0x1e   :  { %227 = vmatpush.bf16.msra.mxu0 %v1308_v40  ;;  %304 = vmatpush.bf16.msra.mxu3 %v1308_v40  ;;  %v272_v17 = vunpack.c.l.bf16 %v270_v15 }
  0x1f   :  { %240 = vmatpush.bf16.msra.mxu1 %v1312_v44  ;;  %v349_v5 = vunpack.c.l.bf16 %v347_v0 }
  0x21   :  { %253 = vmatpush.bf16.msra.mxu2 %v1315_v48 }
  0x22   :  { %228 = vmatpush.bf16.msra.mxu0 %v1318_v49  ;;  %305 = vmatpush.bf16.msra.mxu3 %v1318_v49 }
  0x23   :  { %241 = vmatpush.bf16.msra.mxu1 %v1322_v52 }
  0x25   :  { %254 = vmatpush.bf16.msra.mxu2 %v1325_v57 }
  0x26   :  { %229 = vmatpush.bf16.msra.mxu0 %v1328_v58  ;;  %306 = vmatpush.bf16.msra.mxu3 %v1328_v58 }
  0x27   :  { %242 = vmatpush.bf16.msra.mxu1 %v1332_v61 }
  0x29   :  { %255 = vmatpush.bf16.msra.mxu2 %v1335_v2 }
  0x2a   :  { %230 = vmatpush.bf16.msra.mxu0 %v1338_v4  ;;  %307 = vmatpush.bf16.msra.mxu3 %v1338_v4 }
  0x2b   :  { %243 = vmatpush.bf16.msra.mxu1 %v1342_v8 }
  0x2d   :  { %231 = vmatmul.bf16.vlgmr.msra.gmra.mxu0 %v1229_v10  ;;  %256 = vmatpush.bf16.msra.mxu2 %v1345_v9 }
  0x2e   :  { %313 = vmatpush.bf16.msrb.mxu0 %v1273_v7  ;;  %387 = vmatpush.bf16.msrb.mxu3 %v1273_v7 }
  0x2f   :  { %326 = vmatpush.bf16.msrb.mxu1 %v1282_v14 }
  0x30   :  { %244 = vmatmul.bf16.vlgmr.msra.gmra.mxu1 %v1229_v10  ;;  %257 = vmatmul.bf16.vlgmr.msra.gmra.mxu2 %v1229_v10  ;;  %v339_v10 = vunpack.c.l.bf16 %v1008_v63 }
  0x31   :  { %374 = vmatpush.bf16.msrb.mxu2 %v1271_v3 }
  0x32   :  { %314 = vmatpush.bf16.msrb.mxu0 %v1280_v13  ;;  %388 = vmatpush.bf16.msrb.mxu3 %v1280_v13 }
  0x33   :  { %327 = vmatpush.bf16.msrb.mxu1 %v1285_v21 }
  0x35   :  { %375 = vmatpush.bf16.msrb.mxu2 %v1276_v11 }
  0x36   :  { %315 = vmatpush.bf16.msrb.mxu0 %v1292_v25  ;;  %389 = vmatpush.bf16.msrb.mxu3 %v1292_v25 }
  0x37   :  { %328 = vmatpush.bf16.msrb.mxu1 %v1295_v30 }
  0x39   :  { %376 = vmatpush.bf16.msrb.mxu2 %v1288_v22 }
  0x3a   :  { %316 = vmatpush.bf16.msrb.mxu0 %v1302_v34  ;;  %390 = vmatpush.bf16.msrb.mxu3 %v1302_v34 }
  0x3b   :  { %329 = vmatpush.bf16.msrb.mxu1 %v1305_v39 }
  0x3d   :  { %377 = vmatpush.bf16.msrb.mxu2 %v1298_v31 }
  0x3e   :  { %317 = vmatpush.bf16.msrb.mxu0 %v1312_v44  ;;  %391 = vmatpush.bf16.msrb.mxu3 %v1312_v44 }
  0x3f   :  { %330 = vmatpush.bf16.msrb.mxu1 %v1315_v48 }
  0x41   :  { %378 = vmatpush.bf16.msrb.mxu2 %v1308_v40 }
  0x42   :  { %318 = vmatpush.bf16.msrb.mxu0 %v1322_v52  ;;  %392 = vmatpush.bf16.msrb.mxu3 %v1322_v52 }
  0x43   :  { %331 = vmatpush.bf16.msrb.mxu1 %v1325_v57 }
  0x45   :  { %379 = vmatpush.bf16.msrb.mxu2 %v1318_v49 }
  0x46   :  { %319 = vmatpush.bf16.msrb.mxu0 %v1332_v61  ;;  %393 = vmatpush.bf16.msrb.mxu3 %v1332_v61 }
  0x47   :  { %332 = vmatpush.bf16.msrb.mxu1 %v1335_v2 }
  0x49   :  { %380 = vmatpush.bf16.msrb.mxu2 %v1328_v58 }
  0x4a   :  { %320 = vmatpush.bf16.msrb.mxu0 %v1342_v8  ;;  %394 = vmatpush.bf16.msrb.mxu3 %v1342_v8 }
  0x4b   :  { %333 = vmatpush.bf16.msrb.mxu1 %v1345_v9 }
  0x4d   :  { %381 = vmatpush.bf16.msrb.mxu2 %v1338_v4 }
  0x4e   :  { %400 = vmatpush.bf16.msra.mxu0 %v1282_v14 }
  0x4f   :  { %448 = vmatpush.bf16.msra.mxu1 %v1271_v3 }
  0x51   :  { %461 = vmatpush.bf16.msra.mxu2 %v1273_v7 }
  0x52   :  { %401 = vmatpush.bf16.msra.mxu0 %v1285_v21 }
  0x53   :  { %449 = vmatpush.bf16.msra.mxu1 %v1276_v11 }
  0x55   :  { %462 = vmatpush.bf16.msra.mxu2 %v1280_v13 }
  0x56   :  { %402 = vmatpush.bf16.msra.mxu0 %v1295_v30 }
  0x57   :  { %450 = vmatpush.bf16.msra.mxu1 %v1288_v22 }
  0x59   :  { %463 = vmatpush.bf16.msra.mxu2 %v1292_v25 }
  0x5a   :  { %403 = vmatpush.bf16.msra.mxu0 %v1305_v39 }
  0x5b   :  { %451 = vmatpush.bf16.msra.mxu1 %v1298_v31 }
  0x5d   :  { %464 = vmatpush.bf16.msra.mxu2 %v1302_v34 }
  0x5e   :  { %404 = vmatpush.bf16.msra.mxu0 %v1315_v48 }
  0x5f   :  { %452 = vmatpush.bf16.msra.mxu1 %v1308_v40 }
  0x61   :  { %465 = vmatpush.bf16.msra.mxu2 %v1312_v44 }
  0x62   :  { %405 = vmatpush.bf16.msra.mxu0 %v1325_v57 }
  0x63   :  { %453 = vmatpush.bf16.msra.mxu1 %v1318_v49 }
  0x65   :  { %466 = vmatpush.bf16.msra.mxu2 %v1322_v52 }
  0x66   :  { %406 = vmatpush.bf16.msra.mxu0 %v1335_v2 }
  0x67   :  { %454 = vmatpush.bf16.msra.mxu1 %v1328_v58 }
  0x69   :  { %467 = vmatpush.bf16.msra.mxu2 %v1332_v61 }
  0x6a   :  { %407 = vmatpush.bf16.msra.mxu0 %v1345_v9 }
  0x6b   :  { %455 = vmatpush.bf16.msra.mxu1 %v1338_v4 }
  0x6d   :  { %468 = vmatpush.bf16.msra.mxu2 %v1342_v8 }
  0xaa   :  { %v232_v18 = vpop.f32.mrf.mxu0 }
  0xab   :  { %v263_v19 = vadd.f32 %v262_v16, %v232_v18 }
  0xad   :  { %v245_v20 = vpop.f32.mrf.mxu1  ;;  %v264_v24 = vsub.f32 0.0, %v263_v19 }
  0xae   :  { %v273_v23 = vadd.f32 %v272_v17, %v245_v20 }
  0xaf   :  { %v265_v27 = vmul.f32 1.442695, %v264_v24 }
  0xb0   :  { %v274_v26 = vsub.f32 0.0, %v273_v23 }
  0xb1   :  { %1093 = vpow2.f32 %v265_v27 }
  0xb2   :  { %v275_v28 = vmul.f32 1.442695, %v274_v26  ;;  %v234_v29 = vpop.f32.mrf.mxu0 }
  0xb3   :  { %v258_v33 = vpop.f32.mrf.mxu2 }
  0xb4   :  { %1095 = vpow2.f32 %v275_v28  ;;  %v282_v45 = vadd.f32 %v1413_v38, %v258_v33 }
  0xb5   :  { %v247_v32 = vpop.f32.mrf.mxu1 }
  0xb6   :  { %v1009_v32 = vld [vmem:[%s1638_s0 + $0x14] sm:$0xf] }
  0xb7   :  { %v1094_v35 = vpop.eup %1093 }
  0xb8   :  { %v267_v37 = vadd.f32 1.0, %v1094_v35 }
  0xba   :  { %v1096_v36 = vpop.eup %1095  ;;  %1097 = vrcp.f32 %v267_v37 }
  0xbb   :  { %v277_v41 = vadd.f32 1.0, %v1096_v36  ;;  %v260_v42 = vpop.f32.mrf.mxu2  ;;  %v358_v36 = vunpack.c.l.bf16 %v1009_v32 }
  0xbd   :  { %1099 = vrcp.f32 %v277_v41 }
  0xc0   :  { %v1098_v47 = vpop.eup %1097 }
  0xc1   :  { %v283_v50 = vmul.f32 %v1098_v47, %v282_v45 }
  0xc3   :  { %v285_v51 = vadd.f32 %v284_v46, %v283_v50  ;;  %v1100_v53 = vpop.eup %1099 }
  0xc4   :  { %v287_v54 = vsub.f32 1.0, %v1100_v53  ;;  %v289_v59 = vmul.f32 0.0, %v1100_v53 }
  0xc5   :  { %1101 = vtanh.f32 %v285_v51 }
  0xcb   :  { %v1102_v55 = vpop.eup %1101 }
  0xcc   :  { %v288_v56 = vmul.f32 %v1102_v55, %v287_v54  ;;  %v1010_v54 = vld [vmem:[%s1638_s0 + $0x18] sm:$0xff] }
  0xcd   :  { %v421_v55 = vrot.slane %v1010_v54, 4 }
  0xce   :  { %v1419_v60 = vadd.f32 %v289_v59, %v288_v56  ;;  %v413_v59 = vunpack.c.l.bf16 %v1010_v54 }
  0xd0   :  { %v299_v62 = vpack.c.bf16 %v1419_v60, %v1419_v60 }
  0xd2   :  { %308 = vmatmul.bf16.vlgmr.msra.gmra.mxu3 %v299_v62  ;;  %321 = vmatmul.bf16.vlgmr.msrb.gmra.mxu0 %v299_v62 }
  0xd3   :  { %334 = vmatmul.bf16.vlgmr.msrb.gmra.mxu1 %v299_v62  ;;  %474 = vmatpush.bf16.msra.mxu3 %v1282_v14  ;;  %v423_v62 = vunpack.c.l.bf16 %v421_v55 }
  0xd4   :  { %522 = vmatpush.bf16.msrb.mxu0 %v1271_v3  ;;  %535 = vmatpush.bf16.msrb.mxu1 %v1273_v7 }
  0xd7   :  { %475 = vmatpush.bf16.msra.mxu3 %v1285_v21 }
  0xd8   :  { %523 = vmatpush.bf16.msrb.mxu0 %v1276_v11  ;;  %536 = vmatpush.bf16.msrb.mxu1 %v1280_v13 }
  0xdb   :  { %476 = vmatpush.bf16.msra.mxu3 %v1295_v30 }
  0xdc   :  { %524 = vmatpush.bf16.msrb.mxu0 %v1288_v22  ;;  %537 = vmatpush.bf16.msrb.mxu1 %v1292_v25 }
  0xdf   :  { %477 = vmatpush.bf16.msra.mxu3 %v1305_v39 }
  0xe0   :  { %525 = vmatpush.bf16.msrb.mxu0 %v1298_v31  ;;  %538 = vmatpush.bf16.msrb.mxu1 %v1302_v34 }
  0xe3   :  { %478 = vmatpush.bf16.msra.mxu3 %v1315_v48 }
  0xe4   :  { %526 = vmatpush.bf16.msrb.mxu0 %v1308_v40  ;;  %539 = vmatpush.bf16.msrb.mxu1 %v1312_v44 }
  0xe7   :  { %479 = vmatpush.bf16.msra.mxu3 %v1325_v57 }
  0xe8   :  { %527 = vmatpush.bf16.msrb.mxu0 %v1318_v49  ;;  %540 = vmatpush.bf16.msrb.mxu1 %v1322_v52 }
  0xeb   :  { %480 = vmatpush.bf16.msra.mxu3 %v1335_v2 }
  0xec   :  { %528 = vmatpush.bf16.msrb.mxu0 %v1328_v58  ;;  %541 = vmatpush.bf16.msrb.mxu1 %v1332_v61 }
  0xef   :  { %481 = vmatpush.bf16.msra.mxu3 %v1345_v9 }
  0xf0   :  { %529 = vmatpush.bf16.msrb.mxu0 %v1338_v4  ;;  %542 = vmatpush.bf16.msrb.mxu1 %v1342_v8 }
 0x14f   :  { %v322_v1 = vpop.f32.mrf.mxu0 }
 0x150   :  { %v335_v6 = vpop.f32.mrf.mxu1  ;;  %v350_v12 = vadd.f32 %v349_v5, %v322_v1 }
 0x151   :  { %v356_v35 = vadd.f32 %v1413_v38, %v335_v6 }
 0x152   :  { %v351_v17 = vsub.f32 0.0, %v350_v12 }
 0x154   :  { %v352_v24 = vmul.f32 1.442695, %v351_v17 }
 0x155   :  { %v309_v15 = vpop.f32.mrf.mxu3 }
 0x156   :  { %v340_v16 = vadd.f32 %v339_v10, %v309_v15 }
 0x157   :  { %v324_v18 = vpop.f32.mrf.mxu0 }
 0x158   :  { %v341_v19 = vsub.f32 0.0, %v340_v16  ;;  %v337_v20 = vpop.f32.mrf.mxu1 }
 0x15a   :  { %v342_v23 = vmul.f32 1.442695, %v341_v19 }
 0x15c   :  { %1103 = vpow2.f32 %v342_v23 }
 0x15d   :  { %v311_v26 = vpop.f32.mrf.mxu3  ;;  %1105 = vpow2.f32 %v352_v24  ;;  %v1011_v24 = vld [vmem:[%s1638_s0 + $0x20] sm:$0xf] }
 0x162   :  { %v1104_v27 = vpop.eup %1103 }
 0x163   :  { %v344_v28 = vadd.f32 1.0, %v1104_v27  ;;  %v1106_v29 = vpop.eup %1105 }
 0x164   :  { %v354_v33 = vadd.f32 1.0, %v1106_v29 }
 0x165   :  { %1107 = vrcp.f32 %v344_v28  ;;  %v432_v28 = vunpack.c.l.bf16 %v1011_v24 }
 0x166   :  { %1109 = vrcp.f32 %v354_v33 }
 0x16b   :  { %v1108_v37 = vpop.eup %1107 }
 0x16c   :  { %v357_v41 = vmul.f32 %v1108_v37, %v356_v35  ;;  %v1110_v43 = vpop.eup %1109 }
 0x16d   :  { %v361_v45 = vsub.f32 1.0, %v1110_v43  ;;  %v363_v50 = vmul.f32 %v1110_v43, %v1419_v60 }
 0x16e   :  { %v359_v42 = vadd.f32 %v358_v36, %v357_v41 }
 0x170   :  { %1111 = vtanh.f32 %v359_v42 }
 0x176   :  { %v1112_v46 = vpop.eup %1111 }
 0x177   :  { %v362_v47 = vmul.f32 %v1112_v46, %v361_v45  ;;  %v1012_v46 = vld [vmem:[%s1638_s0 + $0x24] sm:$0xff] }
 0x179   :  { %v1455_v51 = vadd.f32 %v363_v50, %v362_v47  ;;  %v487_v47 = vunpack.c.l.bf16 %v1012_v46  ;;  %v495_v50 = vrot.slane %v1012_v46, 4  ;;  %v1015_v46 = vld [vmem:[%s1638_s0 + $0x38] sm:$0xf] }
 0x17b   :  { %v373_v53 = vpack.c.bf16 %v1455_v51, %v1455_v51 }
 0x17d   :  { %382 = vmatmul.bf16.vlgmr.msrb.gmra.mxu2 %v373_v53  ;;  %395 = vmatmul.bf16.vlgmr.msrb.gmra.mxu3 %v373_v53 }
 0x17e   :  { %408 = vmatmul.bf16.vlgmr.msra.gmra.mxu0 %v373_v53  ;;  %548 = vmatpush.bf16.msrb.mxu2 %v1282_v14 }
 0x17f   :  { %596 = vmatpush.bf16.msrb.mxu3 %v1271_v3  ;;  %609 = vmatpush.bf16.msra.mxu0 %v1273_v7 }
 0x182   :  { %549 = vmatpush.bf16.msrb.mxu2 %v1285_v21 }
 0x183   :  { %597 = vmatpush.bf16.msrb.mxu3 %v1276_v11  ;;  %610 = vmatpush.bf16.msra.mxu0 %v1280_v13 }
 0x186   :  { %550 = vmatpush.bf16.msrb.mxu2 %v1295_v30 }
 0x187   :  { %598 = vmatpush.bf16.msrb.mxu3 %v1288_v22  ;;  %611 = vmatpush.bf16.msra.mxu0 %v1292_v25 }
 0x18a   :  { %551 = vmatpush.bf16.msrb.mxu2 %v1305_v39 }
 0x18b   :  { %599 = vmatpush.bf16.msrb.mxu3 %v1298_v31  ;;  %612 = vmatpush.bf16.msra.mxu0 %v1302_v34 }
 0x18e   :  { %552 = vmatpush.bf16.msrb.mxu2 %v1315_v48 }
 0x18f   :  { %600 = vmatpush.bf16.msrb.mxu3 %v1308_v40  ;;  %613 = vmatpush.bf16.msra.mxu0 %v1312_v44 }
 0x192   :  { %553 = vmatpush.bf16.msrb.mxu2 %v1325_v57 }
 0x193   :  { %601 = vmatpush.bf16.msrb.mxu3 %v1318_v49  ;;  %614 = vmatpush.bf16.msra.mxu0 %v1322_v52 }
 0x196   :  { %554 = vmatpush.bf16.msrb.mxu2 %v1335_v2 }
 0x197   :  { %602 = vmatpush.bf16.msrb.mxu3 %v1328_v58  ;;  %615 = vmatpush.bf16.msra.mxu0 %v1332_v61 }
 0x19a   :  { %555 = vmatpush.bf16.msrb.mxu2 %v1345_v9 }
 0x19b   :  { %603 = vmatpush.bf16.msrb.mxu3 %v1338_v4  ;;  %616 = vmatpush.bf16.msra.mxu0 %v1342_v8 }
 0x1fb   :  { %v409_v56 = vpop.f32.mrf.mxu0 }
 0x1fc   :  { %v430_v27 = vadd.f32 %v1413_v38, %v409_v56  ;;  %v497_v56 = vunpack.c.l.bf16 %v495_v50 }
 0x200   :  { %v383_v63 = vpop.f32.mrf.mxu2  ;;  %v396_v0 = vpop.f32.mrf.mxu3 }
 0x201   :  { %v414_v1 = vadd.f32 %v413_v59, %v383_v63  ;;  %v424_v5 = vadd.f32 %v423_v62, %v396_v0 }
 0x203   :  { %v415_v6 = vsub.f32 0.0, %v414_v1  ;;  %v425_v10 = vsub.f32 0.0, %v424_v5  ;;  %v411_v12 = vpop.f32.mrf.mxu0 }
 0x205   :  { %v416_v15 = vmul.f32 1.442695, %v415_v6  ;;  %v426_v16 = vmul.f32 1.442695, %v425_v10 }
 0x207   :  { %1113 = vpow2.f32 %v416_v15 }
 0x208   :  { %v385_v17 = vpop.f32.mrf.mxu2  ;;  %v398_v18 = vpop.f32.mrf.mxu3  ;;  %1115 = vpow2.f32 %v426_v16 }
 0x209   :  { %v1013_v17 = vld [vmem:[%s1638_s0 + $0x2c] sm:$0xf] }
 0x20d   :  { %v1114_v19 = vpop.eup %1113 }
 0x20e   :  { %v418_v20 = vadd.f32 1.0, %v1114_v19  ;;  %v1116_v23 = vpop.eup %1115 }
 0x20f   :  { %v428_v26 = vadd.f32 1.0, %v1116_v23  ;;  %v506_v23 = vunpack.c.l.bf16 %v1013_v17 }
 0x210   :  { %1117 = vrcp.f32 %v418_v20 }
 0x211   :  { %1119 = vrcp.f32 %v428_v26 }
 0x216   :  { %v1118_v29 = vpop.eup %1117 }
 0x217   :  { %v431_v32 = vmul.f32 %v1118_v29, %v430_v27  ;;  %v1120_v35 = vpop.eup %1119 }
 0x218   :  { %v435_v36 = vsub.f32 1.0, %v1120_v35  ;;  %v437_v42 = vmul.f32 %v1120_v35, %v1455_v51 }
 0x219   :  { %v433_v33 = vadd.f32 %v432_v28, %v431_v32 }
 0x21b   :  { %1121 = vtanh.f32 %v433_v33 }
 0x221   :  { %v1122_v37 = vpop.eup %1121 }
 0x222   :  { %v436_v41 = vmul.f32 %v1122_v37, %v435_v36 }
 0x224   :  { %v1491_v43 = vadd.f32 %v437_v42, %v436_v41 }
 0x226   :  { %v447_v45 = vpack.c.bf16 %v1491_v43, %v1491_v43 }
 0x228   :  { %456 = vmatmul.bf16.vlgmr.msra.gmra.mxu1 %v447_v45  ;;  %469 = vmatmul.bf16.vlgmr.msra.gmra.mxu2 %v447_v45 }
 0x229   :  { %482 = vmatmul.bf16.vlgmr.msra.gmra.mxu3 %v447_v45  ;;  %622 = vmatpush.bf16.msra.mxu1 %v1282_v14 }
 0x22a   :  { %670 = vmatpush.bf16.msra.mxu2 %v1271_v3  ;;  %683 = vmatpush.bf16.msra.mxu3 %v1273_v7 }
 0x22d   :  { %623 = vmatpush.bf16.msra.mxu1 %v1285_v21 }
 0x22e   :  { %671 = vmatpush.bf16.msra.mxu2 %v1276_v11  ;;  %684 = vmatpush.bf16.msra.mxu3 %v1280_v13 }
 0x231   :  { %624 = vmatpush.bf16.msra.mxu1 %v1295_v30 }
 0x232   :  { %672 = vmatpush.bf16.msra.mxu2 %v1288_v22  ;;  %685 = vmatpush.bf16.msra.mxu3 %v1292_v25 }
 0x235   :  { %625 = vmatpush.bf16.msra.mxu1 %v1305_v39 }
 0x236   :  { %673 = vmatpush.bf16.msra.mxu2 %v1298_v31  ;;  %686 = vmatpush.bf16.msra.mxu3 %v1302_v34 }
 0x239   :  { %626 = vmatpush.bf16.msra.mxu1 %v1315_v48 }
 0x23a   :  { %674 = vmatpush.bf16.msra.mxu2 %v1308_v40  ;;  %687 = vmatpush.bf16.msra.mxu3 %v1312_v44 }
 0x23d   :  { %627 = vmatpush.bf16.msra.mxu1 %v1325_v57 }
 0x23e   :  { %675 = vmatpush.bf16.msra.mxu2 %v1318_v49  ;;  %688 = vmatpush.bf16.msra.mxu3 %v1322_v52 }
 0x241   :  { %628 = vmatpush.bf16.msra.mxu1 %v1335_v2 }
 0x242   :  { %676 = vmatpush.bf16.msra.mxu2 %v1328_v58  ;;  %689 = vmatpush.bf16.msra.mxu3 %v1332_v61 }
 0x245   :  { %629 = vmatpush.bf16.msra.mxu1 %v1345_v9 }
 0x246   :  { %677 = vmatpush.bf16.msra.mxu2 %v1338_v4  ;;  %690 = vmatpush.bf16.msra.mxu3 %v1342_v8 }
 0x2a5   :  { %v457_v53 = vpop.f32.mrf.mxu1 }
 0x2a6   :  { %v488_v54 = vadd.f32 %v487_v47, %v457_v53  ;;  %v580_v53 = vunpack.c.l.bf16 %v1015_v46 }
 0x2a8   :  { %v489_v55 = vsub.f32 0.0, %v488_v54 }
 0x2aa   :  { %v490_v59 = vmul.f32 1.442695, %v489_v55 }
 0x2ab   :  { %v470_v62 = vpop.f32.mrf.mxu2 }
 0x2ac   :  { %1123 = vpow2.f32 %v490_v59  ;;  %v498_v63 = vadd.f32 %v497_v56, %v470_v62  ;;  %v483_v0 = vpop.f32.mrf.mxu3 }
 0x2ad   :  { %v459_v1 = vpop.f32.mrf.mxu1  ;;  %v504_v20 = vadd.f32 %v1413_v38, %v483_v0 }
 0x2ae   :  { %v499_v5 = vsub.f32 0.0, %v498_v63 }
 0x2b0   :  { %v500_v6 = vmul.f32 1.442695, %v499_v5 }
 0x2b2   :  { %v1124_v10 = vpop.eup %1123  ;;  %1125 = vpow2.f32 %v500_v6 }
 0x2b3   :  { %v492_v12 = vadd.f32 1.0, %v1124_v10  ;;  %v472_v15 = vpop.f32.mrf.mxu2  ;;  %v1016_v10 = vld [vmem:[%s1638_s0 + $0x3c] sm:$0xff] }
 0x2b4   :  { %v485_v16 = vpop.f32.mrf.mxu3 }
 0x2b5   :  { %1127 = vrcp.f32 %v492_v12  ;;  %v643_v12 = vrot.slane %v1016_v10, 4  ;;  %v635_v16 = vunpack.c.l.bf16 %v1016_v10 }
 0x2b7   :  { %v645_v15 = vunpack.c.l.bf16 %v643_v12 }
 0x2b8   :  { %v1126_v18 = vpop.eup %1125 }
 0x2b9   :  { %v502_v19 = vadd.f32 1.0, %v1126_v18 }
 0x2bb   :  { %v1128_v24 = vpop.eup %1127  ;;  %1129 = vrcp.f32 %v502_v19 }
 0x2bc   :  { %v505_v26 = vmul.f32 %v1128_v24, %v504_v20 }
 0x2be   :  { %v507_v27 = vadd.f32 %v506_v23, %v505_v26 }
 0x2c0   :  { %1131 = vtanh.f32 %v507_v27  ;;  %v1017_v27 = vld [vmem:[%s1638_s0 + $0x44] sm:$0xf] }
 0x2c1   :  { %v1130_v28 = vpop.eup %1129 }
 0x2c2   :  { %v509_v29 = vsub.f32 1.0, %v1130_v28  ;;  %v511_v33 = vmul.f32 %v1130_v28, %v1491_v43 }
 0x2c6   :  { %v1132_v32 = vpop.eup %1131 }
 0x2c7   :  { %v510_v35 = vmul.f32 %v1132_v32, %v509_v29  ;;  %v654_v32 = vunpack.c.l.bf16 %v1017_v27  ;;  %v1079_v27 = vld [vmem:[%s1641_s3 + $0x8] sm:$0xff] }
 0x2c9   :  { %v1527_v36 = vadd.f32 %v511_v33, %v510_v35 }
 0x2cb   :  { %v521_v37 = vpack.c.bf16 %v1527_v36, %v1527_v36 }
 0x2cd   :  { %530 = vmatmul.bf16.vlgmr.msrb.gmra.mxu0 %v521_v37  ;;  %543 = vmatmul.bf16.vlgmr.msrb.gmra.mxu1 %v521_v37 }
 0x2ce   :  { %556 = vmatmul.bf16.vlgmr.msrb.gmra.mxu2 %v521_v37  ;;  %696 = vmatpush.bf16.msrb.mxu0 %v1282_v14 }
 0x2cf   :  { %744 = vmatpush.bf16.msrb.mxu1 %v1271_v3  ;;  %757 = vmatpush.bf16.msrb.mxu2 %v1273_v7  ;;  %v1014_v3 = vld [vmem:[%s1638_s0 + $0x30] sm:$0xff] }
 0x2d0   :  { %v569_v7 = vrot.slane %v1014_v3, 4 }
 0x2d2   :  { %697 = vmatpush.bf16.msrb.mxu0 %v1285_v21 }
 0x2d3   :  { %745 = vmatpush.bf16.msrb.mxu1 %v1276_v11  ;;  %758 = vmatpush.bf16.msrb.mxu2 %v1280_v13  ;;  %v561_v11 = vunpack.c.l.bf16 %v1014_v3  ;;  %v571_v13 = vunpack.c.l.bf16 %v569_v7 }
 0x2d6   :  { %698 = vmatpush.bf16.msrb.mxu0 %v1295_v30 }
 0x2d7   :  { %746 = vmatpush.bf16.msrb.mxu1 %v1288_v22  ;;  %759 = vmatpush.bf16.msrb.mxu2 %v1292_v25 }
 0x2da   :  { %699 = vmatpush.bf16.msrb.mxu0 %v1305_v39 }
 0x2db   :  { %747 = vmatpush.bf16.msrb.mxu1 %v1298_v31  ;;  %760 = vmatpush.bf16.msrb.mxu2 %v1302_v34 }
 0x2de   :  { %700 = vmatpush.bf16.msrb.mxu0 %v1315_v48 }
 0x2df   :  { %748 = vmatpush.bf16.msrb.mxu1 %v1308_v40  ;;  %761 = vmatpush.bf16.msrb.mxu2 %v1312_v44 }
 0x2e2   :  { %701 = vmatpush.bf16.msrb.mxu0 %v1325_v57 }
 0x2e3   :  { %749 = vmatpush.bf16.msrb.mxu1 %v1318_v49  ;;  %762 = vmatpush.bf16.msrb.mxu2 %v1322_v52 }
 0x2e6   :  { %702 = vmatpush.bf16.msrb.mxu0 %v1335_v2 }
 0x2e7   :  { %750 = vmatpush.bf16.msrb.mxu1 %v1328_v58  ;;  %763 = vmatpush.bf16.msrb.mxu2 %v1332_v61 }
 0x2ea   :  { %703 = vmatpush.bf16.msrb.mxu0 %v1345_v9 }
 0x2eb   :  { %751 = vmatpush.bf16.msrb.mxu1 %v1338_v4  ;;  %764 = vmatpush.bf16.msrb.mxu2 %v1342_v8 }
 0x34a   :  { %v531_v22 = vpop.f32.mrf.mxu0  ;;  %v544_v25 = vpop.f32.mrf.mxu1 }
 0x34b   :  { %v562_v31 = vadd.f32 %v561_v11, %v531_v22  ;;  %v572_v34 = vadd.f32 %v571_v13, %v544_v25 }
 0x34d   :  { %v563_v40 = vsub.f32 0.0, %v562_v31  ;;  %v573_v44 = vsub.f32 0.0, %v572_v34  ;;  %v1018_v34 = vld [vmem:[%s1638_s0 + $0x48] sm:$0xff] }
 0x34f   :  { %v564_v49 = vmul.f32 1.442695, %v563_v40  ;;  %v574_v52 = vmul.f32 1.442695, %v573_v44  ;;  %v717_v40 = vrot.slane %v1018_v34, 4 }
 0x351   :  { %1133 = vpow2.f32 %v564_v49  ;;  %v557_v58 = vpop.f32.mrf.mxu2  ;;  %v709_v49 = vunpack.c.l.bf16 %v1018_v34 }
 0x352   :  { %v533_v61 = vpop.f32.mrf.mxu0  ;;  %v546_v4 = vpop.f32.mrf.mxu1  ;;  %1135 = vpow2.f32 %v574_v52  ;;  %v578_v50 = vadd.f32 %v1413_v38, %v557_v58  ;;  %v719_v52 = vunpack.c.l.bf16 %v717_v40 }
 0x357   :  { %v1134_v8 = vpop.eup %1133 }
 0x358   :  { %v566_v41 = vadd.f32 1.0, %v1134_v8  ;;  %v1136_v45 = vpop.eup %1135 }
 0x359   :  { %v559_v42 = vpop.f32.mrf.mxu2  ;;  %v576_v47 = vadd.f32 1.0, %v1136_v45 }
 0x35a   :  { %1137 = vrcp.f32 %v566_v41 }
 0x35b   :  { %1139 = vrcp.f32 %v576_v47 }
 0x360   :  { %v1138_v54 = vpop.eup %1137 }
 0x361   :  { %v579_v55 = vmul.f32 %v1138_v54, %v578_v50  ;;  %v1140_v59 = vpop.eup %1139 }
 0x362   :  { %v583_v62 = vsub.f32 1.0, %v1140_v59  ;;  %v585_v0 = vmul.f32 %v1140_v59, %v1527_v36  ;;  %v1019_v59 = vld [vmem:[%s1638_s0 + $0x50] sm:$0xf] }
 0x363   :  { %v581_v56 = vadd.f32 %v580_v53, %v579_v55 }
 0x365   :  { %1141 = vtanh.f32 %v581_v56 }
 0x36b   :  { %v1142_v63 = vpop.eup %1141 }
 0x36c   :  { %v584_v1 = vmul.f32 %v1142_v63, %v583_v62 }
 0x36e   :  { %v1563_v5 = vadd.f32 %v585_v0, %v584_v1  ;;  %v728_v0 = vunpack.c.l.bf16 %v1019_v59 }
 0x370   :  { %v595_v6 = vpack.c.bf16 %v1563_v5, %v1563_v5 }
 0x372   :  { %604 = vmatmul.bf16.vlgmr.msrb.gmra.mxu3 %v595_v6  ;;  %617 = vmatmul.bf16.vlgmr.msra.gmra.mxu0 %v595_v6 }
 0x373   :  { %630 = vmatmul.bf16.vlgmr.msra.gmra.mxu1 %v595_v6  ;;  %770 = vmatpush.bf16.msrb.mxu3 %v1282_v14 }
 0x377   :  { %771 = vmatpush.bf16.msrb.mxu3 %v1285_v21 }
 0x37b   :  { %772 = vmatpush.bf16.msrb.mxu3 %v1295_v30 }
 0x37f   :  { %773 = vmatpush.bf16.msrb.mxu3 %v1305_v39 }
 0x383   :  { %774 = vmatpush.bf16.msrb.mxu3 %v1315_v48 }
 0x387   :  { %775 = vmatpush.bf16.msrb.mxu3 %v1325_v57 }
 0x38b   :  { %776 = vmatpush.bf16.msrb.mxu3 %v1335_v2 }
 0x38f   :  { %777 = vmatpush.bf16.msrb.mxu3 %v1345_v9 }
 0x3ef   :  { %v618_v14 = vpop.f32.mrf.mxu0 }
 0x3f0   :  { %v631_v21 = vpop.f32.mrf.mxu1  ;;  %v646_v30 = vadd.f32 %v645_v15, %v618_v14 }
 0x3f1   :  { %v652_v29 = vadd.f32 %v1413_v38, %v631_v21 }
 0x3f2   :  { %v647_v18 = vsub.f32 0.0, %v646_v30 }
 0x3f4   :  { %v648_v2 = vmul.f32 1.442695, %v647_v18  ;;  %v1084_v18 = vld [vmem:[%s1641_s3 + $0x30] sm:$0xff] }
 0x3f5   :  { %v605_v17 = vpop.f32.mrf.mxu3 }
 0x3f6   :  { %v636_v39 = vadd.f32 %v635_v16, %v605_v17 }
 0x3f7   :  { %v620_v48 = vpop.f32.mrf.mxu0 }
 0x3f8   :  { %v637_v19 = vsub.f32 0.0, %v636_v39  ;;  %v633_v57 = vpop.f32.mrf.mxu1  ;;  %v1085_v39 = vld [vmem:[%s1641_s3 + $0x38] sm:$0xff]  ;;  %v1083_v48 = vld [vmem:[%s1641_s3 + $0x28] sm:$0xff] }
 0x3f9   :  { %888 = vmatpush.bf16.msra.mxu0 %v1085_v39  ;;  %v1020_v57 = vld [vmem:[%s1638_s0 + $0x54] sm:$0xff] }
 0x3fa   :  { %v638_v20 = vmul.f32 1.442695, %v637_v19  ;;  %v1082_v19 = vld [vmem:[%s1641_s3 + $0x20] sm:$0xff] }
 0x3fc   :  { %1143 = vpow2.f32 %v638_v20  ;;  %v1081_v20 = vld [vmem:[%s1641_s3 + $0x18] sm:$0xff] }
 0x3fd   :  { %v607_v9 = vpop.f32.mrf.mxu3  ;;  %1145 = vpow2.f32 %v648_v2  ;;  %889 = vmatpush.bf16.msra.mxu0 %v1084_v18  ;;  %v783_v2 = vunpack.c.l.bf16 %v1020_v57 }
 0x3fe   :  { %v791_v9 = vrot.slane %v1020_v57, 4 }
 0x401   :  { %890 = vmatpush.bf16.msra.mxu0 %v1083_v48 }
 0x402   :  { %v1144_v23 = vpop.eup %1143 }
 0x403   :  { %v640_v24 = vadd.f32 1.0, %v1144_v23  ;;  %v1146_v26 = vpop.eup %1145 }
 0x404   :  { %v650_v28 = vadd.f32 1.0, %v1146_v26 }
 0x405   :  { %1147 = vrcp.f32 %v640_v24  ;;  %891 = vmatpush.bf16.msra.mxu0 %v1082_v19  ;;  %v1080_v24 = vld [vmem:[%s1641_s3 + $0x10] sm:$0xff] }
 0x406   :  { %1149 = vrcp.f32 %v650_v28 }
 0x409   :  { %892 = vmatpush.bf16.msra.mxu0 %v1081_v20 }
 0x40b   :  { %v1148_v33 = vpop.eup %1147 }
 0x40c   :  { %v653_v35 = vmul.f32 %v1148_v33, %v652_v29  ;;  %v1150_v3 = vpop.eup %1149  ;;  %v793_v29 = vunpack.c.l.bf16 %v791_v9 }
 0x40d   :  { %v657_v7 = vsub.f32 1.0, %v1150_v3  ;;  %v659_v13 = vmul.f32 %v1150_v3, %v1563_v5  ;;  %893 = vmatpush.bf16.msra.mxu0 %v1080_v24 }
 0x40e   :  { %v655_v37 = vadd.f32 %v654_v32, %v653_v35  ;;  %v1078_v35 = vld [vmem:[%s1641_s3] sm:$0xff] }
 0x410   :  { %1151 = vtanh.f32 %v655_v37 }
 0x411   :  { %894 = vmatpush.bf16.msra.mxu0 %v1079_v27 }
 0x415   :  { %895 = vmatpush.bf16.msra.mxu0 %v1078_v35 }
 0x416   :  { %v1152_v11 = vpop.eup %1151 }
 0x417   :  { %v658_v22 = vmul.f32 %v1152_v11, %v657_v7 }
 0x419   :  { %v1583_v25 = vadd.f32 %v659_v13, %v658_v22 }
 0x41b   :  { %v669_v31 = vpack.c.bf16 %v1583_v25, %v1583_v25 }
 0x41d   :  { %678 = vmatmul.bf16.vlgmr.msra.gmra.mxu2 %v669_v31  ;;  %691 = vmatmul.bf16.vlgmr.msra.gmra.mxu3 %v669_v31 }
 0x41e   :  { %704 = vmatmul.bf16.vlgmr.msrb.gmra.mxu0 %v669_v31 }
 0x49b   :  { %v705_v44 = vpop.f32.mrf.mxu0 }
 0x49c   :  { %v726_v63 = vadd.f32 %v1413_v38, %v705_v44  ;;  %v1021_v44 = vld [vmem:[%s1638_s0 + $0x5c] sm:$0xf] }
 0x4a0   :  { %v679_v58 = vpop.f32.mrf.mxu2  ;;  %v692_v61 = vpop.f32.mrf.mxu3 }
 0x4a1   :  { %v710_v4 = vadd.f32 %v709_v49, %v679_v58  ;;  %v720_v8 = vadd.f32 %v719_v52, %v692_v61  ;;  %v802_v61 = vunpack.c.l.bf16 %v1021_v44 }
 0x4a3   :  { %v711_v41 = vsub.f32 0.0, %v710_v4  ;;  %v721_v42 = vsub.f32 0.0, %v720_v8  ;;  %v707_v45 = vpop.f32.mrf.mxu0 }
 0x4a5   :  { %v712_v46 = vmul.f32 1.442695, %v711_v41  ;;  %v722_v47 = vmul.f32 1.442695, %v721_v42  ;;  %v366_v42 = vadd.f32 %v1455_v51, %v1419_v60  ;;  %v1092_v51 = vld [vmem:[#allocation6] ss:$0 sm:$0xff] }
 0x4a7   :  { %1153 = vpow2.f32 %v712_v46  ;;  %v440_v45 = vadd.f32 %v1491_v43, %v366_v42 }
 0x4a8   :  { %v681_v50 = vpop.f32.mrf.mxu2  ;;  %v694_v53 = vpop.f32.mrf.mxu3  ;;  %1155 = vpow2.f32 %v722_v47 }
 0x4a9   :  { %v514_v47 = vadd.f32 %v1527_v36, %v440_v45 }
 0x4ab   :  { %v588_v53 = vadd.f32 %v1563_v5, %v514_v47 }
 0x4ad   :  { %v1154_v54 = vpop.eup %1153 }
 0x4ae   :  { %v714_v55 = vadd.f32 1.0, %v1154_v54  ;;  %v1156_v56 = vpop.eup %1155 }
 0x4af   :  { %v724_v62 = vadd.f32 1.0, %v1156_v56  ;;  %v662_v56 = vadd.f32 %v1583_v25, %v588_v53 }
 0x4b0   :  { %1157 = vrcp.f32 %v714_v55 }
 0x4b1   :  { %1159 = vrcp.f32 %v724_v62 }
 0x4b6   :  { %v1158_v1 = vpop.eup %1157 }
 0x4b7   :  { %v727_v6 = vmul.f32 %v1158_v1, %v726_v63  ;;  %v1160_v12 = vpop.eup %1159 }
 0x4b8   :  { %v731_v14 = vsub.f32 1.0, %v1160_v12  ;;  %v733_v16 = vmul.f32 %v1160_v12, %v1583_v25 }
 0x4b9   :  { %v729_v10 = vadd.f32 %v728_v0, %v727_v6 }
 0x4bb   :  { %1161 = vtanh.f32 %v729_v10 }
 0x4c1   :  { %v1162_v15 = vpop.eup %1161 }
 0x4c2   :  { %v732_v21 = vmul.f32 %v1162_v15, %v731_v14 }
 0x4c4   :  { %v734_v30 = vadd.f32 %v733_v16, %v732_v21 }
 0x4c6   :  { %v743_v17 = vpack.c.bf16 %v734_v30, %v734_v30  ;;  %v736_v59 = vadd.f32 %v734_v30, %v662_v56 }
 0x4c8   :  { %752 = vmatmul.bf16.vlgmr.msrb.gmra.mxu1 %v743_v17  ;;  %765 = vmatmul.bf16.vlgmr.msrb.gmra.mxu2 %v743_v17 }
 0x4c9   :  { %778 = vmatmul.bf16.vlgmr.msrb.gmra.mxu3 %v743_v17 }
 0x545   :  { %v753_v23 = vpop.f32.mrf.mxu1 }
 0x546   :  { %v784_v26 = vadd.f32 %v783_v2, %v753_v23 }
 0x548   :  { %v785_v28 = vsub.f32 0.0, %v784_v26 }
 0x54a   :  { %v786_v32 = vmul.f32 1.442695, %v785_v28 }
 0x54b   :  { %v766_v33 = vpop.f32.mrf.mxu2 }
 0x54c   :  { %1163 = vpow2.f32 %v786_v32  ;;  %v794_v37 = vadd.f32 %v793_v29, %v766_v33  ;;  %v779_v3 = vpop.f32.mrf.mxu3 }
 0x54d   :  { %v755_v7 = vpop.f32.mrf.mxu1  ;;  %v800_v58 = vadd.f32 %v1413_v38, %v779_v3 }
 0x54e   :  { %v795_v11 = vsub.f32 0.0, %v794_v37 }
 0x550   :  { %v796_v13 = vmul.f32 1.442695, %v795_v11 }
 0x552   :  { %v1164_v22 = vpop.eup %1163  ;;  %1165 = vpow2.f32 %v796_v13 }
 0x553   :  { %v788_v31 = vadd.f32 1.0, %v1164_v22  ;;  %v768_v34 = vpop.f32.mrf.mxu2 }
 0x554   :  { %v781_v40 = vpop.f32.mrf.mxu3 }
 0x555   :  { %1167 = vrcp.f32 %v788_v31 }
 0x558   :  { %v1166_v49 = vpop.eup %1165 }
 0x559   :  { %v798_v52 = vadd.f32 1.0, %v1166_v49 }
 0x55b   :  { %v1168_v4 = vpop.eup %1167  ;;  %1169 = vrcp.f32 %v798_v52 }
 0x55c   :  { %v801_v8 = vmul.f32 %v1168_v4, %v800_v58 }
 0x55e   :  { %v803_v41 = vadd.f32 %v802_v61, %v801_v8 }
 0x560   :  { %1171 = vtanh.f32 %v803_v41 }
 0x561   :  { %v1170_v46 = vpop.eup %1169 }
 0x562   :  { %v805_v50 = vsub.f32 1.0, %v1170_v46  ;;  %v807_v55 = vmul.f32 %v1170_v46, %v734_v30 }
 0x566   :  { %v1172_v54 = vpop.eup %1171 }
 0x567   :  { %v806_v38 = vmul.f32 %v1172_v54, %v805_v50 }
 0x569   :  { %v808_v62 = vadd.f32 %v807_v55, %v806_v38 }
 0x56b   :  { %v810_v63 = vadd.f32 %v808_v62, %v736_v59 }
 0x56d   :  { %v817_v0 = vmul.f32 0.125, %v810_v63 }
 0x56f   :  { %818 = vst [vmem:[%s1644_s6] sm:$0xff] %v817_v0  ;;  %v819_v60 = vpack.c.bf16 %v817_v0, %v817_v0 }
 0x571   :  { %896 = vmatmul.bf16.vlgmr.msra.gmra.mxu0 %v819_v60 }
 0x5ee   :  { %v897_v43 = vpop.f32.mrf.mxu0 }
 0x5ef   :  { %v898_v36 = vadd.f32 %v1092_v51, %v897_v43 }
 0x5f1   :  { %901 = vst [vmem:[%s1643_s5] sm:$0xff] %v898_v36 }
 0x5f6   :  { %v899_v5 = vpop.f32.mrf.mxu0 }
 0x5f7   :  { %910 = vsyncpa [#allocation5], 1 }
 0x5f8   :  { %911 = vsyncpa [#allocation7], 1 }

</bundles_post_ra>
